<compile_context>
chip_gen: v7x
topology: tpu7x:2x2x1
jax: 0.10.0
libtpu: 0.0.40
codegen_flags: <defaults>
</compile_context>

<pallas_src>
import functools
import math

import jax
import jax.numpy as jnp
from jax import lax
from jax.experimental import pallas as pl
from jax.experimental.pallas import tpu as pltpu

EPS = 1e-7       # the undefined global `eps` in dvae.py
BETA = 1.0
BN_EPS = 1e-5    # torch BatchNorm1d default eps
LANE = 128
VMEM_LIMIT_BYTES = 32 * 1024 * 1024   # explicit budget (safe on v7x's 64 MiB VMEM)


def _ceil_to(n, m):
    return (n + m - 1) // m * m


def _pad2(a, shape):
    return jnp.pad(a, ((0, shape[0] - a.shape[0]), (0, shape[1] - a.shape[1])))


# ---------------------------------------------------------------------------
# Fused kernel: grid = (phase, batch_tile)
#   phase 0: encoder fc1 into VMEM scratch
#   phase 1: BN (stats at tile 0) + relu + efc2 + reparam + decoder + ent + p_ph
# ---------------------------------------------------------------------------
def _dvae_fused_kernel(lmask_ref, x_ref, u_ref,
                       we1_ref, be1_ref, g1_ref, bb1_ref,
                       we2_ref, be2_ref, wd1_ref, bd1_ref,
                       wd3_ref, bd3_ref, wbm_ref, bbm_ref,
                       xr_ref, ent_ref, pph_ref,
                       h_sc, scale_sc, shift_sc, *, inv_b):
    phase = pl.program_id(0)
    i = pl.program_id(1)

    # ---------------- phase 0: fc1, h kept on-chip ----------------
    @pl.when(phase == 0)
    def _encode_fc1():
        h = jnp.dot(x_ref[...], we1_ref[...],
                    preferred_element_type=jnp.float32) + be1_ref[...]
        h_sc[i] = h

    # ---------------- phase 1: everything else ----------------
    @pl.when(phase == 1)
    def _rest():
        # Exact training-mode BatchNorm stats (centered variance) from the f32
        # h scratch, folded into per-column scale/shift once per forward pass.
        @pl.when(i == 0)
        def _bn_stats_and_init():
            h_all = h_sc[...]                                   # (nb, tb, Hp) f32
            mu = jnp.sum(jnp.sum(h_all, axis=1), axis=0, keepdims=True) * inv_b
            diff = h_all - mu                                   # broadcast (1, Hp)
            var = jnp.sum(jnp.sum(diff * diff, axis=1), axis=0,
                          keepdims=True) * inv_b
            scale = g1_ref[...] * lax.rsqrt(var + BN_EPS)       # (1, Hp)
            scale_sc[...] = scale
            shift_sc[...] = bb1_ref[...] - mu * scale
            ent_ref[...] = jnp.zeros_like(ent_ref)
            pph_ref[...] = jnp.zeros_like(pph_ref)

        # BN + ReLU
        h = jnp.maximum(h_sc[i] * scale_sc[...] + shift_sc[...], 0.0)

        # efc2 -> sigmoid -> q  (latent halves packed into one 128-lane block)
        q = jax.nn.sigmoid(
            jnp.dot(h.astype(jnp.bfloat16), we2_ref[...],
                    preferred_element_type=jnp.float32) + be2_ref[...])

        # spike-and-exponential reparameterization
        # (padded lanes: u=0 -> u+q-1 <= 0 -> z=0, zeta=0)
        u = u_ref[...]
        t = u + q - 1.0
        z = (t > 0.0).astype(jnp.float32)
        zeta = jnp.log(jnp.maximum(t, 0.0)
                       * pl.reciprocal(q + EPS, approx=True)
                       * (math.exp(BETA) - 1.0) + 1.0) * (1.0 / BETA)

        # decoder: dfc1 -> relu -> dfc3 -> sigmoid
        hd = jnp.maximum(
            jnp.dot(zeta.astype(jnp.bfloat16), wd1_ref[...],
                    preferred_element_type=jnp.float32) + bd1_ref[...], 0.0)
        xr_ref[...] = jax.nn.sigmoid(
            jnp.dot(hd.astype(jnp.bfloat16), wd3_ref[...],
                    preferred_element_type=jnp.float32) + bd3_ref[...])

        # entropy: padded latent lanes (q=0.5) masked out by the constant lane mask
        sel = jnp.where(z < 0.5, 1.0 - q, q)
        ent_tile = -jnp.sum(jnp.log(sel + EPS) * lmask_ref[...],
                            axis=(0, 1), keepdims=True)

        # Boltzmann prior: (z @ W_shifted) * z sums to z1·W·z2ᵀ; b-term on the VPU.
        pair = jnp.dot(z.astype(jnp.bfloat16), wbm_ref[...],
                       preferred_element_type=jnp.float32) * z
        lin = z * bbm_ref[...]
        pph_tile = (jnp.sum(pair, axis=(0, 1), keepdims=True)
                    + jnp.sum(lin, axis=(0, 1), keepdims=True))

        ent_ref[...] += ent_tile
        pph_ref[...] += pph_tile


# ---------------------------------------------------------------------------
# Forward wrapper
# ---------------------------------------------------------------------------
def dvae_forward(x, u, params, *, tb=256):
    # tb=256 fills the 256-wide MXU on v6e/v7x; use tb=128 on v5e if desired.
    B, D = x.shape
    h_dim = params["we1"].shape[1]
    z_dim = params["wbm"].shape[0]

    Dp = _ceil_to(D, LANE)
    Hp = _ceil_to(h_dim, LANE)
    Zp2 = _ceil_to(2 * z_dim, LANE)   # BOTH latent halves packed into one lane block

    tb = min(tb, B)
    assert B % tb == 0, "batch must be divisible by the batch tile"
    nb = B // tb

    f32, bf16 = jnp.float32, jnp.bfloat16

    # ---- pad + cast inputs/parameters (padded entries are exactly zero) ----
    # Correctness relies on: u padding == 0 and We2/be2/b/W padding == 0 so that
    # z = 0 and zeta = 0 on padded latent lanes.
    x_p = _pad2(x.astype(f32), (B, Dp)).astype(bf16)   # bf16 streaming of x
    u_p = _pad2(u.astype(f32), (B, Zp2))

    we1 = _pad2(params["we1"], (Dp, Hp)).astype(bf16)
    be1 = _pad2(params["be1"].reshape(1, -1), (1, Hp)).astype(f32)
    g1 = _pad2(params["g1"].reshape(1, -1), (1, Hp)).astype(f32)
    bb1 = _pad2(params["bb1"].reshape(1, -1), (1, Hp)).astype(f32)

    we2 = _pad2(params["we2"], (Hp, Zp2)).astype(bf16)
    be2 = _pad2(params["be2"].reshape(1, -1), (1, Zp2)).astype(f32)

    wd1 = _pad2(params["wd1"], (Zp2, Hp)).astype(bf16)
    bd1 = _pad2(params["bd1"].reshape(1, -1), (1, Hp)).astype(f32)
    wd3 = _pad2(params["wd3"], (Hp, Dp)).astype(bf16)
    bd3 = _pad2(params["bd3"].reshape(1, -1), (1, Dp)).astype(f32)

    # Column-shifted Boltzmann W: W_s[i, z_dim + j] = W[i, j], zero elsewhere, so the
    # packed latent z = (z1 | z2 | 0...) gives sum((z @ W_s) * z) = sum(z1·W·z2ᵀ).
    wbm_s = jnp.pad(params["wbm"],
                    ((0, Zp2 - z_dim), (z_dim, Zp2 - 2 * z_dim))).astype(bf16)
    bbm = _pad2(params["bbm"].reshape(1, -1), (1, Zp2)).astype(f32)

    # Entropy lane mask built ONCE (padded latent lanes carry q=0.5 -> masked out).
    lmask = (jnp.arange(Zp2) < 2 * z_dim).astype(f32).reshape(1, Zp2)

    kernel = functools.partial(_dvae_fused_kernel, inv_b=1.0 / B)
    cparams = pltpu.CompilerParams(
        dimension_semantics=("arbitrary", "arbitrary"),
        vmem_limit_bytes=VMEM_LIMIT_BYTES)

    const = lambda p, i: (0, 0)   # weights/biases/mask: VMEM-resident (DMA'd once)
    tile = lambda p, i: (i, 0)    # batch-streamed tiles

    xr_p, ent, pph = pl.pallas_call(
        kernel,
        grid=(2, nb),
        in_specs=[
            pl.BlockSpec((1, Zp2), const),        # entropy lane mask
            pl.BlockSpec((tb, Dp), tile),         # x tile (bf16, streamed)
            pl.BlockSpec((tb, Zp2), tile),        # u tile (streamed)
            pl.BlockSpec((Dp, Hp), const),        # We1
            pl.BlockSpec((1, Hp), const),         # be1
            pl.BlockSpec((1, Hp), const),         # BN gamma
            pl.BlockSpec((1, Hp), const),         # BN beta
            pl.BlockSpec((Hp, Zp2), const),       # We2
            pl.BlockSpec((1, Zp2), const),        # be2
            pl.BlockSpec((Zp2, Hp), const),       # Wd1
            pl.BlockSpec((1, Hp), const),         # bd1
            pl.BlockSpec((Hp, Dp), const),        # Wd3
            pl.BlockSpec((1, Dp), const),         # bd3
            pl.BlockSpec((Zp2, Zp2), const),      # W (shifted Boltzmann)
            pl.BlockSpec((1, Zp2), const),        # b (Boltzmann, row vector)
        ],
        out_specs=(
            pl.BlockSpec((tb, Dp), tile),         # x_reconst tile
            pl.BlockSpec((1, 1), const),          # ent  (accumulator)
            pl.BlockSpec((1, 1), const),          # p_ph (accumulator)
        ),
        out_shape=(
            jax.ShapeDtypeStruct((B, Dp), jnp.float32),
            jax.ShapeDtypeStruct((1, 1), jnp.float32),
            jax.ShapeDtypeStruct((1, 1), jnp.float32),
        ),
        scratch_shapes=[
            pltpu.VMEM((nb, tb, Hp), jnp.float32),   # h kept on-chip (no HBM trip)
            pltpu.VMEM((1, Hp), jnp.float32),        # BN scale
            pltpu.VMEM((1, Hp), jnp.float32),        # BN shift
        ],
        compiler_params=cparams,
    )(lmask, x_p, u_p, we1, be1, g1, bb1, we2, be2, wd1, bd1, wd3, bd3, wbm_s, bbm)

    return xr_p[:, :D], ent[0, 0], pph[0, 0]


# ---------------- pure-JAX reference (mirrors the torch forward; bf16 matmul inputs
#                  to match the kernel's MXU precision) ----------------
def dvae_reference(x, u, p):
    def mm(a, w):
        return jnp.dot(a.astype(jnp.bfloat16), w.astype(jnp.bfloat16),
                       preferred_element_type=jnp.float32)

    h = mm(x, p["we1"]) + p["be1"]
    mu = h.mean(0, keepdims=True)
    var = ((h - mu) ** 2).mean(0, keepdims=True)
    hn = jnp.maximum((h - mu) * lax.rsqrt(var + BN_EPS) * p["g1"] + p["bb1"], 0.0)
    q = jax.nn.sigmoid(mm(hn, p["we2"]) + p["be2"])
    t = u + q - 1.0
    z = (t > 0.0).astype(jnp.float32)
    zeta = jnp.log(jnp.maximum(t, 0.0) / (q + EPS) * (math.exp(BETA) - 1.0) + 1.0) / BETA
    hd = jnp.maximum(mm(zeta, p["wd1"]) + p["bd1"], 0.0)
    xr = jax.nn.sigmoid(mm(hd, p["wd3"]) + p["bd3"])
    ent = -jnp.sum(jnp.log(jnp.where(z < 0.5, 1.0 - q, q) + EPS))
    zd = p["wbm"].shape[0]
    pph = jnp.sum(mm(z[:, :zd], p["wbm"]) * z[:, zd:]) + jnp.sum(z * p["bbm"])
    return xr, ent, pph


def init_params(key, image_size, h_dim, z_dim):
    """Deterministic init mimicking the module's shapes (kaiming-uniform-ish)."""
    ks = jax.random.split(key, 10)

    def ku(k, fan_in, shape):
        bound = math.sqrt(6.0 / fan_in)
        return jax.random.uniform(k, shape, jnp.float32, -bound, bound)

    return {
        "we1": ku(ks[0], image_size, (image_size, h_dim)),
        "be1": ku(ks[1], image_size, (h_dim,)),
        "g1": jnp.ones((h_dim,), jnp.float32),                 # BN weight
        "bb1": jnp.zeros((h_dim,), jnp.float32),               # BN bias
        "we2": ku(ks[2], h_dim, (h_dim, 2 * z_dim)),
        "be2": ku(ks[3], h_dim, (2 * z_dim,)),
        "wd1": ku(ks[4], 2 * z_dim, (2 * z_dim, h_dim)),
        "bd1": ku(ks[5], 2 * z_dim, (h_dim,)),
        "wd3": ku(ks[6], h_dim, (h_dim, image_size)),
        "bd3": ku(ks[7], h_dim, (image_size,)),
        "wbm": ku(ks[8], z_dim, (z_dim, z_dim)),               # nn.Parameter W
        "bbm": 0.01 * jax.random.normal(ks[9], (2 * z_dim,), jnp.float32),  # b
    }


if __name__ == "__main__":
    # numh=1, beta=1.0; B=256 (single 256-row tile on v6e/v7x-sized MXUs).
    B, IMAGE_SIZE, H_DIM, Z_DIM = 256, 64, 32, 8

    key = jax.random.PRNGKey(0)
    k_param, k_x, k_u = jax.random.split(key, 3)

    params = init_params(k_param, IMAGE_SIZE, H_DIM, Z_DIM)
    x = jax.random.uniform(k_x, (B, IMAGE_SIZE), jnp.float32)
    u = jax.random.uniform(k_u, (B, 2 * Z_DIM), jnp.float32)   # torch.rand(q.shape)

    fwd = jax.jit(dvae_forward)
    xr, ent, pph = jax.block_until_ready(fwd(x, u, params))
    xr_ref, ent_ref, pph_ref = dvae_reference(x, u, params)

    assert xr.shape == (B, IMAGE_SIZE)
    # xr tolerance covers bf16 MXU inputs plus the EUP approx-reciprocal in zeta
    # (~2^-12 relative) propagated through the two decoder matmuls.
    assert jnp.allclose(xr, xr_ref, atol=8e-3, rtol=4e-3)
    # ent / p_ph are sums of O(B*2Z) terms including a hard threshold on u+q-1;
    # modest absolute slack covers accumulation-order / rare threshold flips.
    assert jnp.allclose(ent, ent_ref, atol=2.0, rtol=2e-3)
    assert jnp.allclose(pph, pph_ref, atol=5.0, rtol=2e-3)

    print("KERNEL_OK")
</pallas_src>

<mosaic_0001>
module attributes {stable_mosaic.version = 11 : i64} {
  func.func @_dvae_fused_kernel(%arg0: i32, %arg1: i32, %arg2: memref<1x128xf32, #tpu.memory_space<vmem>>, %arg3: memref<256x128xbf16, #tpu.memory_space<vmem>>, %arg4: memref<256x128xf32, #tpu.memory_space<vmem>>, %arg5: memref<128x128xbf16, #tpu.memory_space<vmem>>, %arg6: memref<1x128xf32, #tpu.memory_space<vmem>>, %arg7: memref<1x128xf32, #tpu.memory_space<vmem>>, %arg8: memref<1x128xf32, #tpu.memory_space<vmem>>, %arg9: memref<128x128xbf16, #tpu.memory_space<vmem>>, %arg10: memref<1x128xf32, #tpu.memory_space<vmem>>, %arg11: memref<128x128xbf16, #tpu.memory_space<vmem>>, %arg12: memref<1x128xf32, #tpu.memory_space<vmem>>, %arg13: memref<128x128xbf16, #tpu.memory_space<vmem>>, %arg14: memref<1x128xf32, #tpu.memory_space<vmem>>, %arg15: memref<128x128xbf16, #tpu.memory_space<vmem>>, %arg16: memref<1x128xf32, #tpu.memory_space<vmem>>, %arg17: memref<256x128xf32, #tpu.memory_space<vmem>>, %arg18: memref<1x1xf32, #tpu.memory_space<vmem>>, %arg19: memref<1x1xf32, #tpu.memory_space<vmem>>, %arg20: memref<1x256x128xf32, #tpu.memory_space<vmem>>, %arg21: memref<1x128xf32, #tpu.memory_space<vmem>>, %arg22: memref<1x128xf32, #tpu.memory_space<vmem>>) attributes {dimension_semantics = [#tpu.dimension_semantics<arbitrary>, #tpu.dimension_semantics<arbitrary>], iteration_bounds = array<i64: 2, 1>, scalar_prefetch = 0 : i64, scratch_operands = 3 : i64, tpu.core_type = #tpu.core_type<tc>, window_params = [{pipeline_mode = #tpu.pipeline_mode<synchronous>, transform_indices = @transform_0, window_bounds = array<i64: 1, 128>}, {transform_indices = @transform_1, window_bounds = array<i64: 256, 128>}, {transform_indices = @transform_2, window_bounds = array<i64: 256, 128>}, {pipeline_mode = #tpu.pipeline_mode<synchronous>, transform_indices = @transform_3, window_bounds = array<i64: 128, 128>}, {pipeline_mode = #tpu.pipeline_mode<synchronous>, transform_indices = @transform_4, window_bounds = array<i64: 1, 128>}, {pipeline_mode = #tpu.pipeline_mode<synchronous>, transform_indices = @transform_5, window_bounds = array<i64: 1, 128>}, {pipeline_mode = #tpu.pipeline_mode<synchronous>, transform_indices = @transform_6, window_bounds = array<i64: 1, 128>}, {pipeline_mode = #tpu.pipeline_mode<synchronous>, transform_indices = @transform_7, window_bounds = array<i64: 128, 128>}, {pipeline_mode = #tpu.pipeline_mode<synchronous>, transform_indices = @transform_8, window_bounds = array<i64: 1, 128>}, {pipeline_mode = #tpu.pipeline_mode<synchronous>, transform_indices = @transform_9, window_bounds = array<i64: 128, 128>}, {pipeline_mode = #tpu.pipeline_mode<synchronous>, transform_indices = @transform_10, window_bounds = array<i64: 1, 128>}, {pipeline_mode = #tpu.pipeline_mode<synchronous>, transform_indices = @transform_11, window_bounds = array<i64: 128, 128>}, {pipeline_mode = #tpu.pipeline_mode<synchronous>, transform_indices = @transform_12, window_bounds = array<i64: 1, 128>}, {pipeline_mode = #tpu.pipeline_mode<synchronous>, transform_indices = @transform_13, window_bounds = array<i64: 128, 128>}, {pipeline_mode = #tpu.pipeline_mode<synchronous>, transform_indices = @transform_14, window_bounds = array<i64: 1, 128>}, {transform_indices = @transform_15, window_bounds = array<i64: 256, 128>}, {pipeline_mode = #tpu.pipeline_mode<synchronous>, transform_indices = @transform_16, window_bounds = array<i64: 1, 1>}, {pipeline_mode = #tpu.pipeline_mode<synchronous>, transform_indices = @transform_17, window_bounds = array<i64: 1, 1>}]} {
    %c0_i32 = arith.constant 0 : i32
    %0 = arith.cmpi eq, %arg0, %c0_i32 : i32
    %1 = arith.extui %0 : i1 to i32
    %c0_i32_0 = arith.constant 0 : i32
    %2 = arith.cmpi ne, %1, %c0_i32_0 : i32
    scf.if %2 {
      %c0 = arith.constant 0 : index
      %c0_2 = arith.constant 0 : index
      %6 = vector.load %arg3[%c0, %c0_2] : memref<256x128xbf16, #tpu.memory_space<vmem>>, vector<256x128xbf16>
      %c0_3 = arith.constant 0 : index
      %c0_4 = arith.constant 0 : index
      %7 = vector.load %arg5[%c0_3, %c0_4] : memref<128x128xbf16, #tpu.memory_space<vmem>>, vector<128x128xbf16>
      %cst = arith.constant dense<0.000000e+00> : vector<256x128xf32>
      %8 = tpu.matmul %6, %7, %cst {dimension_numbers = #tpu.dot_dimension_numbers<[1], [0], [0], [1], [0, 0, 1, 1], [], []>} : vector<256x128xbf16>, vector<128x128xbf16>, vector<256x128xf32> -> vector<256x128xf32>
      %c0_5 = arith.constant 0 : index
      %c0_6 = arith.constant 0 : index
      %9 = vector.load %arg6[%c0_5, %c0_6] : memref<1x128xf32, #tpu.memory_space<vmem>>, vector<1x128xf32>
      %10 = vector.broadcast %9 : vector<1x128xf32> to vector<256x128xf32>
      %11 = arith.addf %8, %10 : vector<256x128xf32>
      %12 = arith.index_cast %arg1 : i32 to index
      %c0_7 = arith.constant 0 : index
      %c0_8 = arith.constant 0 : index
      %13 = vector.load %arg20[%12, %c0_7, %c0_8] : memref<1x256x128xf32, #tpu.memory_space<vmem>>, vector<1x256x128xf32>
      %14 = vector.shape_cast %13 : vector<1x256x128xf32> to vector<256x128xf32>
      %15 = vector.shape_cast %11 : vector<256x128xf32> to vector<1x256x128xf32>
      tpu.vector_store %arg20[%12, %c0_7, %c0_8], %15 {strides = array<i32>} : memref<1x256x128xf32, #tpu.memory_space<vmem>>, vector<1x256x128xf32>,
    } else {
    }
    %c1_i32 = arith.constant 1 : i32
    %3 = arith.cmpi eq, %arg0, %c1_i32 : i32
    %4 = arith.extui %3 : i1 to i32
    %c0_i32_1 = arith.constant 0 : i32
    %5 = arith.cmpi ne, %4, %c0_i32_1 : i32
    scf.if %5 {
      %c0_i32_2 = arith.constant 0 : i32
      %6 = arith.cmpi eq, %arg1, %c0_i32_2 : i32
      %7 = arith.extui %6 : i1 to i32
      %c0_i32_3 = arith.constant 0 : i32
      %8 = arith.cmpi ne, %7, %c0_i32_3 : i32
      scf.if %8 {
        %c0_60 = arith.constant 0 : index
        %c0_61 = arith.constant 0 : index
        %c0_62 = arith.constant 0 : index
        %114 = vector.load %arg20[%c0_60, %c0_61, %c0_62] : memref<1x256x128xf32, #tpu.memory_space<vmem>>, vector<1x256x128xf32>
        %cst_63 = arith.constant dense<0.000000e+00> : vector<1x128xf32>
        %115 = vector.multi_reduction <add>, %114, %cst_63 [1] : vector<1x256x128xf32> to vector<1x128xf32>
        %cst_64 = arith.constant dense<0.000000e+00> : vector<128xf32>
        %116 = vector.multi_reduction <add>, %115, %cst_64 [0] : vector<1x128xf32> to vector<128xf32>
        %117 = vector.shape_cast %116 : vector<128xf32> to vector<1x128xf32>
        %cst_65 = arith.constant 3.906250e-03 : f32
        %118 = vector.broadcast %cst_65 : f32 to vector<1x128xf32>
        %119 = arith.mulf %117, %118 : vector<1x128xf32>
        %120 = vector.shape_cast %119 : vector<1x128xf32> to vector<1x1x128xf32>
        %121 = vector.broadcast %120 : vector<1x1x128xf32> to vector<1x256x128xf32>
        %122 = arith.subf %114, %121 : vector<1x256x128xf32>
        %123 = arith.mulf %122, %122 : vector<1x256x128xf32>
        %cst_66 = arith.constant dense<0.000000e+00> : vector<1x128xf32>
        %124 = vector.multi_reduction <add>, %123, %cst_66 [1] : vector<1x256x128xf32> to vector<1x128xf32>
        %cst_67 = arith.constant dense<0.000000e+00> : vector<128xf32>
        %125 = vector.multi_reduction <add>, %124, %cst_67 [0] : vector<1x128xf32> to vector<128xf32>
        %126 = vector.shape_cast %125 : vector<128xf32> to vector<1x128xf32>
        %cst_68 = arith.constant 3.906250e-03 : f32
        %127 = vector.broadcast %cst_68 : f32 to vector<1x128xf32>
        %128 = arith.mulf %126, %127 : vector<1x128xf32>
        %c0_69 = arith.constant 0 : index
        %c0_70 = arith.constant 0 : index
        %129 = vector.load %arg7[%c0_69, %c0_70] : memref<1x128xf32, #tpu.memory_space<vmem>>, vector<1x128xf32>
        %cst_71 = arith.constant 9.99999974E-6 : f32
        %130 = vector.broadcast %cst_71 : f32 to vector<1x128xf32>
        %131 = arith.addf %128, %130 : vector<1x128xf32>
        %132 = math.rsqrt %131 : vector<1x128xf32>
        %133 = arith.mulf %129, %132 : vector<1x128xf32>
        %c0_72 = arith.constant 0 : index
        %c0_73 = arith.constant 0 : index
        %134 = vector.load %arg21[%c0_72, %c0_73] : memref<1x128xf32, #tpu.memory_space<vmem>>, vector<1x128xf32>
        tpu.vector_store %arg21[%c0_72, %c0_73], %133 {strides = array<i32>} : memref<1x128xf32, #tpu.memory_space<vmem>>, vector<1x128xf32>,
        %c0_74 = arith.constant 0 : index
        %c0_75 = arith.constant 0 : index
        %135 = vector.load %arg8[%c0_74, %c0_75] : memref<1x128xf32, #tpu.memory_space<vmem>>, vector<1x128xf32>
        %136 = arith.mulf %119, %133 : vector<1x128xf32>
        %137 = arith.subf %135, %136 : vector<1x128xf32>
        %c0_76 = arith.constant 0 : index
        %c0_77 = arith.constant 0 : index
        %138 = vector.load %arg22[%c0_76, %c0_77] : memref<1x128xf32, #tpu.memory_space<vmem>>, vector<1x128xf32>
        tpu.vector_store %arg22[%c0_76, %c0_77], %137 {strides = array<i32>} : memref<1x128xf32, #tpu.memory_space<vmem>>, vector<1x128xf32>,
        %cst_78 = arith.constant 0.000000e+00 : f32
        %139 = vector.broadcast %cst_78 : f32 to vector<1x1xf32>
        %c0_79 = arith.constant 0 : index
        %c0_80 = arith.constant 0 : index
        %140 = vector.load %arg18[%c0_79, %c0_80] : memref<1x1xf32, #tpu.memory_space<vmem>>, vector<1x1xf32>
        tpu.vector_store %arg18[%c0_79, %c0_80], %139 {strides = array<i32>} : memref<1x1xf32, #tpu.memory_space<vmem>>, vector<1x1xf32>,
        %cst_81 = arith.constant 0.000000e+00 : f32
        %141 = vector.broadcast %cst_81 : f32 to vector<1x1xf32>
        %c0_82 = arith.constant 0 : index
        %c0_83 = arith.constant 0 : index
        %142 = vector.load %arg19[%c0_82, %c0_83] : memref<1x1xf32, #tpu.memory_space<vmem>>, vector<1x1xf32>
        tpu.vector_store %arg19[%c0_82, %c0_83], %141 {strides = array<i32>} : memref<1x1xf32, #tpu.memory_space<vmem>>, vector<1x1xf32>,
      } else {
      }
      %9 = arith.index_cast %arg1 : i32 to index
      %c0 = arith.constant 0 : index
      %c0_4 = arith.constant 0 : index
      %10 = vector.load %arg20[%9, %c0, %c0_4] : memref<1x256x128xf32, #tpu.memory_space<vmem>>, vector<1x256x128xf32>
      %11 = vector.shape_cast %10 : vector<1x256x128xf32> to vector<256x128xf32>
      %c0_5 = arith.constant 0 : index
      %c0_6 = arith.constant 0 : index
      %12 = vector.load %arg21[%c0_5, %c0_6] : memref<1x128xf32, #tpu.memory_space<vmem>>, vector<1x128xf32>
      %13 = vector.broadcast %12 : vector<1x128xf32> to vector<256x128xf32>
      %14 = arith.mulf %11, %13 : vector<256x128xf32>
      %c0_7 = arith.constant 0 : index
      %c0_8 = arith.constant 0 : index
      %15 = vector.load %arg22[%c0_7, %c0_8] : memref<1x128xf32, #tpu.memory_space<vmem>>, vector<1x128xf32>
      %16 = vector.broadcast %15 : vector<1x128xf32> to vector<256x128xf32>
      %17 = arith.addf %14, %16 : vector<256x128xf32>
      %cst = arith.constant 0.000000e+00 : f32
      %18 = vector.broadcast %cst : f32 to vector<256x128xf32>
      %19 = arith.maximumf %17, %18 : vector<256x128xf32>
      %20 = arith.truncf %19 : vector<256x128xf32> to vector<256x128xbf16>
      %c0_9 = arith.constant 0 : index
      %c0_10 = arith.constant 0 : index
      %21 = vector.load %arg9[%c0_9, %c0_10] : memref<128x128xbf16, #tpu.memory_space<vmem>>, vector<128x128xbf16>
      %cst_11 = arith.constant dense<0.000000e+00> : vector<256x128xf32>
      %22 = tpu.matmul %20, %21, %cst_11 {dimension_numbers = #tpu.dot_dimension_numbers<[1], [0], [0], [1], [0, 0, 1, 1], [], []>} : vector<256x128xbf16>, vector<128x128xbf16>, vector<256x128xf32> -> vector<256x128xf32>
      %c0_12 = arith.constant 0 : index
      %c0_13 = arith.constant 0 : index
      %23 = vector.load %arg10[%c0_12, %c0_13] : memref<1x128xf32, #tpu.memory_space<vmem>>, vector<1x128xf32>
      %24 = vector.broadcast %23 : vector<1x128xf32> to vector<256x128xf32>
      %25 = arith.addf %22, %24 : vector<256x128xf32>
      %26 = arith.negf %25 : vector<256x128xf32>
      %27 = math.exp %26 : vector<256x128xf32>
      %cst_14 = arith.constant 1.000000e+00 : f32
      %28 = vector.broadcast %cst_14 : f32 to vector<256x128xf32>
      %29 = arith.addf %28, %27 : vector<256x128xf32>
      %30 = arith.divf %28, %29 : vector<256x128xf32>
      %c0_15 = arith.constant 0 : index
      %c0_16 = arith.constant 0 : index
      %31 = vector.load %arg4[%c0_15, %c0_16] : memref<256x128xf32, #tpu.memory_space<vmem>>, vector<256x128xf32>
      %32 = arith.addf %31, %30 : vector<256x128xf32>
      %cst_17 = arith.constant 1.000000e+00 : f32
      %33 = vector.broadcast %cst_17 : f32 to vector<256x128xf32>
      %34 = arith.subf %32, %33 : vector<256x128xf32>
      %cst_18 = arith.constant 0.000000e+00 : f32
      %35 = vector.broadcast %cst_18 : f32 to vector<256x128xf32>
      %36 = arith.cmpf ogt, %34, %35 : vector<256x128xf32>
      %37 = arith.extui %36 : vector<256x128xi1> to vector<256x128xi32>
      %38 = arith.sitofp %37 : vector<256x128xi32> to vector<256x128xf32>
      %cst_19 = arith.constant 0.000000e+00 : f32
      %39 = vector.broadcast %cst_19 : f32 to vector<256x128xf32>
      %40 = arith.maximumf %34, %39 : vector<256x128xf32>
      %cst_20 = arith.constant 1.000000e-07 : f32
      %41 = vector.broadcast %cst_20 : f32 to vector<256x128xf32>
      %42 = arith.addf %30, %41 : vector<256x128xf32>
      %43 = tpu.reciprocal %42 {approx = true} : vector<256x128xf32> -> vector<256x128xf32>
      %44 = arith.mulf %40, %43 : vector<256x128xf32>
      %cst_21 = arith.constant 1.71828187 : f32
      %45 = vector.broadcast %cst_21 : f32 to vector<256x128xf32>
      %46 = arith.mulf %44, %45 : vector<256x128xf32>
      %cst_22 = arith.constant 1.000000e+00 : f32
      %47 = vector.broadcast %cst_22 : f32 to vector<256x128xf32>
      %48 = arith.addf %46, %47 : vector<256x128xf32>
      %49 = math.log %48 : vector<256x128xf32>
      %cst_23 = arith.constant 1.000000e+00 : f32
      %50 = vector.broadcast %cst_23 : f32 to vector<256x128xf32>
      %51 = arith.mulf %49, %50 : vector<256x128xf32>
      %52 = arith.truncf %51 : vector<256x128xf32> to vector<256x128xbf16>
      %c0_24 = arith.constant 0 : index
      %c0_25 = arith.constant 0 : index
      %53 = vector.load %arg11[%c0_24, %c0_25] : memref<128x128xbf16, #tpu.memory_space<vmem>>, vector<128x128xbf16>
      %cst_26 = arith.constant dense<0.000000e+00> : vector<256x128xf32>
      %54 = tpu.matmul %52, %53, %cst_26 {dimension_numbers = #tpu.dot_dimension_numbers<[1], [0], [0], [1], [0, 0, 1, 1], [], []>} : vector<256x128xbf16>, vector<128x128xbf16>, vector<256x128xf32> -> vector<256x128xf32>
      %c0_27 = arith.constant 0 : index
      %c0_28 = arith.constant 0 : index
      %55 = vector.load %arg12[%c0_27, %c0_28] : memref<1x128xf32, #tpu.memory_space<vmem>>, vector<1x128xf32>
      %56 = vector.broadcast %55 : vector<1x128xf32> to vector<256x128xf32>
      %57 = arith.addf %54, %56 : vector<256x128xf32>
      %cst_29 = arith.constant 0.000000e+00 : f32
      %58 = vector.broadcast %cst_29 : f32 to vector<256x128xf32>
      %59 = arith.maximumf %57, %58 : vector<256x128xf32>
      %60 = arith.truncf %59 : vector<256x128xf32> to vector<256x128xbf16>
      %c0_30 = arith.constant 0 : index
      %c0_31 = arith.constant 0 : index
      %61 = vector.load %arg13[%c0_30, %c0_31] : memref<128x128xbf16, #tpu.memory_space<vmem>>, vector<128x128xbf16>
      %cst_32 = arith.constant dense<0.000000e+00> : vector<256x128xf32>
      %62 = tpu.matmul %60, %61, %cst_32 {dimension_numbers = #tpu.dot_dimension_numbers<[1], [0], [0], [1], [0, 0, 1, 1], [], []>} : vector<256x128xbf16>, vector<128x128xbf16>, vector<256x128xf32> -> vector<256x128xf32>
      %c0_33 = arith.constant 0 : index
      %c0_34 = arith.constant 0 : index
      %63 = vector.load %arg14[%c0_33, %c0_34] : memref<1x128xf32, #tpu.memory_space<vmem>>, vector<1x128xf32>
      %64 = vector.broadcast %63 : vector<1x128xf32> to vector<256x128xf32>
      %65 = arith.addf %62, %64 : vector<256x128xf32>
      %66 = arith.negf %65 : vector<256x128xf32>
      %67 = math.exp %66 : vector<256x128xf32>
      %cst_35 = arith.constant 1.000000e+00 : f32
      %68 = vector.broadcast %cst_35 : f32 to vector<256x128xf32>
      %69 = arith.addf %68, %67 : vector<256x128xf32>
      %70 = arith.divf %68, %69 : vector<256x128xf32>
      %c0_36 = arith.constant 0 : index
      %c0_37 = arith.constant 0 : index
      %71 = vector.load %arg17[%c0_36, %c0_37] : memref<256x128xf32, #tpu.memory_space<vmem>>, vector<256x128xf32>
      tpu.vector_store %arg17[%c0_36, %c0_37], %70 {strides = array<i32>} : memref<256x128xf32, #tpu.memory_space<vmem>>, vector<256x128xf32>,
      %cst_38 = arith.constant 5.000000e-01 : f32
      %72 = vector.broadcast %cst_38 : f32 to vector<256x128xf32>
      %73 = arith.cmpf olt, %38, %72 : vector<256x128xf32>
      %cst_39 = arith.constant 1.000000e+00 : f32
      %74 = vector.broadcast %cst_39 : f32 to vector<256x128xf32>
      %75 = arith.subf %74, %30 : vector<256x128xf32>
      %76 = arith.select %73, %75, %30 : vector<256x128xi1>, vector<256x128xf32>
      %cst_40 = arith.constant 1.000000e-07 : f32
      %77 = vector.broadcast %cst_40 : f32 to vector<256x128xf32>
      %78 = arith.addf %76, %77 : vector<256x128xf32>
      %79 = math.log %78 : vector<256x128xf32>
      %c0_41 = arith.constant 0 : index
      %c0_42 = arith.constant 0 : index
      %80 = vector.load %arg2[%c0_41, %c0_42] : memref<1x128xf32, #tpu.memory_space<vmem>>, vector<1x128xf32>
      %81 = vector.broadcast %80 : vector<1x128xf32> to vector<256x128xf32>
      %82 = arith.mulf %79, %81 : vector<256x128xf32>
      %83 = vector.shape_cast %82 : vector<256x128xf32> to vector<1x256x128xf32>
      %cst_43 = arith.constant dense<0.000000e+00> : vector<1xf32>
      %84 = vector.multi_reduction <add>, %83, %cst_43 [1, 2] : vector<1x256x128xf32> to vector<1xf32>
      %85 = vector.shape_cast %84 : vector<1xf32> to vector<1x1x1xf32>
      %86 = vector.extract %85[0, 0, 0] : f32 from vector<1x1x1xf32>
      %87 = vector.broadcast %86 : f32 to vector<1x1xf32>
      %cst_44 = arith.constant 0.000000e+00 : f32
      %88 = vector.broadcast %cst_44 : f32 to vector<1x1xf32>
      %89 = arith.subf %88, %87 : vector<1x1xf32>
      %90 = arith.truncf %38 : vector<256x128xf32> to vector<256x128xbf16>
      %c0_45 = arith.constant 0 : index
      %c0_46 = arith.constant 0 : index
      %91 = vector.load %arg15[%c0_45, %c0_46] : memref<128x128xbf16, #tpu.memory_space<vmem>>, vector<128x128xbf16>
      %cst_47 = arith.constant dense<0.000000e+00> : vector<256x128xf32>
      %92 = tpu.matmul %90, %91, %cst_47 {dimension_numbers = #tpu.dot_dimension_numbers<[1], [0], [0], [1], [0, 0, 1, 1], [], []>} : vector<256x128xbf16>, vector<128x128xbf16>, vector<256x128xf32> -> vector<256x128xf32>
      %93 = arith.mulf %92, %38 : vector<256x128xf32>
      %c0_48 = arith.constant 0 : index
      %c0_49 = arith.constant 0 : index
      %94 = vector.load %arg16[%c0_48, %c0_49] : memref<1x128xf32, #tpu.memory_space<vmem>>, vector<1x128xf32>
      %95 = vector.broadcast %94 : vector<1x128xf32> to vector<256x128xf32>
      %96 = arith.mulf %38, %95 : vector<256x128xf32>
      %97 = vector.shape_cast %93 : vector<256x128xf32> to vector<1x256x128xf32>
      %cst_50 = arith.constant dense<0.000000e+00> : vector<1xf32>
      %98 = vector.multi_reduction <add>, %97, %cst_50 [1, 2] : vector<1x256x128xf32> to vector<1xf32>
      %99 = vector.shape_cast %98 : vector<1xf32> to vector<1x1x1xf32>
      %100 = vector.extract %99[0, 0, 0] : f32 from vector<1x1x1xf32>
      %101 = vector.broadcast %100 : f32 to vector<1x1xf32>
      %102 = vector.shape_cast %96 : vector<256x128xf32> to vector<1x256x128xf32>
      %cst_51 = arith.constant dense<0.000000e+00> : vector<1xf32>
      %103 = vector.multi_reduction <add>, %102, %cst_51 [1, 2] : vector<1x256x128xf32> to vector<1xf32>
      %104 = vector.shape_cast %103 : vector<1xf32> to vector<1x1x1xf32>
      %105 = vector.extract %104[0, 0, 0] : f32 from vector<1x1x1xf32>
      %106 = vector.broadcast %105 : f32 to vector<1x1xf32>
      %107 = arith.addf %101, %106 : vector<1x1xf32>
      %c0_52 = arith.constant 0 : index
      %c0_53 = arith.constant 0 : index
      %108 = vector.load %arg18[%c0_52, %c0_53] : memref<1x1xf32, #tpu.memory_space<vmem>>, vector<1x1xf32>
      %109 = arith.addf %108, %89 : vector<1x1xf32>
      %c0_54 = arith.constant 0 : index
      %c0_55 = arith.constant 0 : index
      %110 = vector.load %arg18[%c0_54, %c0_55] : memref<1x1xf32, #tpu.memory_space<vmem>>, vector<1x1xf32>
      tpu.vector_store %arg18[%c0_54, %c0_55], %109 {strides = array<i32>} : memref<1x1xf32, #tpu.memory_space<vmem>>, vector<1x1xf32>,
      %c0_56 = arith.constant 0 : index
      %c0_57 = arith.constant 0 : index
      %111 = vector.load %arg19[%c0_56, %c0_57] : memref<1x1xf32, #tpu.memory_space<vmem>>, vector<1x1xf32>
      %112 = arith.addf %111, %107 : vector<1x1xf32>
      %c0_58 = arith.constant 0 : index
      %c0_59 = arith.constant 0 : index
      %113 = vector.load %arg19[%c0_58, %c0_59] : memref<1x1xf32, #tpu.memory_space<vmem>>, vector<1x1xf32>
      tpu.vector_store %arg19[%c0_58, %c0_59], %112 {strides = array<i32>} : memref<1x1xf32, #tpu.memory_space<vmem>>, vector<1x1xf32>,
    } else {
    }
    return
  }
  func.func @transform_0(%arg0: i32, %arg1: i32) -> (i32, i32) {
    %c0_i32 = arith.constant 0 : i32
    %c0_i32_0 = arith.constant 0 : i32
    %c0_i32_1 = arith.constant 0 : i32
    return %c0_i32, %c0_i32_0 : i32, i32
  }
  func.func @transform_1(%arg0: i32, %arg1: i32) -> (i32, i32) {
    %c0_i32 = arith.constant 0 : i32
    %c0_i32_0 = arith.constant 0 : i32
    return %arg1, %c0_i32 : i32, i32
  }
  func.func @transform_2(%arg0: i32, %arg1: i32) -> (i32, i32) {
    %c0_i32 = arith.constant 0 : i32
    %c0_i32_0 = arith.constant 0 : i32
    return %arg1, %c0_i32 : i32, i32
  }
  func.func @transform_3(%arg0: i32, %arg1: i32) -> (i32, i32) {
    %c0_i32 = arith.constant 0 : i32
    %c0_i32_0 = arith.constant 0 : i32
    %c0_i32_1 = arith.constant 0 : i32
    return %c0_i32, %c0_i32_0 : i32, i32
  }
  func.func @transform_4(%arg0: i32, %arg1: i32) -> (i32, i32) {
    %c0_i32 = arith.constant 0 : i32
    %c0_i32_0 = arith.constant 0 : i32
    %c0_i32_1 = arith.constant 0 : i32
    return %c0_i32, %c0_i32_0 : i32, i32
  }
  func.func @transform_5(%arg0: i32, %arg1: i32) -> (i32, i32) {
    %c0_i32 = arith.constant 0 : i32
    %c0_i32_0 = arith.constant 0 : i32
    %c0_i32_1 = arith.constant 0 : i32
    return %c0_i32, %c0_i32_0 : i32, i32
  }
  func.func @transform_6(%arg0: i32, %arg1: i32) -> (i32, i32) {
    %c0_i32 = arith.constant 0 : i32
    %c0_i32_0 = arith.constant 0 : i32
    %c0_i32_1 = arith.constant 0 : i32
    return %c0_i32, %c0_i32_0 : i32, i32
  }
  func.func @transform_7(%arg0: i32, %arg1: i32) -> (i32, i32) {
    %c0_i32 = arith.constant 0 : i32
    %c0_i32_0 = arith.constant 0 : i32
    %c0_i32_1 = arith.constant 0 : i32
    return %c0_i32, %c0_i32_0 : i32, i32
  }
  func.func @transform_8(%arg0: i32, %arg1: i32) -> (i32, i32) {
    %c0_i32 = arith.constant 0 : i32
    %c0_i32_0 = arith.constant 0 : i32
    %c0_i32_1 = arith.constant 0 : i32
    return %c0_i32, %c0_i32_0 : i32, i32
  }
  func.func @transform_9(%arg0: i32, %arg1: i32) -> (i32, i32) {
    %c0_i32 = arith.constant 0 : i32
    %c0_i32_0 = arith.constant 0 : i32
    %c0_i32_1 = arith.constant 0 : i32
    return %c0_i32, %c0_i32_0 : i32, i32
  }
  func.func @transform_10(%arg0: i32, %arg1: i32) -> (i32, i32) {
    %c0_i32 = arith.constant 0 : i32
    %c0_i32_0 = arith.constant 0 : i32
    %c0_i32_1 = arith.constant 0 : i32
    return %c0_i32, %c0_i32_0 : i32, i32
  }
  func.func @transform_11(%arg0: i32, %arg1: i32) -> (i32, i32) {
    %c0_i32 = arith.constant 0 : i32
    %c0_i32_0 = arith.constant 0 : i32
    %c0_i32_1 = arith.constant 0 : i32
    return %c0_i32, %c0_i32_0 : i32, i32
  }
  func.func @transform_12(%arg0: i32, %arg1: i32) -> (i32, i32) {
    %c0_i32 = arith.constant 0 : i32
    %c0_i32_0 = arith.constant 0 : i32
    %c0_i32_1 = arith.constant 0 : i32
    return %c0_i32, %c0_i32_0 : i32, i32
  }
  func.func @transform_13(%arg0: i32, %arg1: i32) -> (i32, i32) {
    %c0_i32 = arith.constant 0 : i32
    %c0_i32_0 = arith.constant 0 : i32
    %c0_i32_1 = arith.constant 0 : i32
    return %c0_i32, %c0_i32_0 : i32, i32
  }
  func.func @transform_14(%arg0: i32, %arg1: i32) -> (i32, i32) {
    %c0_i32 = arith.constant 0 : i32
    %c0_i32_0 = arith.constant 0 : i32
    %c0_i32_1 = arith.constant 0 : i32
    return %c0_i32, %c0_i32_0 : i32, i32
  }
  func.func @transform_15(%arg0: i32, %arg1: i32) -> (i32, i32) {
    %c0_i32 = arith.constant 0 : i32
    %c0_i32_0 = arith.constant 0 : i32
    return %arg1, %c0_i32 : i32, i32
  }
  func.func @transform_16(%arg0: i32, %arg1: i32) -> (i32, i32) {
    %c0_i32 = arith.constant 0 : i32
    %c0_i32_0 = arith.constant 0 : i32
    %c0_i32_1 = arith.constant 0 : i32
    return %c0_i32, %c0_i32_0 : i32, i32
  }
  func.func @transform_17(%arg0: i32, %arg1: i32) -> (i32, i32) {
    %c0_i32 = arith.constant 0 : i32
    %c0_i32_0 = arith.constant 0 : i32
    %c0_i32_1 = arith.constant 0 : i32
    return %c0_i32, %c0_i32_0 : i32, i32
  }
}

</mosaic_0001>

<bundles_post_ra>
// kernel: dvae_forward.1
= control target key start
LH: loop header
LB: loop body
LE: loop exit
PB: predicated region body
PF: predicated region fallthrough
CT: control target
= control target key end

     0   :  { %s6909_s0 = inlined_call_operand.vmem [shape: f32[1,128], index: 0, kind: input, shape index: {}]   ;;  %s6910_s1 = inlined_call_operand.vmem [shape: bf16[256,128], index: 1, kind: input, shape index: {}]   ;;  %s6911_s2 = inlined_call_operand.vmem [shape: f32[256,128], index: 2, kind: input, shape index: {}]   ;;  %s6912_s3 = inlined_call_operand.vmem [shape: bf16[128,128], index: 3, kind: input, shape index: {}]   ;;  %s6913_s4 = inlined_call_operand.vmem [shape: f32[1,128], index: 4, kind: input, shape index: {}]   ;;  %s6914_s5 = inlined_call_operand.vmem [shape: f32[1,128], index: 5, kind: input, shape index: {}]   ;;  %s6915_s6 = inlined_call_operand.vmem [shape: f32[1,128], index: 6, kind: input, shape index: {}]   ;;  %s6916_s7 = inlined_call_operand.vmem [shape: bf16[128,128], index: 7, kind: input, shape index: {}]   ;;  %s6917_s8 = inlined_call_operand.vmem [shape: f32[1,128], index: 8, kind: input, shape index: {}]   ;;  %s6918_s9 = inlined_call_operand.vmem [shape: bf16[128,128], index: 9, kind: input, shape index: {}]   ;;  %s6919_s10 = inlined_call_operand.vmem [shape: f32[1,128], index: 10, kind: input, shape index: {}]   ;;  %s6920_s11 = inlined_call_operand.vmem [shape: bf16[128,128], index: 11, kind: input, shape index: {}]   ;;  %s6921_s12 = inlined_call_operand.vmem [shape: f32[1,128], index: 12, kind: input, shape index: {}]   ;;  %s6922_s13 = inlined_call_operand.vmem [shape: bf16[128,128], index: 13, kind: input, shape index: {}]   ;;  %s6923_s14 = inlined_call_operand.vmem [shape: f32[1,128], index: 14, kind: input, shape index: {}]   ;;  %s6924_s15 = inlined_call_operand.vmem [shape: f32[256,128], index: 15, kind: output, shape index: {0}]   ;;  %s6925_s16 = inlined_call_operand.hbm [shape: f32[1,1], index: 16, kind: output, shape index: {1}]   ;;  %s6926_s17 = inlined_call_operand.hbm [shape: f32[1,1], index: 17, kind: output, shape index: {2}]  }
   0x1   :  { %6979 = sst [smem:[#allocation48_spill]] %s6909_s0 }
   0x2   :  { %6980 = sst [smem:[#allocation49_spill]] %s6910_s1 }
   0x3   :  { %6981 = sst [smem:[#allocation50_spill]] %s6911_s2 }
   0x4   :  { %23 = vsyncpa [#allocation6], 0 }
   0x5   :  { %24 = vsyncpa [#allocation8], 0  ;;  %s5113_s24 = smov 0   ;;  %s5115_s25 = smov 0  }
   0x6   :  { %s5117_s26 = smov 0  }
   0x7 LB: > { %s42_s28 = sadd.s32 1, %s5013_s25  ;;  %p3769_p1 = scmp.ge.s32.totalorder %s5017_s26, 1  ;;  %s5017_s26 = sphi %s5117_s26, %s30_s26   ;;  %s5013_s25 = sphi %s5115_s25, %s7131_s25   ;;  %s5009_s24 = sphi %s5113_s24, %s7130_s24  }
   0x8   : > { %p44_p0 = scmp.ge.s32.totalorder %s42_s28, 2  ;;  %p508_p2 = scmp.lt.s32.totalorder %s5017_s26, 3 }
   0xa   : > { %s7133_s28 = smov (%p44_p0, %s42_s28), 0  ;;  %p509_p3 = pnand %p3769_p1, %p508_p2 }
   0xb   : > { %p3770_p4 = scmp.ne.s32.totalorder (!%p509_p3), %s5009_s24, 0 }
   0xc   : > { %512 = sbr.rel (%p509_p3) target bundleno = 1516 (0x5ec), region = 80 }
  0x13   : > { %587 = sbr.rel (%p3770_p4) target bundleno = 294 (0x126), region = 84  ;;  %v4426_v0 = vld [vmem:[%s6912_s3] sm:$0xff] (!%p3770_p4)   ;;  %v4427_v1 = vld [vmem:[%s6912_s3 + $0x8] sm:$0xff] (!%p3770_p4)   ;;  %v4428_v2 = vld [vmem:[%s6912_s3 + $0x10] sm:$0xff] (!%p3770_p4)   ;;  %s6982_s29 = sld [smem:[#allocation49_spill]] (!%p3770_p4) }
  0x14   : > { %4124 = vmatprep.subr.bf16.mxu0 (!%p3770_p4), %v4426_v0  ;;  %4364 = vmatprep.subr.bf16.mxu1 (!%p3770_p4), %v4426_v0  ;;  %v4429_v3 = vld [vmem:[%s6912_s3 + $0x18] sm:$0xff] (!%p3770_p4)   ;;  %v4430_v6 = vld [vmem:[%s6912_s3 + $0x20] sm:$0xff] (!%p3770_p4)   ;;  %v4431_v7 = vld [vmem:[%s6912_s3 + $0x28] sm:$0xff] (!%p3770_p4)  }
  0x15   : > { %4125 = vmatpush3.bf16.msra.mxu0 (!%p3770_p4), %v4426_v0  ;;  %4372 = vmatpush3.bf16.msra.mxu1 (!%p3770_p4), %v4426_v0  ;;  %v4432_v8 = vld [vmem:[%s6912_s3 + $0x30] sm:$0xff] (!%p3770_p4)   ;;  %v4433_v9 = vld [vmem:[%s6912_s3 + $0x38] sm:$0xff] (!%p3770_p4)   ;;  %v5210_v24 = vld [vmem:[%s6913_s4] ss:$0 sm:$0xff] (!%p3770_p4) }
  0x16   : > { %4126 = vmatprep.subr.bf16.mxu0 (!%p3770_p4), %v4427_v1  ;;  %4365 = vmatprep.subr.bf16.mxu1 (!%p3770_p4), %v4427_v1 }
  0x19   : > { %4127 = vmatpush3.bf16.msra.mxu0 (!%p3770_p4), %v4427_v1  ;;  %4373 = vmatpush3.bf16.msra.mxu1 (!%p3770_p4), %v4427_v1  ;;  %v4434_v4 = vld [vmem:[%s6982_s29] sm:$0xff] (!%p3770_p4)   ;;  %v4436_v10 = vld [vmem:[%s6982_s29 + $0x8] sm:$0xff] (!%p3770_p4)   ;;  %v4438_v12 = vld [vmem:[%s6982_s29 + $0x10] sm:$0xff] (!%p3770_p4)  }
  0x1a   : > { %4128 = vmatprep.subr.bf16.mxu0 %v4428_v2  ;;  %4366 = vmatprep.subr.bf16.mxu1 %v4428_v2  ;;  %v4435_v5 = vld [vmem:[%s6982_s29 + $0x40] sm:$0xff]   ;;  %v4437_v11 = vld [vmem:[%s6982_s29 + $0x48] sm:$0xff]   ;;  %v4439_v13 = vld [vmem:[%s6982_s29 + $0x50] sm:$0xff]  }
  0x1b   : > { %4140 = vmatprep.mubr.bf16.mxu0 %v4434_v4  ;;  %4156 = vmatprep.mubr.bf16.mxu1 %v4435_v5  ;;  %v4440_v14 = vld [vmem:[%s6982_s29 + $0x18] sm:$0xff]   ;;  %v4442_v16 = vld [vmem:[%s6982_s29 + $0x20] sm:$0xff]   ;;  %v4444_v18 = vld [vmem:[%s6982_s29 + $0x28] sm:$0xff]  }
  0x1c   : > { %v4441_v15 = vld [vmem:[%s6982_s29 + $0x58] sm:$0xff]   ;;  %v4443_v17 = vld [vmem:[%s6982_s29 + $0x60] sm:$0xff]   ;;  %v4445_v19 = vld [vmem:[%s6982_s29 + $0x68] sm:$0xff]  }
  0x1d   : > { %4129 = vmatpush3.bf16.msra.mxu0 %v4428_v2  ;;  %4374 = vmatpush3.bf16.msra.mxu1 %v4428_v2  ;;  %v4446_v20 = vld [vmem:[%s6982_s29 + $0x30] sm:$0xff]   ;;  %v4448_v22 = vld [vmem:[%s6982_s29 + $0x38] sm:$0xff]  }
  0x1e   : > { %4130 = vmatprep.subr.bf16.mxu0 %v4429_v3  ;;  %4367 = vmatprep.subr.bf16.mxu1 %v4429_v3  ;;  %v4447_v21 = vld [vmem:[%s6982_s29 + $0x70] sm:$0xff]   ;;  %v4449_v23 = vld [vmem:[%s6982_s29 + $0x78] sm:$0xff]  }
  0x21   : > { %4131 = vmatpush3.bf16.msra.mxu0 %v4429_v3  ;;  %4375 = vmatpush3.bf16.msra.mxu1 %v4429_v3 }
  0x22   : > { %4132 = vmatprep.subr.bf16.mxu0 %v4430_v6  ;;  %4368 = vmatprep.subr.bf16.mxu1 %v4430_v6 }
  0x25   : > { %4133 = vmatpush3.bf16.msra.mxu0 %v4430_v6  ;;  %4376 = vmatpush3.bf16.msra.mxu1 %v4430_v6 }
  0x26   : > { %4134 = vmatprep.subr.bf16.mxu0 %v4431_v7  ;;  %4369 = vmatprep.subr.bf16.mxu1 %v4431_v7 }
  0x29   : > { %4135 = vmatpush3.bf16.msra.mxu0 %v4431_v7  ;;  %4377 = vmatpush3.bf16.msra.mxu1 %v4431_v7 }
  0x2a   : > { %4136 = vmatprep.subr.bf16.mxu0 %v4432_v8  ;;  %4370 = vmatprep.subr.bf16.mxu1 %v4432_v8 }
  0x2d   : > { %4137 = vmatpush3.bf16.msra.mxu0 %v4432_v8  ;;  %4378 = vmatpush3.bf16.msra.mxu1 %v4432_v8 }
  0x2e   : > { %4138 = vmatprep.subr.bf16.mxu0 %v4433_v9  ;;  %4371 = vmatprep.subr.bf16.mxu1 %v4433_v9 }
  0x31   : > { %4139 = vmatpush3.bf16.msra.mxu0 %v4433_v9  ;;  %4379 = vmatpush3.bf16.msra.mxu1 %v4433_v9 }
  0x34   : > { %4141 = vmatmul.mubr.bf16.vlgmr.msra.gmra.mrb[0].mxu0 %v4436_v10  ;;  %4157 = vmatmul.mubr.bf16.vlgmr.msra.gmra.mrb[0].mxu1 %v4437_v11 }
  0x35   : > { %4144 = vmatprep.mubr.bf16.mxu0 %v4438_v12  ;;  %4160 = vmatprep.mubr.bf16.mxu1 %v4439_v13 }
  0x3c   : > { %4145 = vmatmul.mubr.bf16.gmra.mrb[4].mxu0 %v4440_v14  ;;  %4161 = vmatmul.mubr.bf16.gmra.mrb[4].mxu1 %v4441_v15 }
  0x3d   : > { %4148 = vmatprep.mubr.bf16.mxu0 %v4442_v16  ;;  %4164 = vmatprep.mubr.bf16.mxu1 %v4443_v17 }
  0x44   : > { %4149 = vmatmul.mubr.bf16.gmra.mrb[8].mxu0 %v4444_v18  ;;  %4165 = vmatmul.mubr.bf16.gmra.mrb[8].mxu1 %v4445_v19 }
  0x45   : > { %4152 = vmatprep.mubr.bf16.mxu0 %v4446_v20  ;;  %4168 = vmatprep.mubr.bf16.mxu1 %v4447_v21 }
  0x4c   : > { %4153 = vmatmul.mubr.bf16.gmra.mrb[12].mxu0 %v4448_v22  ;;  %4169 = vmatmul.mubr.bf16.gmra.mrb[12].mxu1 %v4449_v23 }
 0x107   : > { %v4142_v25 = vpop.f32.mrb[0].mxu0  ;;  %v4158_v26 = vpop.f32.mrb[0].mxu1 }
 0x108   : > { %v830_v27 = vadd.f32 %v4142_v25, %v5210_v24  ;;  %v894_v28 = vadd.f32 %v4158_v26, %v5210_v24  ;;  %v821_v29 = vpop.f32.mrb[1].mxu0  ;;  %v885_v30 = vpop.f32.mrb[1].mxu1 }
 0x109   : > { %v822_v31 = vadd.f32 %v5210_v24, %v821_v29  ;;  %v886_v32 = vadd.f32 %v5210_v24, %v885_v30  ;;  %v4143_v33 = vpop.f32.mrb[2].mxu0  ;;  %v4159_v34 = vpop.f32.mrb[2].mxu1 }
 0x10a   : > { %952 = vst [vmem:[#allocation2 + $0x10] sm:$0xff] %v830_v27  ;;  %968 = vst [vmem:[#allocation2 + $0x90] sm:$0xff] %v894_v28  ;;  %v833_v35 = vadd.f32 %v4143_v33, %v5210_v24  ;;  %v897_v36 = vadd.f32 %v4159_v34, %v5210_v24  ;;  %v824_v37 = vpop.f32.mrb[3].mxu0  ;;  %v888_v38 = vpop.f32.mrb[3].mxu1 }
 0x10b   : > { %950 = vst [vmem:[#allocation2] sm:$0xff] %v822_v31  ;;  %966 = vst [vmem:[#allocation2 + $0x80] sm:$0xff] %v886_v32  ;;  %v825_v39 = vadd.f32 %v5210_v24, %v824_v37  ;;  %v889_v40 = vadd.f32 %v5210_v24, %v888_v38 }
 0x10c   : > { %953 = vst [vmem:[#allocation2 + $0x18] sm:$0xff] %v833_v35  ;;  %969 = vst [vmem:[#allocation2 + $0x98] sm:$0xff] %v897_v36 }
 0x10d   : > { %951 = vst [vmem:[#allocation2 + $0x8] sm:$0xff] %v825_v39  ;;  %967 = vst [vmem:[#allocation2 + $0x88] sm:$0xff] %v889_v40 }
 0x10f   : > { %v4146_v41 = vpop.f32.mrb[4].mxu0  ;;  %v4162_v42 = vpop.f32.mrb[4].mxu1 }
 0x110   : > { %v846_v43 = vadd.f32 %v4146_v41, %v5210_v24  ;;  %v910_v44 = vadd.f32 %v4162_v42, %v5210_v24  ;;  %v837_v45 = vpop.f32.mrb[5].mxu0  ;;  %v901_v46 = vpop.f32.mrb[5].mxu1 }
 0x111   : > { %v838_v47 = vadd.f32 %v5210_v24, %v837_v45  ;;  %v902_v48 = vadd.f32 %v5210_v24, %v901_v46  ;;  %v4147_v49 = vpop.f32.mrb[6].mxu0  ;;  %v4163_v50 = vpop.f32.mrb[6].mxu1 }
 0x112   : > { %956 = vst [vmem:[#allocation2 + $0x30] sm:$0xff] %v846_v43  ;;  %972 = vst [vmem:[#allocation2 + $0xb0] sm:$0xff] %v910_v44  ;;  %v849_v51 = vadd.f32 %v4147_v49, %v5210_v24  ;;  %v913_v52 = vadd.f32 %v4163_v50, %v5210_v24  ;;  %v840_v53 = vpop.f32.mrb[7].mxu0  ;;  %v904_v54 = vpop.f32.mrb[7].mxu1 }
 0x113   : > { %954 = vst [vmem:[#allocation2 + $0x20] sm:$0xff] %v838_v47  ;;  %970 = vst [vmem:[#allocation2 + $0xa0] sm:$0xff] %v902_v48  ;;  %v841_v55 = vadd.f32 %v5210_v24, %v840_v53  ;;  %v905_v56 = vadd.f32 %v5210_v24, %v904_v54 }
 0x114   : > { %957 = vst [vmem:[#allocation2 + $0x38] sm:$0xff] %v849_v51  ;;  %973 = vst [vmem:[#allocation2 + $0xb8] sm:$0xff] %v913_v52 }
 0x115   : > { %955 = vst [vmem:[#allocation2 + $0x28] sm:$0xff] %v841_v55  ;;  %971 = vst [vmem:[#allocation2 + $0xa8] sm:$0xff] %v905_v56 }
 0x117   : > { %v4150_v57 = vpop.f32.mrb[8].mxu0  ;;  %v4166_v58 = vpop.f32.mrb[8].mxu1 }
 0x118   : > { %v862_v59 = vadd.f32 %v4150_v57, %v5210_v24  ;;  %v926_v60 = vadd.f32 %v4166_v58, %v5210_v24  ;;  %v853_v61 = vpop.f32.mrb[9].mxu0  ;;  %v917_v62 = vpop.f32.mrb[9].mxu1 }
 0x119   : > { %v854_v63 = vadd.f32 %v5210_v24, %v853_v61  ;;  %v918_v0 = vadd.f32 %v5210_v24, %v917_v62  ;;  %v4151_v1 = vpop.f32.mrb[10].mxu0  ;;  %v4167_v2 = vpop.f32.mrb[10].mxu1 }
 0x11a   : > { %960 = vst [vmem:[#allocation2 + $0x50] sm:$0xff] %v862_v59  ;;  %976 = vst [vmem:[#allocation2 + $0xd0] sm:$0xff] %v926_v60  ;;  %v865_v3 = vadd.f32 %v4151_v1, %v5210_v24  ;;  %v929_v4 = vadd.f32 %v4167_v2, %v5210_v24  ;;  %v856_v5 = vpop.f32.mrb[11].mxu0  ;;  %v920_v6 = vpop.f32.mrb[11].mxu1 }
 0x11b   : > { %958 = vst [vmem:[#allocation2 + $0x40] sm:$0xff] %v854_v63  ;;  %974 = vst [vmem:[#allocation2 + $0xc0] sm:$0xff] %v918_v0  ;;  %v857_v7 = vadd.f32 %v5210_v24, %v856_v5  ;;  %v921_v8 = vadd.f32 %v5210_v24, %v920_v6 }
 0x11c   : > { %961 = vst [vmem:[#allocation2 + $0x58] sm:$0xff] %v865_v3  ;;  %977 = vst [vmem:[#allocation2 + $0xd8] sm:$0xff] %v929_v4 }
 0x11d   : > { %959 = vst [vmem:[#allocation2 + $0x48] sm:$0xff] %v857_v7  ;;  %975 = vst [vmem:[#allocation2 + $0xc8] sm:$0xff] %v921_v8 }
 0x11f   : > { %v4154_v9 = vpop.f32.mrb[12].mxu0  ;;  %v4170_v10 = vpop.f32.mrb[12].mxu1 }
 0x120   : > { %v878_v11 = vadd.f32 %v4154_v9, %v5210_v24  ;;  %v942_v12 = vadd.f32 %v4170_v10, %v5210_v24  ;;  %v869_v13 = vpop.f32.mrb[13].mxu0  ;;  %v933_v14 = vpop.f32.mrb[13].mxu1 }
 0x121   : > { %v870_v15 = vadd.f32 %v5210_v24, %v869_v13  ;;  %v934_v16 = vadd.f32 %v5210_v24, %v933_v14  ;;  %v4155_v17 = vpop.f32.mrb[14].mxu0  ;;  %v4171_v18 = vpop.f32.mrb[14].mxu1 }
 0x122   : > { %964 = vst [vmem:[#allocation2 + $0x70] sm:$0xff] %v878_v11  ;;  %980 = vst [vmem:[#allocation2 + $0xf0] sm:$0xff] %v942_v12  ;;  %v881_v19 = vadd.f32 %v4155_v17, %v5210_v24  ;;  %v945_v20 = vadd.f32 %v4171_v18, %v5210_v24  ;;  %v872_v21 = vpop.f32.mrb[15].mxu0  ;;  %v936_v22 = vpop.f32.mrb[15].mxu1 }
 0x123   : > { %962 = vst [vmem:[#allocation2 + $0x60] sm:$0xff] %v870_v15  ;;  %978 = vst [vmem:[#allocation2 + $0xe0] sm:$0xff] %v934_v16  ;;  %v873_v23 = vadd.f32 %v5210_v24, %v872_v21  ;;  %v937_v25 = vadd.f32 %v5210_v24, %v936_v22 }
 0x124   : > { %965 = vst [vmem:[#allocation2 + $0x78] sm:$0xff] %v881_v19  ;;  %981 = vst [vmem:[#allocation2 + $0xf8] sm:$0xff] %v945_v20 }
 0x125   : > { %963 = vst [vmem:[#allocation2 + $0x68] sm:$0xff] %v873_v23  ;;  %979 = vst [vmem:[#allocation2 + $0xe8] sm:$0xff] %v937_v25 }
 0x126 PF: > { %p3796_p5 = scmp.ne.s32.totalorder %s5009_s24, 1 }
 0x128   : > { %985 = sbr.rel (%p3796_p5) target bundleno = 1468 (0x5bc), region = 88 }
 0x12f   : > { %v4450_v26 = vld [vmem:[%s6916_s7] sm:$0xff]   ;;  %v4451_v27 = vld [vmem:[%s6916_s7 + $0x8] sm:$0xff]   ;;  %v4452_v24 = vld [vmem:[%s6916_s7 + $0x10] sm:$0xff]   ;;  %s6983_s2 = sld [smem:[#allocation50_spill]]  ;;  %s7004_s0 = sld [smem:[#allocation48_spill]] }
 0x130   : > { %4172 = vmatprep.subr.bf16.mxu0 %v4450_v26  ;;  %v4453_v28 = vld [vmem:[%s6916_s7 + $0x18] sm:$0xff]   ;;  %v5257_v29 = vld [vmem:[#allocation2] sm:$0xff]  ;;  %v5259_v30 = vld [vmem:[#allocation2 + $0x8] sm:$0xff] }
 0x131   : > { %4173 = vmatpush3.bf16.msra.mxu0 %v4450_v26  ;;  %v5261_v31 = vld [vmem:[#allocation2 + $0x10] sm:$0xff]  ;;  %v1022_v32 = vadd.f32 %v5259_v30, %v5257_v29  ;;  %v5265_v33 = vld [vmem:[#allocation2 + $0x18] sm:$0xff]  ;;  %v4454_v35 = vld [vmem:[%s6916_s7 + $0x20] sm:$0xff]  }
 0x132   : > { %4174 = vmatprep.subr.bf16.mxu0 %v4451_v27  ;;  %v5271_v36 = vld [vmem:[#allocation2 + $0x20] sm:$0xff]  ;;  %v5274_v38 = vld [vmem:[#allocation2 + $0x28] sm:$0xff]  ;;  %v5280_v41 = vld [vmem:[#allocation2 + $0x30] sm:$0xff] }
 0x133   : > { %v1023_v34 = vadd.f32 %v1022_v32, %v5261_v31  ;;  %v4455_v40 = vld [vmem:[%s6916_s7 + $0x28] sm:$0xff]   ;;  %v4456_v43 = vld [vmem:[%s6916_s7 + $0x30] sm:$0xff]   ;;  %v5286_v44 = vld [vmem:[#allocation2 + $0x38] sm:$0xff] }
 0x134   : > { %v5288_v45 = vld [vmem:[#allocation2 + $0x40] sm:$0xff]  ;;  %v5291_v47 = vld [vmem:[#allocation2 + $0x48] sm:$0xff]  ;;  %v4457_v49 = vld [vmem:[%s6916_s7 + $0x38] sm:$0xff]  }
 0x135   : > { %4175 = vmatpush3.bf16.msra.mxu0 %v4451_v27  ;;  %v1024_v37 = vadd.f32 %v1023_v34, %v5265_v33  ;;  %v5297_v50 = vld [vmem:[#allocation2 + $0x50] sm:$0xff]  ;;  %v5300_v52 = vld [vmem:[#allocation2 + $0x58] sm:$0xff]  ;;  %v5303_v54 = vld [vmem:[#allocation2 + $0x60] sm:$0xff] }
 0x136   : > { %4176 = vmatprep.subr.bf16.mxu0 %v4452_v24  ;;  %v5306_v56 = vld [vmem:[#allocation2 + $0x68] sm:$0xff]  ;;  %v5309_v58 = vld [vmem:[#allocation2 + $0x70] sm:$0xff]  ;;  %v5313_v61 = vld [vmem:[#allocation2 + $0x78] sm:$0xff] }
 0x137   : > { %v1025_v39 = vadd.f32 %v1024_v37, %v5271_v36  ;;  %v5316_v63 = vld [vmem:[#allocation2 + $0x80] sm:$0xff]  ;;  %v5319_v1 = vld [vmem:[#allocation2 + $0x88] sm:$0xff]  ;;  %v5322_v3 = vld [vmem:[#allocation2 + $0x90] sm:$0xff] }
 0x138   : > { %v5325_v5 = vld [vmem:[#allocation2 + $0x98] sm:$0xff]  ;;  %v5328_v7 = vld [vmem:[#allocation2 + $0xa0] sm:$0xff]  ;;  %v5331_v9 = vld [vmem:[#allocation2 + $0xa8] sm:$0xff] }
 0x139   : > { %4177 = vmatpush3.bf16.msra.mxu0 %v4452_v24  ;;  %v1026_v42 = vadd.f32 %v1025_v39, %v5274_v38  ;;  %v5334_v11 = vld [vmem:[#allocation2 + $0xb0] sm:$0xff]  ;;  %v5337_v13 = vld [vmem:[#allocation2 + $0xb8] sm:$0xff]  ;;  %v5340_v15 = vld [vmem:[#allocation2 + $0xc0] sm:$0xff] }
 0x13a   : > { %4178 = vmatprep.subr.bf16.mxu0 %v4453_v28  ;;  %v5343_v17 = vld [vmem:[#allocation2 + $0xc8] sm:$0xff]  ;;  %v5346_v19 = vld [vmem:[#allocation2 + $0xd0] sm:$0xff]  ;;  %v5349_v21 = vld [vmem:[#allocation2 + $0xd8] sm:$0xff] }
 0x13b   : > { %v1027_v46 = vadd.f32 %v1026_v42, %v5280_v41  ;;  %v5352_v23 = vld [vmem:[#allocation2 + $0xe0] sm:$0xff]  ;;  %v5355_v26 = vld [vmem:[#allocation2 + $0xe8] sm:$0xff]  ;;  %v5358_v24 = vld [vmem:[#allocation2 + $0xf0] sm:$0xff] }
 0x13c   : > { %v5361_v32 = vld [vmem:[#allocation2 + $0xf8] sm:$0xff] }
 0x13d   : > { %4179 = vmatpush3.bf16.msra.mxu0 %v4453_v28  ;;  %v1028_v48 = vadd.f32 %v1027_v46, %v5286_v44 }
 0x13e   : > { %4180 = vmatprep.subr.bf16.mxu0 %v4454_v35 }
 0x13f   : > { %v1029_v51 = vadd.f32 %v1028_v48, %v5288_v45 }
 0x141   : > { %4181 = vmatpush3.bf16.msra.mxu0 %v4454_v35  ;;  %v1030_v53 = vadd.f32 %v1029_v51, %v5291_v47 }
 0x142   : > { %4182 = vmatprep.subr.bf16.mxu0 %v4455_v40 }
 0x143   : > { %v1031_v55 = vadd.f32 %v1030_v53, %v5297_v50 }
 0x145   : > { %4183 = vmatpush3.bf16.msra.mxu0 %v4455_v40  ;;  %v1032_v57 = vadd.f32 %v1031_v55, %v5300_v52 }
 0x146   : > { %4184 = vmatprep.subr.bf16.mxu0 %v4456_v43 }
 0x147   : > { %v1033_v59 = vadd.f32 %v1032_v57, %v5303_v54 }
 0x149   : > { %4185 = vmatpush3.bf16.msra.mxu0 %v4456_v43  ;;  %v1034_v60 = vadd.f32 %v1033_v59, %v5306_v56 }
 0x14a   : > { %4186 = vmatprep.subr.bf16.mxu0 %v4457_v49 }
 0x14b   : > { %v1035_v62 = vadd.f32 %v1034_v60, %v5309_v58 }
 0x14d   : > { %4187 = vmatpush3.bf16.msra.mxu0 %v4457_v49  ;;  %v1036_v0 = vadd.f32 %v1035_v62, %v5313_v61 }
 0x14f   : > { %v1037_v2 = vadd.f32 %v1036_v0, %v5316_v63 }
 0x151   : > { %v1038_v4 = vadd.f32 %v1037_v2, %v5319_v1 }
 0x153   : > { %v1039_v6 = vadd.f32 %v1038_v4, %v5322_v3 }
 0x155   : > { %v1040_v8 = vadd.f32 %v1039_v6, %v5325_v5 }
 0x157   : > { %v1041_v10 = vadd.f32 %v1040_v8, %v5328_v7 }
 0x159   : > { %v1042_v12 = vadd.f32 %v1041_v10, %v5331_v9 }
 0x15b   : > { %v1043_v14 = vadd.f32 %v1042_v12, %v5334_v11 }
 0x15d   : > { %v1044_v16 = vadd.f32 %v1043_v14, %v5337_v13 }
 0x15f   : > { %v1045_v18 = vadd.f32 %v1044_v16, %v5340_v15 }
 0x161   : > { %v1046_v20 = vadd.f32 %v1045_v18, %v5343_v17 }
 0x163   : > { %v1047_v22 = vadd.f32 %v1046_v20, %v5346_v19 }
 0x165   : > { %v1048_v25 = vadd.f32 %v1047_v22, %v5349_v21 }
 0x167   : > { %v1049_v27 = vadd.f32 %v1048_v25, %v5352_v23 }
 0x169   : > { %v1050_v28 = vadd.f32 %v1049_v27, %v5355_v26 }
 0x16b   : > { %v1051_v34 = vadd.f32 %v1050_v28, %v5358_v24 }
 0x16d   : > { %v1052_v35 = vadd.f32 %v1051_v34, %v5361_v32 }
 0x16f   : > { %v1053_v37 = vrot.slane %v1052_v35, 4 }
 0x171   : > { %v1054_v39 = vadd.f32 %v1053_v37, %v1052_v35 }
 0x173   : > { %v1055_v40 = vrot.slane %v1054_v39, 2 }
 0x175   : > { %v1056_v42 = vadd.f32 %v1055_v40, %v1054_v39 }
 0x177   : > { %v1057_v43 = vrot.slane %v1056_v42, 1 }
 0x179   : > { %v1058_v46 = vadd.f32 %v1057_v43, %v1056_v42 }
 0x17b   : > { %v5365_v48 = vmul.f32 0.00390625, %v1058_v46 }
 0x17d   : > { %v1061_v49 = vsub.f32 %v5257_v29, %v5365_v48  ;;  %v1062_v51 = vsub.f32 %v5259_v30, %v5365_v48  ;;  %v1063_v53 = vsub.f32 %v5261_v31, %v5365_v48  ;;  %v1064_v55 = vsub.f32 %v5265_v33, %v5365_v48 }
 0x17e   : > { %v1065_v60 = vsub.f32 %v5271_v36, %v5365_v48  ;;  %v1066_v0 = vsub.f32 %v5274_v38, %v5365_v48  ;;  %v1067_v6 = vsub.f32 %v5280_v41, %v5365_v48  ;;  %v1068_v12 = vsub.f32 %v5286_v44, %v5365_v48 }
 0x17f   : > { %v1093_v57 = vmul.f32 %v1061_v49, %v1061_v49  ;;  %v1094_v59 = vmul.f32 %v1062_v51, %v1062_v51  ;;  %v1095_v62 = vmul.f32 %v1063_v53, %v1063_v53  ;;  %v1096_v2 = vmul.f32 %v1064_v55, %v1064_v55 }
 0x180   : > { %v1097_v8 = vmul.f32 %v1065_v60, %v1065_v60  ;;  %v1098_v14 = vmul.f32 %v1066_v0, %v1066_v0  ;;  %v1069_v18 = vsub.f32 %v5288_v45, %v5365_v48  ;;  %v1099_v20 = vmul.f32 %v1067_v6, %v1067_v6 }
 0x181   : > { %v1125_v4 = vadd.f32 %v1094_v59, %v1093_v57  ;;  %v1070_v25 = vsub.f32 %v5291_v47, %v5365_v48  ;;  %v1100_v27 = vmul.f32 %v1068_v12, %v1068_v12  ;;  %v1071_v34 = vsub.f32 %v5297_v50, %v5365_v48 }
 0x182   : > { %v1101_v35 = vmul.f32 %v1069_v18, %v1069_v18  ;;  %v1072_v39 = vsub.f32 %v5300_v52, %v5365_v48  ;;  %v1073_v43 = vsub.f32 %v5303_v54, %v5365_v48  ;;  %v1074_v51 = vsub.f32 %v5306_v56, %v5365_v48 }
 0x183   : > { %v1126_v10 = vadd.f32 %v1125_v4, %v1095_v62  ;;  %v1102_v40 = vmul.f32 %v1070_v25, %v1070_v25  ;;  %v1103_v46 = vmul.f32 %v1071_v34, %v1071_v34  ;;  %v1075_v57 = vsub.f32 %v5309_v58, %v5365_v48 }
 0x184   : > { %v1104_v53 = vmul.f32 %v1072_v39, %v1072_v39  ;;  %v1105_v59 = vmul.f32 %v1073_v43, %v1073_v43  ;;  %v1076_v62 = vsub.f32 %v5313_v61, %v5365_v48  ;;  %v1106_v0 = vmul.f32 %v1074_v51, %v1074_v51 }
 0x185   : > { %v1127_v16 = vadd.f32 %v1126_v10, %v1096_v2  ;;  %v1077_v4 = vsub.f32 %v5316_v63, %v5365_v48  ;;  %v1107_v6 = vmul.f32 %v1075_v57, %v1075_v57  ;;  %v1078_v10 = vsub.f32 %v5319_v1, %v5365_v48 }
 0x186   : > { %v1108_v12 = vmul.f32 %v1076_v62, %v1076_v62 }
 0x187   : > { %v1128_v22 = vadd.f32 %v1127_v16, %v1097_v8  ;;  %v1079_v16 = vsub.f32 %v5322_v3, %v5365_v48  ;;  %v1109_v18 = vmul.f32 %v1077_v4, %v1077_v4  ;;  %v1110_v25 = vmul.f32 %v1078_v10, %v1078_v10 }
 0x189   : > { %v1129_v28 = vadd.f32 %v1128_v22, %v1098_v14  ;;  %v1080_v22 = vsub.f32 %v5325_v5, %v5365_v48  ;;  %v1111_v34 = vmul.f32 %v1079_v16, %v1079_v16 }
 0x18b   : > { %v1130_v37 = vadd.f32 %v1129_v28, %v1099_v20  ;;  %v1081_v28 = vsub.f32 %v5328_v7, %v5365_v48  ;;  %v1112_v39 = vmul.f32 %v1080_v22, %v1080_v22 }
 0x18d   : > { %v1131_v42 = vadd.f32 %v1130_v37, %v1100_v27  ;;  %v1082_v37 = vsub.f32 %v5331_v9, %v5365_v48  ;;  %v1113_v43 = vmul.f32 %v1081_v28, %v1081_v28 }
 0x18f   : > { %v1132_v49 = vadd.f32 %v1131_v42, %v1101_v35  ;;  %v1083_v42 = vsub.f32 %v5334_v11, %v5365_v48  ;;  %v1114_v51 = vmul.f32 %v1082_v37, %v1082_v37 }
 0x191   : > { %v1133_v55 = vadd.f32 %v1132_v49, %v1102_v40  ;;  %v1084_v49 = vsub.f32 %v5337_v13, %v5365_v48  ;;  %v1115_v57 = vmul.f32 %v1083_v42, %v1083_v42 }
 0x193   : > { %v1134_v60 = vadd.f32 %v1133_v55, %v1103_v46  ;;  %v1085_v55 = vsub.f32 %v5340_v15, %v5365_v48  ;;  %v1116_v62 = vmul.f32 %v1084_v49, %v1084_v49 }
 0x195   : > { %v1135_v2 = vadd.f32 %v1134_v60, %v1104_v53  ;;  %v1086_v60 = vsub.f32 %v5343_v17, %v5365_v48  ;;  %v1117_v4 = vmul.f32 %v1085_v55, %v1085_v55 }
 0x197   : > { %v1136_v8 = vadd.f32 %v1135_v2, %v1105_v59  ;;  %v1087_v2 = vsub.f32 %v5346_v19, %v5365_v48  ;;  %v1118_v10 = vmul.f32 %v1086_v60, %v1086_v60 }
 0x199   : > { %v1137_v14 = vadd.f32 %v1136_v8, %v1106_v0  ;;  %v1088_v8 = vsub.f32 %v5349_v21, %v5365_v48  ;;  %v1119_v16 = vmul.f32 %v1087_v2, %v1087_v2 }
 0x19b   : > { %v1138_v20 = vadd.f32 %v1137_v14, %v1107_v6  ;;  %v1089_v14 = vsub.f32 %v5352_v23, %v5365_v48  ;;  %v1120_v22 = vmul.f32 %v1088_v8, %v1088_v8 }
 0x19d   : > { %v1139_v27 = vadd.f32 %v1138_v20, %v1108_v12  ;;  %v1090_v20 = vsub.f32 %v5355_v26, %v5365_v48  ;;  %v1121_v28 = vmul.f32 %v1089_v14, %v1089_v14 }
 0x19f   : > { %v1140_v35 = vadd.f32 %v1139_v27, %v1109_v18  ;;  %v1091_v27 = vsub.f32 %v5358_v24, %v5365_v48  ;;  %v1122_v37 = vmul.f32 %v1090_v20, %v1090_v20 }
 0x1a1   : > { %v1141_v40 = vadd.f32 %v1140_v35, %v1110_v25  ;;  %v1092_v35 = vsub.f32 %v5361_v32, %v5365_v48 }
 0x1a3   : > { %v1142_v46 = vadd.f32 %v1141_v40, %v1111_v34  ;;  %v1123_v40 = vmul.f32 %v1091_v27, %v1091_v27 }
 0x1a5   : > { %v1143_v53 = vadd.f32 %v1142_v46, %v1112_v39 }
 0x1a7   : > { %v1144_v59 = vadd.f32 %v1143_v53, %v1113_v43  ;;  %v1124_v43 = vmul.f32 %v1092_v35, %v1092_v35 }
 0x1a9   : > { %v1145_v0 = vadd.f32 %v1144_v59, %v1114_v51 }
 0x1ab   : > { %v1146_v6 = vadd.f32 %v1145_v0, %v1115_v57 }
 0x1ad   : > { %v1147_v12 = vadd.f32 %v1146_v6, %v1116_v62 }
 0x1af   : > { %v1148_v18 = vadd.f32 %v1147_v12, %v1117_v4  ;;  %v1164_v4 = vld [vmem:[%s6914_s5] sm:$0x1] }
 0x1b1   : > { %v1149_v25 = vadd.f32 %v1148_v18, %v1118_v10  ;;  %v1169_v10 = vld [vmem:[%s6915_s6] sm:$0x1] }
 0x1b3   : > { %v1150_v34 = vadd.f32 %v1149_v25, %v1119_v16 }
 0x1b5   : > { %v1151_v39 = vadd.f32 %v1150_v34, %v1120_v22 }
 0x1b7   : > { %v1152_v42 = vadd.f32 %v1151_v39, %v1121_v28 }
 0x1b9   : > { %v1153_v46 = vadd.f32 %v1152_v42, %v1122_v37 }
 0x1bb   : > { %v1154_v49 = vadd.f32 %v1153_v46, %v1123_v40 }
 0x1bd   : > { %v1155_v51 = vadd.f32 %v1154_v49, %v1124_v43 }
 0x1bf   : > { %v1156_v53 = vrot.slane %v1155_v51, 4 }
 0x1c1   : > { %v1157_v55 = vadd.f32 %v1156_v53, %v1155_v51 }
 0x1c3   : > { %v1158_v57 = vrot.slane %v1157_v55, 2 }
 0x1c5   : > { %v1159_v59 = vadd.f32 %v1158_v57, %v1157_v55 }
 0x1c7   : > { %v1160_v60 = vrot.slane %v1159_v59, 1 }
 0x1c9   : > { %v1161_v62 = vadd.f32 %v1160_v60, %v1159_v59 }
 0x1cb   : > { %v1163_v0 = vmul.f32 0.00390625, %v1161_v62 }
 0x1cd   : > { %v1165_v2 = vadd.f32 1e-05, %v1163_v0 }
 0x1cf   : > { %4482 = vrsqrt.f32 %v1165_v2 }
 0x1d9   : > { %v4483_v6 = vpop.eup %4482 }
 0x1da   : > { %v1167_v8 = vmul.f32 %v4483_v6, %v1164_v4 }
 0x1dc   : > { %1168 = vst [vmem:[#allocation3] sm:$0x1] %v1167_v8  ;;  %v1170_v12 = vmul.f32 %v1167_v8, %v5365_v48 }
 0x1de   : > { %v1171_v14 = vsub.f32 %v1169_v10, %v1170_v12 }
 0x1e0   : > { %1172 = vst [vmem:[#allocation4] sm:$0x1] %v1171_v14 }
 0x1e3   : > { %v5438_v16 = vld [vmem:[#allocation3] ss:$0 sm:$0xff] }
 0x1e4   : > { %v1217_v18 = vmul.f32 %v5438_v16, %v5257_v29  ;;  %v1218_v20 = vmul.f32 %v5438_v16, %v5259_v30  ;;  %v1219_v22 = vmul.f32 %v5438_v16, %v5261_v31  ;;  %v1220_v25 = vmul.f32 %v5438_v16, %v5265_v33 }
 0x1e5   : > { %v1221_v27 = vmul.f32 %v5438_v16, %v5271_v36  ;;  %v1222_v48 = vmul.f32 %v5438_v16, %v5274_v38  ;;  %v1223_v29 = vmul.f32 %v5438_v16, %v5280_v41  ;;  %v1224_v30 = vmul.f32 %v5438_v16, %v5286_v44 }
 0x1e6   : > { %v1225_v31 = vmul.f32 %v5438_v16, %v5288_v45  ;;  %v1226_v33 = vmul.f32 %v5438_v16, %v5291_v47  ;;  %v1227_v62 = vmul.f32 %v5438_v16, %v5297_v50  ;;  %v1228_v0 = vmul.f32 %v5438_v16, %v5300_v52 }
 0x1e7   : > { %v5452_v28 = vld [vmem:[#allocation4] ss:$0 sm:$0xff]  ;;  %v1229_v6 = vmul.f32 %v5438_v16, %v5303_v54  ;;  %v1230_v8 = vmul.f32 %v5438_v16, %v5306_v56  ;;  %v1232_v54 = vmul.f32 %v5438_v16, %v5313_v61 }
 0x1e8   : > { %v1256_v34 = vadd.f32 %v5452_v28, %v1217_v18  ;;  %v1257_v36 = vadd.f32 %v5452_v28, %v1218_v20  ;;  %v1258_v38 = vadd.f32 %v5452_v28, %v1219_v22  ;;  %v1259_v35 = vadd.f32 %v5452_v28, %v1220_v25 }
 0x1e9   : > { %v1260_v37 = vadd.f32 %v5452_v28, %v1221_v27  ;;  %v1261_v41 = vadd.f32 %v5452_v28, %v1222_v48  ;;  %v1262_v47 = vadd.f32 %v5452_v28, %v1223_v29  ;;  %v1263_v46 = vadd.f32 %v5452_v28, %v1224_v30 }
 0x1ea   : > { %v1288_v39 = vmax.f32 %v1256_v34, 0.0  ;;  %v1289_v44 = vmax.f32 %v1257_v36, 0.0  ;;  %v1290_v40 = vmax.f32 %v1258_v38, 0.0  ;;  %v1291_v42 = vmax.f32 %v1259_v35, 0.0 }
 0x1eb   : > { %v1292_v45 = vmax.f32 %v1260_v37, 0.0  ;;  %v1293_v43 = vmax.f32 %v1261_v41, 0.0  ;;  %v1264_v53 = vadd.f32 %v5452_v28, %v1225_v31  ;;  %v1265_v55 = vadd.f32 %v5452_v28, %v1226_v33 }
 0x1ec   : > { %v1320_v49 = vpack.c.bf16 %v1289_v44, %v1288_v39  ;;  %v1321_v51 = vpack.c.bf16 %v1291_v42, %v1290_v40  ;;  %v1294_v59 = vmax.f32 %v1262_v47, 0.0  ;;  %v1295_v60 = vmax.f32 %v1263_v46, 0.0 }
 0x1ed   : > { %v1322_v57 = vpack.c.bf16 %v1293_v43, %v1292_v45  ;;  %v1296_v2 = vmax.f32 %v1264_v53, 0.0  ;;  %v1297_v4 = vmax.f32 %v1265_v55, 0.0  ;;  %v1266_v12 = vadd.f32 %v5452_v28, %v1227_v62 }
 0x1ee   : > { %4188 = vmatprep.mubr.bf16.mxu0 %v1320_v49  ;;  %v1323_v10 = vpack.c.bf16 %v1295_v60, %v1294_v59  ;;  %v1267_v14 = vadd.f32 %v5452_v28, %v1228_v0  ;;  %v1268_v50 = vadd.f32 %v5452_v28, %v1229_v6  ;;  %v1269_v20 = vadd.f32 %v5452_v28, %v1230_v8 }
 0x1ef   : > { %4189 = vmatmul.mubr.bf16.vlgmr.msra.gmra.mrb[0].mxu0 %v1321_v51  ;;  %v1324_v18 = vpack.c.bf16 %v1297_v4, %v1296_v2  ;;  %v1298_v52 = vmax.f32 %v1266_v12, 0.0  ;;  %v1231_v25 = vmul.f32 %v5438_v16, %v5309_v58  ;;  %v1233_v48 = vmul.f32 %v5438_v16, %v5316_v63 }
 0x1f0   : > { %4192 = vmatprep.mubr.bf16.mxu0 %v1322_v57  ;;  %v1299_v22 = vmax.f32 %v1267_v14, 0.0  ;;  %v1300_v56 = vmax.f32 %v1268_v50, 0.0  ;;  %v1301_v27 = vmax.f32 %v1269_v20, 0.0  ;;  %v1234_v29 = vmul.f32 %v5438_v16, %v5319_v1 }
 0x1f1   : > { %v1270_v31 = vadd.f32 %v5452_v28, %v1231_v25  ;;  %v1271_v33 = vadd.f32 %v5452_v28, %v1232_v54  ;;  %v1272_v58 = vadd.f32 %v5452_v28, %v1233_v48  ;;  %v1235_v35 = vmul.f32 %v5438_v16, %v5322_v3 }
 0x1f2   : > { %v1325_v30 = vpack.c.bf16 %v1299_v22, %v1298_v52  ;;  %v1326_v34 = vpack.c.bf16 %v1301_v27, %v1300_v56  ;;  %v1273_v36 = vadd.f32 %v5452_v28, %v1234_v29  ;;  %v1236_v63 = vmul.f32 %v5438_v16, %v5325_v5 }
 0x1f3   : > { %v1302_v61 = vmax.f32 %v1270_v31, 0.0  ;;  %v1303_v38 = vmax.f32 %v1271_v33, 0.0  ;;  %v1304_v1 = vmax.f32 %v1272_v58, 0.0  ;;  %v1237_v41 = vmul.f32 %v5438_v16, %v5328_v7  ;;  %v4462_v31 = vld [vmem:[%s6918_s9 + $0x20] sm:$0xff]   ;;  %v4463_v33 = vld [vmem:[%s6918_s9 + $0x28] sm:$0xff]   ;;  %v4465_v58 = vld [vmem:[%s6918_s9 + $0x38] sm:$0xff]  }
 0x1f4   : > { %v1305_v37 = vmax.f32 %v1273_v36, 0.0  ;;  %v1238_v39 = vmul.f32 %v5438_v16, %v5331_v9  ;;  %v1274_v40 = vadd.f32 %v5452_v28, %v1235_v35  ;;  %v1275_v42 = vadd.f32 %v5452_v28, %v1236_v63  ;;  %v4466_v36 = vld [vmem:[%s6922_s13] sm:$0xff]  }
 0x1f5   : > { %v1327_v44 = vpack.c.bf16 %v1303_v38, %v1302_v61  ;;  %v1276_v3 = vadd.f32 %v5452_v28, %v1237_v41  ;;  %v1239_v46 = vmul.f32 %v5438_v16, %v5334_v11  ;;  %v1240_v7 = vmul.f32 %v5438_v16, %v5337_v13  ;;  %v5568_v61 = vld [vmem:[%s6917_s8] ss:$0 sm:$0xff] }
 0x1f6   : > { %v1328_v45 = vpack.c.bf16 %v1305_v37, %v1304_v1  ;;  %v1277_v43 = vadd.f32 %v5452_v28, %v1238_v39  ;;  %v1306_v5 = vmax.f32 %v1274_v40, 0.0  ;;  %v1307_v47 = vmax.f32 %v1275_v42, 0.0 }
 0x1f7   : > { %4193 = vmatmul.mubr.bf16.gmra.mrb[4].mxu0 %v1323_v10  ;;  %v1308_v9 = vmax.f32 %v1276_v3, 0.0  ;;  %v1241_v51 = vmul.f32 %v5438_v16, %v5340_v15  ;;  %v1242_v53 = vmul.f32 %v5438_v16, %v5343_v17  ;;  %v1278_v57 = vadd.f32 %v5452_v28, %v1239_v46 }
 0x1f8   : > { %4196 = vmatprep.mubr.bf16.mxu0 %v1324_v18  ;;  %v1309_v49 = vmax.f32 %v1277_v43, 0.0  ;;  %v1329_v55 = vpack.c.bf16 %v1307_v47, %v1306_v5  ;;  %v1279_v59 = vadd.f32 %v5452_v28, %v1240_v7  ;;  %v1243_v2 = vmul.f32 %v5438_v16, %v5346_v19 }
 0x1f9   : > { %v1280_v11 = vadd.f32 %v5452_v28, %v1241_v51  ;;  %v1281_v62 = vadd.f32 %v5452_v28, %v1242_v53  ;;  %v1310_v13 = vmax.f32 %v1278_v57, 0.0  ;;  %v1244_v15 = vmul.f32 %v5438_v16, %v5349_v21 }
 0x1fa   : > { %v1330_v60 = vpack.c.bf16 %v1309_v49, %v1308_v9  ;;  %v1311_v0 = vmax.f32 %v1279_v59, 0.0  ;;  %v1245_v6 = vmul.f32 %v5438_v16, %v5352_v23  ;;  %v1246_v8 = vmul.f32 %v5438_v16, %v5355_v26 }
 0x1fb   : > { %v1312_v17 = vmax.f32 %v1280_v11, 0.0  ;;  %v1313_v4 = vmax.f32 %v1281_v62, 0.0  ;;  %v1282_v12 = vadd.f32 %v5452_v28, %v1243_v2  ;;  %v1283_v14 = vadd.f32 %v5452_v28, %v1244_v15 }
 0x1fc   : > { %v1331_v10 = vpack.c.bf16 %v1311_v0, %v1310_v13  ;;  %v1284_v19 = vadd.f32 %v5452_v28, %v1245_v6  ;;  %v1285_v50 = vadd.f32 %v5452_v28, %v1246_v8  ;;  %v1247_v52 = vmul.f32 %v5438_v16, %v5358_v24  ;;  %v4458_v24 = vld [vmem:[%s6918_s9] sm:$0xff]  }
 0x1fd   : > { %v1332_v18 = vpack.c.bf16 %v1313_v4, %v1312_v17  ;;  %v1314_v21 = vmax.f32 %v1282_v12, 0.0  ;;  %v1315_v20 = vmax.f32 %v1283_v14, 0.0  ;;  %v1248_v23 = vmul.f32 %v5438_v16, %v5361_v32  ;;  %4220 = vmatprep.subr.bf16.mxu1 %v4458_v24  ;;  %v4459_v32 = vld [vmem:[%s6918_s9 + $0x8] sm:$0xff]   ;;  %v4460_v16 = vld [vmem:[%s6918_s9 + $0x10] sm:$0xff]  }
 0x1fe   : > { %v1316_v26 = vmax.f32 %v1284_v19, 0.0  ;;  %v1317_v22 = vmax.f32 %v1285_v50, 0.0  ;;  %v1286_v54 = vadd.f32 %v5452_v28, %v1247_v52  ;;  %4221 = vmatpush3.bf16.msra.mxu1 %v4458_v24 }
 0x1ff   : > { %4197 = vmatmul.mubr.bf16.gmra.mrb[8].mxu0 %v1325_v30  ;;  %v1333_v25 = vpack.c.bf16 %v1315_v20, %v1314_v21  ;;  %v1287_v56 = vadd.f32 %v5452_v28, %v1248_v23  ;;  %4222 = vmatprep.subr.bf16.mxu1 %v4459_v32  ;;  %v4461_v28 = vld [vmem:[%s6918_s9 + $0x18] sm:$0xff]  }
 0x200   : > { %4200 = vmatprep.mubr.bf16.mxu0 %v1326_v34  ;;  %v1334_v27 = vpack.c.bf16 %v1317_v22, %v1316_v26  ;;  %v1318_v48 = vmax.f32 %v1286_v54, 0.0  ;;  %v4464_v34 = vld [vmem:[%s6918_s9 + $0x30] sm:$0xff]  }
 0x201   : > { %v1319_v29 = vmax.f32 %v1287_v56, 0.0 }
 0x202   : > { %4223 = vmatpush3.bf16.msra.mxu1 %v4459_v32 }
 0x203   : > { %v1335_v30 = vpack.c.bf16 %v1319_v29, %v1318_v48  ;;  %4224 = vmatprep.subr.bf16.mxu1 %v4460_v16 }
 0x206   : > { %4225 = vmatpush3.bf16.msra.mxu1 %v4460_v16 }
 0x207   : > { %4201 = vmatmul.mubr.bf16.gmra.mrb[12].mxu0 %v1327_v44  ;;  %4226 = vmatprep.subr.bf16.mxu1 %v4461_v28 }
 0x208   : > { %4204 = vmatprep.mubr.bf16.mxu0 %v1328_v45 }
 0x20a   : > { %4227 = vmatpush3.bf16.msra.mxu1 %v4461_v28 }
 0x20b   : > { %4228 = vmatprep.subr.bf16.mxu1 %v4462_v31 }
 0x20e   : > { %4229 = vmatpush3.bf16.msra.mxu1 %v4462_v31 }
 0x20f   : > { %4205 = vmatmul.mubr.bf16.gmra.mrb[16].mxu0 %v1329_v55  ;;  %4230 = vmatprep.subr.bf16.mxu1 %v4463_v33 }
 0x210   : > { %4208 = vmatprep.mubr.bf16.mxu0 %v1330_v60 }
 0x212   : > { %4231 = vmatpush3.bf16.msra.mxu1 %v4463_v33 }
 0x213   : > { %4232 = vmatprep.subr.bf16.mxu1 %v4464_v34 }
 0x216   : > { %4233 = vmatpush3.bf16.msra.mxu1 %v4464_v34  ;;  %v1760_v34 = vld [vmem:[%s6983_s2] sm:$0xff] }
 0x217   : > { %4209 = vmatmul.mubr.bf16.gmra.mrb[20].mxu0 %v1331_v10  ;;  %4234 = vmatprep.subr.bf16.mxu1 %v4465_v58 }
 0x218   : > { %4212 = vmatprep.mubr.bf16.mxu0 %v1332_v18 }
 0x21a   : > { %4235 = vmatpush3.bf16.msra.mxu1 %v4465_v58 }
 0x21b   : > { %4316 = vmatprep.subr.bf16.mxu1 %v4466_v36 }
 0x21f   : > { %4213 = vmatmul.mubr.bf16.gmra.mrb[24].mxu0 %v1333_v25 }
 0x220   : > { %4216 = vmatprep.mubr.bf16.mxu0 %v1334_v27 }
 0x227   : > { %4217 = vmatmul.mubr.bf16.gmra.mrb[28].mxu0 %v1335_v30 }
 0x2c2   : > { %v4190_v38 = vpop.f32.mrb[0].mxu0 }
 0x2c3   : > { %v1450_v35 = vadd.f32 %v4190_v38, %v5568_v61  ;;  %v1441_v63 = vpop.f32.mrb[1].mxu0 }
 0x2c4   : > { %v1442_v1 = vadd.f32 %v5568_v61, %v1441_v63  ;;  %v4191_v37 = vpop.f32.mrb[2].mxu0 }
 0x2c5   : > { %v3810_v41 = vmul.f32 -1.442695, %v1450_v35  ;;  %v1453_v39 = vadd.f32 %v4191_v37, %v5568_v61  ;;  %v1444_v44 = vpop.f32.mrb[3].mxu0  ;;  %v1762_v35 = vld [vmem:[%s6983_s2 + $0x10] sm:$0xff]  ;;  %v1761_v37 = vld [vmem:[%s6983_s2 + $0x8] sm:$0xff] }
 0x2c6   : > { %v3808_v40 = vmul.f32 -1.442695, %v1442_v1  ;;  %v1445_v42 = vadd.f32 %v5568_v61, %v1444_v44 }
 0x2c7   : > { %4484 = vpow2.f32 %v3810_v41  ;;  %v3811_v45 = vmul.f32 -1.442695, %v1453_v39 }
 0x2c8   : > { %4486 = vpow2.f32 %v3808_v40  ;;  %v3809_v3 = vmul.f32 -1.442695, %v1445_v42 }
 0x2c9   : > { %4488 = vpow2.f32 %v3811_v45 }
 0x2ca   : > { %4490 = vpow2.f32 %v3809_v3  ;;  %v4194_v43 = vpop.f32.mrb[4].mxu0 }
 0x2cb   : > { %v1466_v5 = vadd.f32 %v4194_v43, %v5568_v61  ;;  %v1457_v47 = vpop.f32.mrb[5].mxu0 }
 0x2cc   : > { %v1458_v46 = vadd.f32 %v5568_v61, %v1457_v47  ;;  %v4195_v7 = vpop.f32.mrb[6].mxu0 }
 0x2cd   : > { %v3814_v9 = vmul.f32 -1.442695, %v1466_v5  ;;  %v1469_v49 = vadd.f32 %v4195_v7, %v5568_v61  ;;  %v1460_v51 = vpop.f32.mrb[7].mxu0 }
 0x2ce   : > { %v3812_v53 = vmul.f32 -1.442695, %v1458_v46  ;;  %v1461_v55 = vadd.f32 %v5568_v61, %v1460_v51 }
 0x2cf   : > { %4492 = vpow2.f32 %v3814_v9  ;;  %v3815_v57 = vmul.f32 -1.442695, %v1469_v49 }
 0x2d0   : > { %4494 = vpow2.f32 %v3812_v53  ;;  %v3813_v59 = vmul.f32 -1.442695, %v1461_v55 }
 0x2d1   : > { %v4485_v60 = vpop.eup %4484  ;;  %4496 = vpow2.f32 %v3815_v57 }
 0x2d2   : > { %v4487_v11 = vpop.eup %4486  ;;  %v1666_v62 = vadd.f32 1.0, %v4485_v60  ;;  %4498 = vpow2.f32 %v3813_v59  ;;  %v4198_v13 = vpop.f32.mrb[8].mxu0 }
 0x2d3   : > { %v4489_v0 = vpop.eup %4488  ;;  %v1664_v2 = vadd.f32 1.0, %v4487_v11  ;;  %v1482_v15 = vadd.f32 %v4198_v13, %v5568_v61  ;;  %v1473_v17 = vpop.f32.mrb[9].mxu0 }
 0x2d4   : > { %v4491_v4 = vpop.eup %4490  ;;  %4500 = vrcp.f32 %v1666_v62  ;;  %v1667_v6 = vadd.f32 1.0, %v4489_v0  ;;  %v1474_v8 = vadd.f32 %v5568_v61, %v1473_v17  ;;  %v4199_v10 = vpop.f32.mrb[10].mxu0  ;;  %v1763_v17 = vld [vmem:[%s6983_s2 + $0x18] sm:$0xff] }
 0x2d5   : > { %4502 = vrcp.f32 %v1664_v2  ;;  %v1665_v12 = vadd.f32 1.0, %v4491_v4  ;;  %v3818_v14 = vmul.f32 -1.442695, %v1482_v15  ;;  %v1485_v18 = vadd.f32 %v4199_v10, %v5568_v61  ;;  %v1476_v19 = vpop.f32.mrb[11].mxu0 }
 0x2d6   : > { %4504 = vrcp.f32 %v1667_v6  ;;  %v3816_v50 = vmul.f32 -1.442695, %v1474_v8  ;;  %v1477_v21 = vadd.f32 %v5568_v61, %v1476_v19 }
 0x2d7   : > { %4506 = vrcp.f32 %v1665_v12  ;;  %v3819_v20 = vmul.f32 -1.442695, %v1485_v18  ;;  %v6929_v18 = vmov 0.0  }
 0x2d8   : > { %4508 = vpow2.f32 %v3818_v14  ;;  %v3817_v52 = vmul.f32 -1.442695, %v1477_v21 }
 0x2d9   : > { %v4493_v23 = vpop.eup %4492  ;;  %4510 = vpow2.f32 %v3816_v50 }
 0x2da   : > { %v4495_v26 = vpop.eup %4494  ;;  %v1670_v22 = vadd.f32 1.0, %v4493_v23  ;;  %4512 = vpow2.f32 %v3819_v20  ;;  %v4202_v25 = vpop.f32.mrb[12].mxu0 }
 0x2db   : > { %v4497_v54 = vpop.eup %4496  ;;  %v1668_v56 = vadd.f32 1.0, %v4495_v26  ;;  %4514 = vpow2.f32 %v3817_v52  ;;  %v1498_v27 = vadd.f32 %v4202_v25, %v5568_v61  ;;  %v1489_v48 = vpop.f32.mrb[13].mxu0 }
 0x2dc   : > { %v4499_v29 = vpop.eup %4498  ;;  %4516 = vrcp.f32 %v1670_v22  ;;  %v1671_v30 = vadd.f32 1.0, %v4497_v54  ;;  %v1490_v24 = vadd.f32 %v5568_v61, %v1489_v48  ;;  %v4203_v32 = vpop.f32.mrb[14].mxu0 }
 0x2dd   : > { %4518 = vrcp.f32 %v1668_v56  ;;  %v1669_v16 = vadd.f32 1.0, %v4499_v29  ;;  %v3822_v28 = vmul.f32 -1.442695, %v1498_v27  ;;  %v1501_v31 = vadd.f32 %v4203_v32, %v5568_v61  ;;  %v1492_v33 = vpop.f32.mrb[15].mxu0 }
 0x2de   : > { %v5588_v58 = vpop.eup %4500  ;;  %4520 = vrcp.f32 %v1671_v30  ;;  %v3820_v36 = vmul.f32 -1.442695, %v1490_v24  ;;  %v1493_v38 = vadd.f32 %v5568_v61, %v1492_v33 }
 0x2df   : > { %v5594_v63 = vpop.eup %4502  ;;  %4522 = vrcp.f32 %v1669_v16  ;;  %v3823_v1 = vmul.f32 -1.442695, %v1501_v31  ;;  %v1794_v42 = vadd.f32 %v5588_v58, %v1762_v35  ;;  %v5606_v45 = vadd.f32 1e-07, %v5588_v58 }
 0x2e0   : > { %v5599_v41 = vpop.eup %4504  ;;  %4524 = vpow2.f32 %v3822_v28  ;;  %v3821_v39 = vmul.f32 -1.442695, %v1493_v38  ;;  %v1792_v44 = vadd.f32 %v5594_v63, %v1760_v34  ;;  %v5612_v46 = vadd.f32 1e-07, %v5594_v63 }
 0x2e1   : > { %v5602_v40 = vpop.eup %4506  ;;  %4526 = vpow2.f32 %v3820_v36  ;;  %v2992_v53 = vsub.f32 1.0, %v5594_v63  ;;  %v1795_v52 = vadd.f32 %v5599_v41, %v1763_v17  ;;  %v5647_v26 = vadd.f32 -1.0, %v1794_v42  ;;  %v5665_v42 = vld [vmem:[%s6923_s14] ss:$0 sm:$0xff] }
 0x2e2   : > { %v4509_v3 = vpop.eup %4508  ;;  %4528 = vpow2.f32 %v3823_v1  ;;  %v4206_v43 = vpop.f32.mrb[16].mxu0  ;;  %v1793_v5 = vadd.f32 %v5602_v40, %v1761_v37  ;;  %v5609_v47 = vadd.f32 -1.0, %v1792_v44  ;;  %v5651_v56 = vadd.f32 1e-07, %v5602_v40 }
 0x2e3   : > { %v4511_v7 = vpop.eup %4510  ;;  %v1674_v9 = vadd.f32 1.0, %v4509_v3  ;;  %4530 = vpow2.f32 %v3821_v39  ;;  %v1514_v49 = vadd.f32 %v4206_v43, %v5568_v61  ;;  %v1505_v51 = vpop.f32.mrb[17].mxu0  ;;  %v2993_v27 = vsub.f32 1.0, %v5602_v40 }
 0x2e4   : > { %v4513_v55 = vpop.eup %4512  ;;  %v1672_v57 = vadd.f32 1.0, %v4511_v7  ;;  %v1506_v59 = vadd.f32 %v5568_v61, %v1505_v51  ;;  %v4207_v60 = vpop.f32.mrb[18].mxu0  ;;  %v5617_v11 = vadd.f32 -1.0, %v1793_v5  ;;  %vm1856_vm0 = vcmp.gt.f32.partialorder %v5609_v47, 0.0 }
 0x2e5   : > { %v4515_v62 = vpop.eup %4514  ;;  %4532 = vrcp.f32 %v1674_v9  ;;  %v1675_v13 = vadd.f32 1.0, %v4513_v55  ;;  %v3826_v0 = vmul.f32 -1.442695, %v1514_v49  ;;  %v1517_v2 = vadd.f32 %v4207_v60, %v5568_v61  ;;  %v1508_v15 = vpop.f32.mrb[19].mxu0 }
 0x2e6   : > { %v5624_v4 = vpop.eup %4516  ;;  %4534 = vrcp.f32 %v1672_v57  ;;  %v1673_v6 = vadd.f32 1.0, %v4515_v62  ;;  %v3824_v8 = vmul.f32 -1.442695, %v1506_v59  ;;  %v1509_v10 = vadd.f32 %v5568_v61, %v1508_v15 }
 0x2e7   : > { %v5627_v12 = vpop.eup %4518  ;;  %4536 = vrcp.f32 %v1675_v13  ;;  %v3827_v14 = vmul.f32 -1.442695, %v1517_v2  ;;  %vm1857_vm1 = vcmp.gt.f32.partialorder %v5617_v11, 0.0  ;;  %v5633_v19 = vsel %vm1856_vm0, 1.0, %v6929_v18 }
 0x2e8   : > { %6984 = vst [vmem:[#allocation11_spill] sm:$0xff] %v5633_v19  ;;  %v5635_v50 = vpop.eup %4520  ;;  %4538 = vrcp.f32 %v1673_v6  ;;  %v3825_v21 = vmul.f32 -1.442695, %v1509_v10  ;;  %v5640_v20 = vsel %vm1857_vm1, 1.0, %v6929_v18  ;;  %vm2960_vm2 = vcmp.lt.f32.partialorder %v5633_v19, 0.5  ;;  %vm5698_vm6 = vmpackc.low %vm1857_vm1, %vm1856_vm0 }
 0x2e9   : > { %6985 = vst [vmem:[#allocation12_spill] sm:$0xff] %v5640_v20  ;;  %v5643_v23 = vpop.eup %4522  ;;  %4540 = vpow2.f32 %v3826_v0  ;;  %vm2961_vm3 = vcmp.lt.f32.partialorder %v5640_v20, 0.5  ;;  %v1952_v54 = vmax.f32 %v5609_v47, 0.0  ;;  %v3024_v32 = vsel %vm2960_vm2, %v2992_v53, %v5594_v63 }
 0x2ea   : > { %v4525_v22 = vpop.eup %4524  ;;  %4542 = vpow2.f32 %v3824_v8  ;;  %v4210_v25 = vpop.f32.mrb[20].mxu0  ;;  %v3025_v34 = vsel %vm2961_vm3, %v2993_v27, %v5602_v40  ;;  %v3514_v43 = vmul.f32 %v5665_v42, %v5640_v20  ;;  %v5671_v5 = vadd.f32 -1.0, %v1795_v52 }
 0x2eb   : > { %v4527_v48 = vpop.eup %4526  ;;  %v1678_v29 = vadd.f32 1.0, %v4525_v22  ;;  %4544 = vpow2.f32 %v3827_v14  ;;  %v1530_v30 = vadd.f32 %v4210_v25, %v5568_v61  ;;  %v1521_v24 = vpop.f32.mrb[21].mxu0  ;;  %v1953_v49 = vmax.f32 %v5617_v11, 0.0 }
 0x2ec   : > { %v4529_v16 = vpop.eup %4528  ;;  %v1676_v28 = vadd.f32 1.0, %v4527_v48  ;;  %4546 = vpow2.f32 %v3825_v21  ;;  %v1522_v31 = vadd.f32 %v5568_v61, %v1521_v24  ;;  %v4211_v33 = vpop.f32.mrb[22].mxu0  ;;  %vm1858_vm4 = vcmp.gt.f32.partialorder %v5647_v26, 0.0 }
 0x2ed   : > { %v4531_v36 = vpop.eup %4530  ;;  %4548 = vrcp.f32 %v1678_v29  ;;  %v1679_v38 = vadd.f32 1.0, %v4529_v16  ;;  %v3830_v35 = vmul.f32 -1.442695, %v1530_v30  ;;  %v1533_v1 = vadd.f32 %v4211_v33, %v5568_v61  ;;  %v1524_v37 = vpop.f32.mrb[23].mxu0 }
 0x2ee   : > { %4550 = vrcp.f32 %v1676_v28  ;;  %v1677_v39 = vadd.f32 1.0, %v4531_v36  ;;  %v3828_v63 = vmul.f32 -1.442695, %v1522_v31  ;;  %v1525_v44 = vadd.f32 %v5568_v61, %v1524_v37 }
 0x2ef   : > { %v5667_v3 = vpop.eup %4532  ;;  %4552 = vrcp.f32 %v1679_v38  ;;  %v3831_v40 = vmul.f32 -1.442695, %v1533_v1  ;;  %v3513_v53 = vmul.f32 %v5665_v42, %v5633_v19  ;;  %vm1859_vm5 = vcmp.gt.f32.partialorder %v5671_v5, 0.0  ;;  %v1764_v1 = vld [vmem:[%s6983_s2 + $0x20] sm:$0xff] }
 0x2f0   : > { %v5673_v7 = vpop.eup %4534  ;;  %4554 = vrcp.f32 %v1677_v39  ;;  %v3829_v9 = vmul.f32 -1.442695, %v1525_v44  ;;  %v5685_v55 = vsel %vm1858_vm4, 1.0, %v6929_v18  ;;  %v5689_v60 = vadd.f32 1e-07, %v3024_v32  ;;  %vm5712_vm7 = vmpackc.low %vm1859_vm5, %vm1858_vm4 }
 0x2f1   : > { %v5677_v51 = vpop.eup %4536  ;;  %4556 = vpow2.f32 %v3830_v35  ;;  %6986 = vst [vmem:[#allocation13_spill] sm:$0xff] %v5685_v55  ;;  %v5691_v62 = vadd.f32 1e-07, %v3025_v34  ;;  %v6987_v0 = vmov 0  ;;  %v3586_v6 = vadd.f32 %v3514_v43, %v3513_v53 }
 0x2f2   : > { %v5687_v57 = vpop.eup %4538  ;;  %4558 = vpow2.f32 %v3828_v63  ;;  %v4214_v59 = vpop.f32.mrb[24].mxu0  ;;  %v6988_v0 = vsel %vm5698_vm6, 4294967295, %v6987_v0  ;;  %v5706_v8 = vsel %vm1859_vm5, 1.0, %v6929_v18  ;;  %v6991_v10 = vmov 0 }
 0x2f3   : > { %6989 = vst [vmem:[#allocation14_spill] sm:$0xff] %v6988_v0  ;;  %v4541_v2 = vpop.eup %4540  ;;  %4560 = vpow2.f32 %v3831_v40  ;;  %v1546_v15 = vadd.f32 %v4214_v59, %v5568_v61  ;;  %v1537_v17 = vpop.f32.mrb[25].mxu0  ;;  %6990 = vst [vmem:[#allocation15_spill] sm:$0xff] %v5706_v8  ;;  %v6992_v10 = vsel %vm5712_vm7, 4294967295, %v6991_v10  ;;  %vm2962_vm8 = vcmp.lt.f32.partialorder %v5685_v55, 0.5  ;;  %v1765_v40 = vld [vmem:[%s6983_s2 + $0x28] sm:$0xff] }
 0x2f4   : > { %6993 = vst [vmem:[#allocation16_spill] sm:$0xff] %v6992_v10  ;;  %v4543_v14 = vpop.eup %4542  ;;  %v1682_v21 = vadd.f32 1.0, %v4541_v2  ;;  %4562 = vpow2.f32 %v3829_v9  ;;  %v1538_v52 = vadd.f32 %v5568_v61, %v1537_v17  ;;  %v4215_v22 = vpop.f32.mrb[26].mxu0  ;;  %v2994_v30 = vsub.f32 1.0, %v5588_v58 }
 0x2f5   : > { %v4545_v25 = vpop.eup %4544  ;;  %v1680_v27 = vadd.f32 1.0, %v4543_v14  ;;  %v1549_v48 = vadd.f32 %v4215_v22, %v5568_v61  ;;  %v1540_v29 = vpop.f32.mrb[27].mxu0  ;;  %4564 = vrcp.f32 %v5612_v46  ;;  %v3834_v16 = vmul.f32 -1.442695, %v1546_v15 }
 0x2f6   : > { %v4547_v24 = vpop.eup %4546  ;;  %4566 = vrcp.f32 %v1682_v21  ;;  %v1683_v32 = vadd.f32 1.0, %v4545_v25  ;;  %v1541_v28 = vadd.f32 %v5568_v61, %v1540_v29  ;;  %v3832_v34 = vmul.f32 -1.442695, %v1538_v52 }
 0x2f7   : > { %v5722_v31 = vpop.eup %4548  ;;  %4568 = vrcp.f32 %v1680_v27  ;;  %v1681_v33 = vadd.f32 1.0, %v4547_v24  ;;  %vm2963_vm9 = vcmp.lt.f32.partialorder %v5706_v8, 0.5  ;;  %v3835_v38 = vmul.f32 -1.442695, %v1549_v48 }
 0x2f8   : > { %v5725_v36 = vpop.eup %4550  ;;  %4570 = vrcp.f32 %v1683_v32  ;;  %v2995_v46 = vsub.f32 1.0, %v5599_v41  ;;  %v3026_v35 = vsel %vm2962_vm8, %v2994_v30, %v5588_v58  ;;  %v3833_v39 = vmul.f32 -1.442695, %v1541_v28 }
 0x2f9   : > { %v5734_v37 = vpop.eup %4552  ;;  %4572 = vrcp.f32 %v1681_v33  ;;  %v5738_v44 = vadd.f32 1e-07, %v5599_v41  ;;  %v5748_v53 = vadd.f32 1e-07, %v3026_v35  ;;  %v3515_v59 = vmul.f32 %v5665_v42, %v5685_v55 }
 0x2fa   : > { %v5743_v43 = vpop.eup %4554  ;;  %4574 = vpow2.f32 %v3834_v16  ;;  %v4218_v58 = vpop.f32.mrb[28].mxu0  ;;  %v3027_v9 = vsel %vm2963_vm9, %v2995_v46, %v5599_v41  ;;  %v3516_v14 = vmul.f32 %v5665_v42, %v5706_v8  ;;  %v1796_v21 = vadd.f32 %v5627_v12, %v1764_v1 }
 0x2fb   : > { %v4557_v2 = vpop.eup %4556  ;;  %4576 = vpow2.f32 %v3832_v34  ;;  %v1562_v15 = vadd.f32 %v4218_v58, %v5568_v61  ;;  %v1553_v17 = vpop.f32.mrb[29].mxu0  ;;  %v1797_v27 = vadd.f32 %v5643_v23, %v1765_v40  ;;  %v3587_v32 = vadd.f32 %v3586_v6, %v3515_v59 }
 0x2fc   : > { %v4559_v52 = vpop.eup %4558  ;;  %v1686_v22 = vadd.f32 1.0, %v4557_v2  ;;  %4578 = vpow2.f32 %v3835_v38  ;;  %v1554_v41 = vadd.f32 %v5568_v61, %v1553_v17  ;;  %v4219_v25 = vpop.f32.mrb[30].mxu0  ;;  %v5760_v1 = vadd.f32 -1.0, %v1796_v21 }
 0x2fd   : > { %v4561_v48 = vpop.eup %4560  ;;  %v1684_v29 = vadd.f32 1.0, %v4559_v52  ;;  %4580 = vpow2.f32 %v3833_v39  ;;  %v1565_v30 = vadd.f32 %v4219_v25, %v5568_v61  ;;  %v1556_v24 = vpop.f32.mrb[31].mxu0  ;;  %v3838_v33 = vmul.f32 -1.442695, %v1562_v15 }
 0x2fe   : > { %v4563_v16 = vpop.eup %4562  ;;  %4582 = vrcp.f32 %v1686_v22  ;;  %v1687_v28 = vadd.f32 1.0, %v4561_v48  ;;  %v1557_v34 = vadd.f32 %v5568_v61, %v1556_v24  ;;  %v3836_v35 = vmul.f32 -1.442695, %v1554_v41 }
 0x2ff   : > { %v4565_v46 = vpop.eup %4564  ;;  %4584 = vrcp.f32 %v1684_v29  ;;  %v1685_v38 = vadd.f32 1.0, %v4563_v16  ;;  %v3839_v39 = vmul.f32 -1.442695, %v1565_v30  ;;  %v5766_v6 = vadd.f32 -1.0, %v1797_v27 }
 0x300   : > { %v5762_v40 = vpop.eup %4566  ;;  %4586 = vrcp.f32 %v1687_v28  ;;  %v2048_v58 = vmul.f32 %v4565_v46, %v1952_v54  ;;  %v3837_v2 = vmul.f32 -1.442695, %v1557_v34  ;;  %v5770_v61 = vadd.f32 1e-07, %v3027_v9  ;;  %v1766_v28 = vld [vmem:[%s6983_s2 + $0x30] sm:$0xff] }
 0x301   : > { %v5768_v59 = vpop.eup %4568  ;;  %4588 = vrcp.f32 %v1685_v38  ;;  %vm1860_vm10 = vcmp.gt.f32.partialorder %v5760_v1, 0.0  ;;  %vm1861_vm11 = vcmp.gt.f32.partialorder %v5766_v6, 0.0  ;;  %v3588_v54 = vadd.f32 %v3587_v32, %v3516_v14 }
 0x302   : > { %v5773_v15 = vpop.eup %4570  ;;  %4590 = vpow2.f32 %v3838_v33  ;;  %v2080_v17 = vmul.f32 1.7182819, %v2048_v58  ;;  %v5777_v21 = vsel %vm1860_vm10, 1.0, %v6929_v18  ;;  %v5782_v52 = vsel %vm1861_vm11, 1.0, %v6929_v18  ;;  %vm5787_vm12 = vmpackc.low %vm1861_vm11, %vm1860_vm10  ;;  %v1767_v33 = vld [vmem:[%s6983_s2 + $0x38] sm:$0xff] }
 0x303   : > { %6994 = vst [vmem:[#allocation17_spill] sm:$0xff] %v5777_v21  ;;  %v5779_v47 = vpop.eup %4572  ;;  %4592 = vpow2.f32 %v3836_v35  ;;  %6995 = vst [vmem:[#allocation18_spill] sm:$0xff] %v5782_v52  ;;  %v5785_v9 = vadd.f32 1e-07, %v5627_v12  ;;  %v6996_v22 = vmov 0  ;;  %vm2964_vm13 = vcmp.lt.f32.partialorder %v5777_v21, 0.5 }
 0x304   : > { %v6997_v22 = vsel %vm5787_vm12, 4294967295, %v6996_v22  ;;  %v4575_v41 = vpop.eup %4574  ;;  %4594 = vpow2.f32 %v3839_v39  ;;  %vm2965_vm14 = vcmp.lt.f32.partialorder %v5782_v52, 0.5  ;;  %v2996_v25 = vsub.f32 1.0, %v5627_v12 }
 0x305   : > { %6998 = vst [vmem:[#allocation19_spill] sm:$0xff] %v6997_v22  ;;  %v4577_v27 = vpop.eup %4576  ;;  %v1690_v14 = vadd.f32 1.0, %v4575_v41  ;;  %4596 = vpow2.f32 %v3837_v2  ;;  %v2997_v48 = vsub.f32 1.0, %v5643_v23  ;;  %v3517_v29 = vmul.f32 %v5665_v42, %v5777_v21 }
 0x306   : > { %v4579_v30 = vpop.eup %4578  ;;  %v1688_v24 = vadd.f32 1.0, %v4577_v27  ;;  %4598 = vrcp.f32 %v5651_v56  ;;  %v2112_v32 = vadd.f32 1.0, %v2080_v17  ;;  %v3028_v38 = vsel %vm2964_vm13, %v2996_v25, %v5627_v12 }
 0x307   : > { %v4581_v34 = vpop.eup %4580  ;;  %4600 = vrcp.f32 %v1690_v14  ;;  %v1691_v46 = vadd.f32 1.0, %v4579_v30  ;;  %v3029_v56 = vsel %vm2965_vm14, %v2997_v48, %v5643_v23  ;;  %v3518_v58 = vmul.f32 %v5665_v42, %v5782_v52 }
 0x308   : > { %v5811_v35 = vpop.eup %4582  ;;  %4602 = vrcp.f32 %v1688_v24  ;;  %v1689_v39 = vadd.f32 1.0, %v4581_v34  ;;  %v3589_v2 = vadd.f32 %v3588_v54, %v3517_v29  ;;  %v5818_v41 = vadd.f32 1e-07, %v5643_v23 }
 0x309   : > { %v5815_v17 = vpop.eup %4584  ;;  %4604 = vrcp.f32 %v1691_v46  ;;  %v1798_v12 = vadd.f32 %v5624_v4, %v1766_v28  ;;  %v1799_v25 = vadd.f32 %v5635_v50, %v1767_v33  ;;  %v5825_v48 = vadd.f32 1e-07, %v3028_v38  ;;  %v1769_v38 = vld [vmem:[%s6983_s2 + $0x48] sm:$0xff] }
 0x30a   : > { %v5822_v27 = vpop.eup %4586  ;;  %4606 = vrcp.f32 %v1689_v39  ;;  %v5827_v30 = vadd.f32 1e-07, %v3029_v56  ;;  %v5836_v24 = vadd.f32 1e-07, %v5624_v4  ;;  %v3590_v33 = vadd.f32 %v3589_v2, %v3518_v58 }
 0x30b   : > { %v5829_v54 = vpop.eup %4588  ;;  %4608 = vlog2.f32 %v2112_v32  ;;  %v5831_v29 = vadd.f32 -1.0, %v1798_v12  ;;  %v5833_v23 = vadd.f32 -1.0, %v1799_v25  ;;  %v5840_v34 = vadd.f32 1e-07, %v5635_v50  ;;  %v1768_v32 = vld [vmem:[%s6983_s2 + $0x40] sm:$0xff] }
 0x30c   : > { %v4591_v28 = vpop.eup %4590  ;;  %4610 = vlog2.f32 %v5689_v60  ;;  %v2998_v46 = vsub.f32 1.0, %v5624_v4  ;;  %v7001_v25 = vmov 0  ;;  %v2999_v14 = vsub.f32 1.0, %v5635_v50 }
 0x30d   : > { %v4593_v56 = vpop.eup %4592  ;;  %v1694_v39 = vadd.f32 1.0, %v4591_v28  ;;  %4612 = vlog2.f32 %v5691_v62  ;;  %vm1862_vm15 = vcmp.gt.f32.partialorder %v5831_v29, 0.0  ;;  %vm1863_vm0 = vcmp.gt.f32.partialorder %v5833_v23, 0.0 }
 0x30e   : > { %v4595_v60 = vpop.eup %4594  ;;  %v1692_v58 = vadd.f32 1.0, %v4593_v56  ;;  %4614 = vrcp.f32 %v5606_v45  ;;  %v5854_v2 = vsel %vm1862_vm15, 1.0, %v6929_v18  ;;  %v5857_v12 = vsel %vm1863_vm0, 1.0, %v6929_v18  ;;  %vm5859_vm1 = vmpackc.low %vm1863_vm0, %vm1862_vm15 }
 0x30f   : > { %6999 = vst [vmem:[#allocation20_spill] sm:$0xff] %v5854_v2  ;;  %7000 = vst [vmem:[#allocation21_spill] sm:$0xff] %v5857_v12  ;;  %v7002_v25 = vsel %vm5859_vm1, 4294967295, %v7001_v25  ;;  %v4597_v28 = vpop.eup %4596  ;;  %v1695_v62 = vadd.f32 1.0, %v4595_v60  ;;  %v1800_v16 = vadd.f32 %v5673_v7, %v1768_v32  ;;  %v1801_v56 = vadd.f32 %v5687_v57, %v1769_v38 }
 0x310   : > { %7003 = vst [vmem:[#allocation22_spill] sm:$0xff] %v7002_v25  ;;  %v4599_v63 = vpop.eup %4598  ;;  %4616 = vrcp.f32 %v1694_v39  ;;  %vm2966_vm2 = vcmp.lt.f32.partialorder %v5854_v2, 0.5  ;;  %vm2967_vm3 = vcmp.lt.f32.partialorder %v5857_v12, 0.5  ;;  %v5869_v45 = vadd.f32 1e-07, %v5673_v7 }
 0x311   : > { %v5871_v13 = vpop.eup %4600  ;;  %4618 = vrcp.f32 %v1692_v58  ;;  %v2049_v60 = vmul.f32 %v4599_v63, %v1953_v49  ;;  %v3030_v18 = vsel %vm2966_vm2, %v2998_v46, %v5624_v4  ;;  %v3031_v32 = vsel %vm2967_vm3, %v2999_v14, %v5635_v50 }
 0x312   : > { %v5877_v38 = vpop.eup %4602  ;;  %4620 = vrcp.f32 %v1695_v62  ;;  %v5879_v39 = vadd.f32 1.0, %v4597_v28  ;;  %v3062_v11 = vadd.f32 1e-07, %v3030_v18  ;;  %v5886_v49 = vadd.f32 -1.0, %v1800_v16 }
 0x313   : > { %v5883_v8 = vpop.eup %4604  ;;  %v2081_v55 = vmul.f32 1.7182819, %v2049_v60  ;;  %4622 = vrcp.f32 %v5738_v44  ;;  %v3063_v50 = vadd.f32 1e-07, %v3031_v32  ;;  %v3519_v63 = vmul.f32 %v5665_v42, %v5854_v2 }
 0x314   : > { %v5888_v4 = vpop.eup %4606  ;;  %4624 = vlog2.f32 %v5748_v53  ;;  %v5893_v14 = vadd.f32 -1.0, %v1801_v56  ;;  %v3520_v44 = vmul.f32 %v5665_v42, %v5857_v12  ;;  %vm1864_vm4 = vcmp.gt.f32.partialorder %v5886_v49, 0.0  ;;  %v5902_v53 = vld [vmem:[%s7004_s0] ss:$0 sm:$0xff] }
 0x315   : > { %v4609_v46 = vpop.eup %4608  ;;  %v2113_v58 = vadd.f32 1.0, %v2081_v55  ;;  %4626 = vlog2.f32 %v5770_v61  ;;  %v3591_v16 = vadd.f32 %v3590_v33, %v3519_v63  ;;  %v1993_v55 = vadd.f32 1e-07, %v5687_v57 }
 0x316   : > { %v4611_v18 = vpop.eup %4610  ;;  %4628 = vrcp.f32 %v5785_v9  ;;  %vm1865_vm5 = vcmp.gt.f32.partialorder %v5893_v14, 0.0  ;;  %v7005_v62 = vmov 0.0   ;;  %v7008_v32 = vmov 0 }
 0x317   : > { %v4613_v28 = vpop.eup %4612  ;;  %4630 = vlog2.f32 %v2113_v58  ;;  %v3089_v61 = vmul.f32 0.6931472, %v4611_v18  ;;  %v5908_v56 = vsel %vm1864_vm4, 1.0, %v7005_v62  ;;  %v5911_v60 = vsel %vm1865_vm5, 1.0, %v7005_v62  ;;  %vm5913_vm8 = vmpackc.low %vm1865_vm5, %vm1864_vm4 }
 0x318   : > { %7006 = vst [vmem:[#allocation23_spill] sm:$0xff] %v5908_v56  ;;  %7007 = vst [vmem:[#allocation24_spill] sm:$0xff] %v5911_v60  ;;  %v7009_v32 = vsel %vm5913_vm8, 4294967295, %v7008_v32  ;;  %v4615_v21 = vpop.eup %4614  ;;  %v3091_v9 = vmul.f32 0.6931472, %v4613_v28  ;;  %4632 = vrcp.f32 %v5818_v41  ;;  %vm2968_vm9 = vcmp.lt.f32.partialorder %v5908_v56, 0.5 }
 0x319   : > { %7010 = vst [vmem:[#allocation25_spill] sm:$0xff] %v7009_v32  ;;  %v3159_v63 = vmul.f32 %v5902_v53, %v3089_v61  ;;  %v7011_v58 = vmax.f32 %v5647_v26, 0.0  ;;  %4634 = vlog2.f32 %v5825_v48  ;;  %vm2969_vm10 = vcmp.lt.f32.partialorder %v5911_v60, 0.5 }
 0x31a   : > { %v5925_v52 = vpop.eup %4616  ;;  %v3160_v12 = vmul.f32 %v5902_v53, %v3091_v9  ;;  %4636 = vlog2.f32 %v5827_v30  ;;  %v3000_v41 = vsub.f32 1.0, %v5673_v7  ;;  %v3001_v28 = vsub.f32 1.0, %v5687_v57 }
 0x31b   : > { %v2050_v18 = vmul.f32 %v4615_v21, %v7011_v58  ;;  %v5931_v33 = vpop.eup %4618  ;;  %v2145_v61 = vmul.f32 0.6931472, %v4609_v46  ;;  %4638 = vrcp.f32 %v5836_v24  ;;  %v5934_v26 = vadd.f32 %v3591_v16, %v3520_v44  ;;  %v1770_v21 = vld [vmem:[%s6983_s2 + $0x50] sm:$0xff] }
 0x31c   : > { %v5939_v48 = vpop.eup %4620  ;;  %v3191_v9 = vadd.f32 %v3160_v12, %v3159_v63  ;;  %4640 = vrcp.f32 %v5840_v34  ;;  %v3032_v30 = vsel %vm2968_vm9, %v3000_v41, %v5673_v7  ;;  %v3033_v46 = vsel %vm2969_vm10, %v3001_v28, %v5687_v57  ;;  %v1771_v34 = vld [vmem:[%s6983_s2 + $0x58] sm:$0xff] }
 0x31d   : > { %v2082_v2 = vmul.f32 1.7182819, %v2050_v18  ;;  %v4623_v24 = vpop.eup %4622  ;;  %4642 = vlog2.f32 %v3062_v11  ;;  %v3521_v58 = vmul.f32 %v5665_v42, %v5908_v56  ;;  %v7012_v63 = vmax.f32 %v5671_v5, 0.0 }
 0x31e   : > { %v4625_v12 = vpop.eup %4624  ;;  %4644 = vlog2.f32 %v3063_v50  ;;  %v3064_v18 = vadd.f32 1e-07, %v3032_v30  ;;  %v1802_v57 = vadd.f32 %v5667_v3, %v1770_v21  ;;  %v3065_v11 = vadd.f32 1e-07, %v3033_v46 }
 0x31f   : > { %v2114_v44 = vadd.f32 1.0, %v2082_v2  ;;  %v2051_v7 = vmul.f32 %v4623_v24, %v7012_v63  ;;  %v4627_v41 = vpop.eup %4626  ;;  %v3093_v2 = vmul.f32 0.6931472, %v4625_v12  ;;  %v5959_v28 = vmul.f32 %v5665_v42, %v5911_v60 }
 0x320   : > { %v4629_v16 = vpop.eup %4628  ;;  %v3095_v20 = vmul.f32 0.6931472, %v4627_v41  ;;  %v1803_v5 = vadd.f32 %v5677_v51, %v1771_v34  ;;  %v7013_v21 = vmax.f32 %v5760_v1, 0.0 }
 0x321   : > { %4646 = vlog2.f32 %v2114_v44  ;;  %v2083_v56 = vmul.f32 1.7182819, %v2051_v7  ;;  %v4631_v24 = vpop.eup %4630  ;;  %v3161_v50 = vmul.f32 %v5902_v53, %v3093_v2  ;;  %v5966_v44 = vadd.f32 -1.0, %v1802_v57 }
 0x322   : > { %4648 = vrcp.f32 %v5869_v45  ;;  %v2052_v30 = vmul.f32 %v4629_v16, %v7013_v21  ;;  %v4633_v46 = vpop.eup %4632  ;;  %v2147_v12 = vmul.f32 0.6931472, %v4631_v24  ;;  %v3162_v60 = vmul.f32 %v5902_v53, %v3095_v20 }
 0x323   : > { %4650 = vrcp.f32 %v1993_v55  ;;  %v2115_v63 = vadd.f32 1.0, %v2083_v56  ;;  %v4635_v7 = vpop.eup %4634  ;;  %v3192_v41 = vadd.f32 %v3191_v9, %v3161_v50  ;;  %v7014_v45 = vmax.f32 %v5766_v6, 0.0 }
 0x324   : > { %4652 = vlog2.f32 %v3064_v18  ;;  %v2084_v19 = vmul.f32 1.7182819, %v2052_v30  ;;  %v4637_v2 = vpop.eup %4636  ;;  %v2208_v32 = vpack.c.bf16 %v2147_v12, %v2145_v61  ;;  %v3097_v1 = vmul.f32 0.6931472, %v4635_v7 }
 0x325   : > { %v2053_v34 = vmul.f32 %v4633_v46, %v7014_v45  ;;  %4654 = vlog2.f32 %v3065_v11  ;;  %v5971_v55 = vadd.f32 -1.0, %v1803_v5  ;;  %v4639_v16 = vpop.eup %4638  ;;  %v3193_v57 = vadd.f32 %v3192_v41, %v3162_v60 }
 0x326   : > { %4656 = vlog2.f32 %v2115_v63  ;;  %v2116_v56 = vadd.f32 1.0, %v2084_v19  ;;  %v3099_v21 = vmul.f32 0.6931472, %v4637_v2  ;;  %v4641_v20 = vpop.eup %4640  ;;  %4236 = vmatprep.mubr.bf16.mxu1 %v2208_v32  ;;  %v3163_v9 = vmul.f32 %v5902_v53, %v3097_v1 }
 0x327   : > { %v2085_v24 = vmul.f32 1.7182819, %v2053_v34  ;;  %v7015_v6 = vmax.f32 %v5831_v29, 0.0  ;;  %vm1866_vm11 = vcmp.gt.f32.partialorder %v5966_v44, 0.0  ;;  %vm1867_vm13 = vcmp.gt.f32.partialorder %v5971_v55, 0.0  ;;  %v4643_v61 = vpop.eup %4642 }
 0x328   : > { %4658 = vlog2.f32 %v2116_v56  ;;  %v3164_v5 = vmul.f32 %v5902_v53, %v3099_v21  ;;  %v7016_v60 = vmax.f32 %v5833_v23, 0.0  ;;  %vm5985_vm14 = vmpackc.low %vm1867_vm13, %vm1866_vm11  ;;  %v7017_v32 = vmov 0  ;;  %v4645_v29 = vpop.eup %4644 }
 0x329   : > { %v2054_v18 = vmul.f32 %v4639_v16, %v7015_v6  ;;  %v2117_v11 = vadd.f32 1.0, %v2085_v24  ;;  %v7018_v32 = vsel %vm5985_vm14, 4294967295, %v7017_v32  ;;  %v3194_v50 = vadd.f32 %v3193_v57, %v3163_v9 }
 0x32a   : > { %v2055_v19 = vmul.f32 %v4641_v20, %v7016_v60  ;;  %7019 = vst [vmem:[#allocation26_spill] sm:$0xff] %v7018_v32  ;;  %v3101_v46 = vmul.f32 0.6931472, %v4643_v61  ;;  %v3593_v12 = vadd.f32 %v5934_v26, %v3521_v58  ;;  %v3103_v41 = vmul.f32 0.6931472, %v4645_v29 }
 0x32b   : > { %v2086_v30 = vmul.f32 1.7182819, %v2054_v18  ;;  %v4647_v63 = vpop.eup %4646  ;;  %4660 = vlog2.f32 %v2117_v11  ;;  %v1994_v23 = vadd.f32 1e-07, %v5667_v3  ;;  %v3195_v34 = vadd.f32 %v3194_v50, %v3164_v5 }
 0x32c   : > { %v2087_v7 = vmul.f32 1.7182819, %v2055_v19  ;;  %v4649_v45 = vpop.eup %4648  ;;  %v3165_v1 = vmul.f32 %v5902_v53, %v3101_v46  ;;  %v5995_v16 = vsel %vm1866_vm11, 1.0, %v7005_v62  ;;  %v2149_v24 = vmul.f32 0.6931472, %v4647_v63 }
 0x32d   : > { %v2118_v2 = vadd.f32 1.0, %v2086_v30  ;;  %7020 = vst [vmem:[#allocation27_spill] sm:$0xff] %v5995_v16  ;;  %v4651_v57 = vpop.eup %4650  ;;  %v7021_v26 = vmax.f32 %v5886_v49, 0.0  ;;  %v6002_v21 = vsel %vm1867_vm13, 1.0, %v7005_v62  ;;  %v3166_v9 = vmul.f32 %v5902_v53, %v3103_v41 }
 0x32e   : > { %v2119_v56 = vadd.f32 1.0, %v2087_v7  ;;  %7022 = vst [vmem:[#allocation28_spill] sm:$0xff] %v6002_v21  ;;  %v4653_v20 = vpop.eup %4652  ;;  %v3196_v6 = vadd.f32 %v3195_v34, %v3165_v1  ;;  %v7023_v18 = vmax.f32 %v5893_v14, 0.0  ;;  %v1995_v49 = vadd.f32 1e-07, %v5677_v51 }
 0x32f   : > { %v2056_v58 = vmul.f32 %v4649_v45, %v7021_v26  ;;  %4662 = vlog2.f32 %v2118_v2  ;;  %v4655_v11 = vpop.eup %4654  ;;  %v3105_v60 = vmul.f32 0.6931472, %v4653_v20  ;;  %vm2970_vm15 = vcmp.lt.f32.partialorder %v5995_v16, 0.5  ;;  %v1772_v45 = vld [vmem:[%s6983_s2 + $0x60] sm:$0xff]  ;;  %v1773_v20 = vld [vmem:[%s6983_s2 + $0x68] sm:$0xff] }
 0x330   : > { %v2057_v61 = vmul.f32 %v4651_v57, %v7023_v18  ;;  %4664 = vlog2.f32 %v2119_v56  ;;  %v4657_v19 = vpop.eup %4656  ;;  %v3197_v29 = vadd.f32 %v3196_v6, %v3166_v9  ;;  %v3107_v30 = vmul.f32 0.6931472, %v4655_v11 }
 0x331   : > { %v2088_v5 = vmul.f32 1.7182819, %v2056_v58  ;;  %4666 = vrcp.f32 %v1994_v23  ;;  %v2151_v46 = vmul.f32 0.6931472, %v4657_v19  ;;  %v3167_v7 = vmul.f32 %v5902_v53, %v3105_v60  ;;  %v4467_v23 = vld [vmem:[%s6922_s13 + $0x8] sm:$0xff]  }
 0x332   : > { %v2089_v50 = vmul.f32 1.7182819, %v2057_v61  ;;  %4668 = vrcp.f32 %v1995_v49  ;;  %v3168_v14 = vmul.f32 %v5902_v53, %v3107_v30  ;;  %vm2971_vm0 = vcmp.lt.f32.partialorder %v6002_v21, 0.5  ;;  %v4659_v34 = vpop.eup %4658 }
 0x333   : > { %v2120_v63 = vadd.f32 1.0, %v2088_v5  ;;  %v2209_v2 = vpack.c.bf16 %v2151_v46, %v2149_v24  ;;  %v3198_v1 = vadd.f32 %v3197_v29, %v3167_v7  ;;  %v3002_v57 = vsub.f32 1.0, %v5667_v3 }
 0x334   : > { %v2121_v41 = vadd.f32 1.0, %v2089_v50  ;;  %v3594_v56 = vadd.f32 %v3593_v12, %v5959_v28  ;;  %v1962_v26 = vmax.f32 %v5966_v44, 0.0  ;;  %v3003_v58 = vsub.f32 1.0, %v5677_v51  ;;  %v4932_v28 = vld [vmem:[%s6922_s13] sm:$0xff]  }
 0x335   : > { %4670 = vlog2.f32 %v2120_v63  ;;  %v4661_v24 = vpop.eup %4660  ;;  %4237 = vmatmul.mubr.bf16.vlgmr.msra.gmra.mrb[0].mxu1 %v2209_v2  ;;  %v2153_v9 = vmul.f32 0.6931472, %v4659_v34  ;;  %v6025_v6 = vadd.f32 %v3198_v1, %v3168_v14  ;;  %v3034_v18 = vsel %vm2970_vm15, %v3002_v57, %v5667_v3  ;;  %v4468_v3 = vld [vmem:[%s6922_s13 + $0x10] sm:$0xff]  }
 0x336   : > { %4672 = vlog2.f32 %v2121_v41  ;;  %v1804_v61 = vadd.f32 %v5725_v36, %v1772_v45  ;;  %4317 = vmatpush3.bf16.msra.mxu1 %v4932_v28  ;;  %v2155_v44 = vmul.f32 0.6931472, %v4661_v24  ;;  %v3035_v12 = vsel %vm2971_vm0, %v3003_v58, %v5677_v51 }
 0x337   : > { %v3066_v11 = vadd.f32 1e-07, %v3034_v18  ;;  %v3523_v5 = vmul.f32 %v5665_v42, %v5995_v16  ;;  %4318 = vmatprep.subr.bf16.mxu1 %v4467_v23  ;;  %v3067_v60 = vadd.f32 1e-07, %v3035_v12  ;;  %v1805_v49 = vadd.f32 %v5743_v43, %v1773_v20 }
 0x338   : > { %v6043_v19 = vadd.f32 -1.0, %v1804_v61  ;;  %v1996_v29 = vadd.f32 1e-07, %v5725_v36  ;;  %v2210_v30 = vpack.c.bf16 %v2155_v44, %v2153_v9  ;;  %v1963_v51 = vmax.f32 %v5971_v55, 0.0 }
 0x339   : > { %v4663_v50 = vpop.eup %4662  ;;  %4674 = vlog2.f32 %v3066_v11  ;;  %v1997_v46 = vadd.f32 1e-07, %v5743_v43  ;;  %v3595_v7 = vadd.f32 %v3594_v56, %v3523_v5  ;;  %v6048_v41 = vadd.f32 -1.0, %v1805_v49  ;;  %v1775_v49 = vld [vmem:[%s6983_s2 + $0x78] sm:$0xff] }
 0x33a   : > { %v4665_v63 = vpop.eup %4664  ;;  %4676 = vlog2.f32 %v3067_v60  ;;  %vm1868_vm2 = vcmp.gt.f32.partialorder %v6043_v19, 0.0  ;;  %4240 = vmatprep.mubr.bf16.mxu1 %v2210_v30  ;;  %v2157_v45 = vmul.f32 0.6931472, %v4663_v50  ;;  %4319 = vmatpush3.bf16.msra.mxu1 %v4467_v23  ;;  %v3524_v57 = vmul.f32 %v5665_v42, %v6002_v21  ;;  %v4469_v23 = vld [vmem:[%s6922_s13 + $0x18] sm:$0xff]   ;;  %v1774_v60 = vld [vmem:[%s6983_s2 + $0x70] sm:$0xff] }
 0x33b   : > { %v4667_v14 = vpop.eup %4666  ;;  %v2159_v34 = vmul.f32 0.6931472, %v4665_v63  ;;  %v6054_v2 = vsel %vm1868_vm2, 1.0, %v7005_v62  ;;  %4678 = vrcp.f32 %v1996_v29  ;;  %4320 = vmatprep.subr.bf16.mxu1 %v4468_v3  ;;  %vm1869_vm3 = vcmp.gt.f32.partialorder %v6048_v41, 0.0 }
 0x33c   : > { %7024 = vst [vmem:[#allocation29_spill] sm:$0xff] %v6054_v2  ;;  %v4669_v55 = vpop.eup %4668  ;;  %v2058_v1 = vmul.f32 %v4667_v14, %v1962_v26  ;;  %4680 = vrcp.f32 %v1997_v46  ;;  %v6060_v20 = vsel %vm1869_vm3, 1.0, %v7005_v62  ;;  %vm2972_vm4 = vcmp.lt.f32.partialorder %v6054_v2, 0.5  ;;  %vm6068_vm5 = vmpackc.low %vm1869_vm3, %vm1868_vm2  ;;  %v4470_v46 = vld [vmem:[%s6922_s13 + $0x20] sm:$0xff]  }
 0x33d   : > { %v2211_v56 = vpack.c.bf16 %v2159_v34, %v2157_v45  ;;  %v2059_v58 = vmul.f32 %v4669_v55, %v1963_v51  ;;  %7025 = vst [vmem:[#allocation30_spill] sm:$0xff] %v6060_v20  ;;  %v7026_v26 = vmov 0  ;;  %vm2973_vm9 = vcmp.lt.f32.partialorder %v6060_v20, 0.5 }
 0x33e   : > { %v7027_v26 = vsel %vm6068_vm5, 4294967295, %v7026_v26  ;;  %v2090_v9 = vmul.f32 1.7182819, %v2058_v1  ;;  %v3004_v18 = vsub.f32 1.0, %v5725_v36  ;;  %v3005_v61 = vsub.f32 1.0, %v5743_v43  ;;  %4321 = vmatpush3.bf16.msra.mxu1 %v4468_v3 }
 0x33f   : > { %7028 = vst [vmem:[#allocation31_spill] sm:$0xff] %v7027_v26  ;;  %v4671_v24 = vpop.eup %4670  ;;  %4241 = vmatmul.mubr.bf16.gmra.mrb[4].mxu1 %v2211_v56  ;;  %v2091_v12 = vmul.f32 1.7182819, %v2059_v58  ;;  %v3596_v11 = vadd.f32 %v3595_v7, %v3524_v57  ;;  %v3525_v5 = vmul.f32 %v5665_v42, %v6054_v2  ;;  %v1964_v7 = vmax.f32 %v6043_v19, 0.0  ;;  %4322 = vmatprep.subr.bf16.mxu1 %v4469_v23 }
 0x340   : > { %v4673_v28 = vpop.eup %4672  ;;  %v2161_v44 = vmul.f32 0.6931472, %v4671_v24  ;;  %v2122_v50 = vadd.f32 1.0, %v2090_v9  ;;  %v3036_v30 = vsel %vm2972_vm4, %v3004_v18, %v5725_v36  ;;  %v3037_v51 = vsel %vm2973_vm9, %v3005_v61, %v5743_v43  ;;  %v4471_v9 = vld [vmem:[%s6922_s13 + $0x28] sm:$0xff]  }
 0x341   : > { %v2163_v29 = vmul.f32 0.6931472, %v4673_v28  ;;  %v2123_v63 = vadd.f32 1.0, %v2091_v12  ;;  %v3068_v14 = vadd.f32 1e-07, %v3036_v30  ;;  %v1806_v3 = vadd.f32 %v5722_v31, %v1774_v60 }
 0x342   : > { %v3069_v45 = vadd.f32 1e-07, %v3037_v51  ;;  %4682 = vlog2.f32 %v2122_v50  ;;  %v1807_v55 = vadd.f32 %v5734_v37, %v1775_v49  ;;  %v1965_v36 = vmax.f32 %v6048_v41, 0.0  ;;  %4323 = vmatpush3.bf16.msra.mxu1 %v4469_v23 }
 0x343   : > { %v2212_v34 = vpack.c.bf16 %v2163_v29, %v2161_v44  ;;  %v4675_v1 = vpop.eup %4674  ;;  %4684 = vlog2.f32 %v2123_v63  ;;  %v3526_v43 = vmul.f32 %v5665_v42, %v6060_v20  ;;  %v3597_v57 = vadd.f32 %v3596_v11, %v3525_v5  ;;  %4324 = vmatprep.subr.bf16.mxu1 %v4470_v46 }
 0x344   : > { %v4677_v56 = vpop.eup %4676  ;;  %v3109_v19 = vmul.f32 0.6931472, %v4675_v1  ;;  %4686 = vlog2.f32 %v3068_v14  ;;  %v6096_v58 = vadd.f32 -1.0, %v1806_v3  ;;  %v6098_v24 = vadd.f32 -1.0, %v1807_v55  ;;  %v1776_v14 = vld [vmem:[%s6983_s2 + $0x80] sm:$0xff]  ;;  %v1777_v3 = vld [vmem:[%s6983_s2 + $0x88] sm:$0xff] }
 0x345   : > { %4244 = vmatprep.mubr.bf16.mxu1 %v2212_v34  ;;  %v4679_v18 = vpop.eup %4678  ;;  %v3111_v61 = vmul.f32 0.6931472, %v4677_v56  ;;  %4688 = vlog2.f32 %v3069_v45  ;;  %v1998_v41 = vadd.f32 1e-07, %v5722_v31  ;;  %v1999_v28 = vadd.f32 1e-07, %v5734_v37 }
 0x346   : > { %v4681_v44 = vpop.eup %4680  ;;  %v3169_v12 = vmul.f32 %v5902_v53, %v3109_v19  ;;  %v2060_v11 = vmul.f32 %v4679_v18, %v1964_v7  ;;  %vm1870_vm10 = vcmp.gt.f32.partialorder %v6096_v58, 0.0  ;;  %vm1871_vm11 = vcmp.gt.f32.partialorder %v6098_v24, 0.0  ;;  %4325 = vmatpush3.bf16.msra.mxu1 %v4470_v46  ;;  %v4472_v45 = vld [vmem:[%s6922_s13 + $0x30] sm:$0xff]  }
 0x347   : > { %v2061_v23 = vmul.f32 %v4681_v44, %v1965_v36  ;;  %v6109_v5 = vsel %vm1870_vm10, 1.0, %v7005_v62  ;;  %v6112_v60 = vsel %vm1871_vm11, 1.0, %v7005_v62  ;;  %v3006_v49 = vsub.f32 1.0, %v5722_v31  ;;  %vm6115_vm13 = vmpackc.low %vm1871_vm11, %vm1870_vm10  ;;  %4326 = vmatprep.subr.bf16.mxu1 %v4471_v9 }
 0x348   : > { %7029 = vst [vmem:[#allocation32_spill] sm:$0xff] %v6109_v5  ;;  %7030 = vst [vmem:[#allocation33_spill] sm:$0xff] %v6112_v60  ;;  %v7031_v29 = vmov 0  ;;  %v3170_v50 = vmul.f32 %v5902_v53, %v3111_v61  ;;  %v3200_v30 = vadd.f32 %v6025_v6, %v3169_v12  ;;  %v2092_v51 = vmul.f32 1.7182819, %v2060_v11 }
 0x349   : > { %v7032_v29 = vsel %vm6115_vm13, 4294967295, %v7031_v29  ;;  %v3007_v63 = vsub.f32 1.0, %v5734_v37  ;;  %v2093_v7 = vmul.f32 1.7182819, %v2061_v23  ;;  %4690 = vrcp.f32 %v1998_v41 }
 0x34a   : > { %7033 = vst [vmem:[#allocation34_spill] sm:$0xff] %v7032_v29  ;;  %vm2974_vm15 = vcmp.lt.f32.partialorder %v6109_v5, 0.5  ;;  %vm2975_vm0 = vcmp.lt.f32.partialorder %v6112_v60, 0.5  ;;  %v3201_v6 = vadd.f32 %v3200_v30, %v3170_v50  ;;  %v2124_v34 = vadd.f32 1.0, %v2092_v51  ;;  %4327 = vmatpush3.bf16.msra.mxu1 %v4471_v9 }
 0x34b   : > { %4692 = vrcp.f32 %v1999_v28  ;;  %v3038_v46 = vsel %vm2974_vm15, %v3006_v49, %v5722_v31  ;;  %v2125_v55 = vadd.f32 1.0, %v2093_v7  ;;  %v3039_v1 = vsel %vm2975_vm0, %v3007_v63, %v5734_v37  ;;  %4328 = vmatprep.subr.bf16.mxu1 %v4472_v45  ;;  %v4473_v37 = vld [vmem:[%s6922_s13 + $0x38] sm:$0xff]  }
 0x34c   : > { %4694 = vrcp.f32 %v5879_v39  ;;  %v3070_v36 = vadd.f32 1e-07, %v3038_v46  ;;  %v4683_v56 = vpop.eup %4682  ;;  %v3598_v19 = vadd.f32 %v3597_v57, %v3526_v43  ;;  %v3071_v18 = vadd.f32 1e-07, %v3039_v1 }
 0x34d   : > { %4696 = vlog2.f32 %v2124_v34  ;;  %v1808_v61 = vadd.f32 %v5768_v59, %v1776_v14  ;;  %v4685_v41 = vpop.eup %4684  ;;  %v2165_v28 = vmul.f32 0.6931472, %v4683_v56  ;;  %v1966_v31 = vmax.f32 %v6096_v58, 0.0  ;;  %v6160_v14 = vld [vmem:[%s6923_s14] ss:$0 sm:$0xff] }
 0x34e   : > { %4698 = vlog2.f32 %v2125_v55  ;;  %v1809_v44 = vadd.f32 %v5779_v47, %v1777_v3  ;;  %v4687_v39 = vpop.eup %4686  ;;  %v2167_v12 = vmul.f32 0.6931472, %v4685_v41  ;;  %v2000_v57 = vadd.f32 1e-07, %v5768_v59  ;;  %4329 = vmatpush3.bf16.msra.mxu1 %v4472_v45 }
 0x34f   : > { %4700 = vlog2.f32 %v3070_v36  ;;  %v6142_v43 = vadd.f32 -1.0, %v1808_v61  ;;  %v4689_v9 = vpop.eup %4688  ;;  %v3113_v11 = vmul.f32 0.6931472, %v4687_v39  ;;  %v3527_v58 = vmul.f32 %v5665_v42, %v6109_v5  ;;  %4330 = vmatprep.subr.bf16.mxu1 %v4473_v37 }
 0x350   : > { %4702 = vlog2.f32 %v3071_v18  ;;  %v6147_v23 = vadd.f32 -1.0, %v1809_v44  ;;  %v2213_v49 = vpack.c.bf16 %v2167_v12, %v2165_v28  ;;  %v3115_v50 = vmul.f32 0.6931472, %v4689_v9  ;;  %v1779_v44 = vld [vmem:[%s6983_s2 + $0x98] sm:$0xff] }
 0x351   : > { %v1967_v30 = vmax.f32 %v6098_v24, 0.0  ;;  %vm1872_vm2 = vcmp.gt.f32.partialorder %v6142_v43, 0.0  ;;  %v3171_v51 = vmul.f32 %v5902_v53, %v3113_v11  ;;  %v3599_v63 = vadd.f32 %v3598_v19, %v3527_v58  ;;  %v1778_v19 = vld [vmem:[%s6983_s2 + $0x90] sm:$0xff] }
 0x352   : > { %vm1873_vm3 = vcmp.gt.f32.partialorder %v6147_v23, 0.0  ;;  %v6154_v7 = vsel %vm1872_vm2, 1.0, %v7005_v62  ;;  %4245 = vmatmul.mubr.bf16.gmra.mrb[8].mxu1 %v2213_v49  ;;  %v3172_v42 = vmul.f32 %v5902_v53, %v3115_v50  ;;  %v3528_v24 = vmul.f32 %v6160_v14, %v6112_v60 }
 0x353   : > { %7034 = vst [vmem:[#allocation35_spill] sm:$0xff] %v6154_v7  ;;  %v2001_v45 = vadd.f32 1e-07, %v5779_v47  ;;  %4704 = vrcp.f32 %v2000_v57  ;;  %vm6165_vm4 = vmpackc.low %vm1873_vm3, %vm1872_vm2  ;;  %v7035_v34 = vmov 0  ;;  %v4691_v46 = vpop.eup %4690  ;;  %v3202_v3 = vadd.f32 %v3201_v6, %v3171_v51  ;;  %4331 = vmatpush3.bf16.msra.mxu1 %v4473_v37 }
 0x354   : > { %v7036_v34 = vsel %vm6165_vm4, 4294967295, %v7035_v34  ;;  %v6170_v55 = vsel %vm1873_vm3, 1.0, %v7005_v62  ;;  %vm2976_vm9 = vcmp.lt.f32.partialorder %v6154_v7, 0.5  ;;  %v3008_v1 = vsub.f32 1.0, %v5768_v59 }
 0x355   : > { %7037 = vst [vmem:[#allocation36_spill] sm:$0xff] %v7036_v34  ;;  %7038 = vst [vmem:[#allocation37_spill] sm:$0xff] %v6170_v55  ;;  %v4693_v36 = vpop.eup %4692  ;;  %v2062_v56 = vmul.f32 %v4691_v46, %v1966_v31  ;;  %4706 = vrcp.f32 %v2001_v45  ;;  %v3203_v61 = vadd.f32 %v3202_v3, %v3172_v42  ;;  %v3600_v6 = vadd.f32 %v3599_v63, %v3528_v24 }
 0x356   : > { %v6177_v18 = vpop.eup %4694  ;;  %v2063_v41 = vmul.f32 %v4693_v36, %v1967_v30  ;;  %v3040_v28 = vsel %vm2976_vm9, %v3008_v1, %v5768_v59  ;;  %v1968_v31 = vmax.f32 %v6142_v43, 0.0  ;;  %vm2977_vm10 = vcmp.lt.f32.partialorder %v6170_v55, 0.5 }
 0x357   : > { %v4697_v39 = vpop.eup %4696  ;;  %v2094_v12 = vmul.f32 1.7182819, %v2062_v56  ;;  %v3072_v57 = vadd.f32 1e-07, %v3040_v28  ;;  %v1969_v11 = vmax.f32 %v6147_v23, 0.0  ;;  %v3009_v58 = vsub.f32 1.0, %v5779_v47 }
 0x358   : > { %v4699_v9 = vpop.eup %4698  ;;  %v2095_v37 = vmul.f32 1.7182819, %v2063_v41  ;;  %v1810_v49 = vadd.f32 %v5762_v40, %v1778_v19  ;;  %v2169_v50 = vmul.f32 0.6931472, %v4697_v39  ;;  %v1811_v45 = vadd.f32 %v5773_v15, %v1779_v44 }
 0x359   : > { %v4701_v59 = vpop.eup %4700  ;;  %v2171_v30 = vmul.f32 0.6931472, %v4699_v9  ;;  %v2126_v51 = vadd.f32 1.0, %v2094_v12  ;;  %4708 = vlog2.f32 %v3072_v57  ;;  %v3041_v43 = vsel %vm2977_vm10, %v3009_v58, %v5779_v47 }
 0x35a   : > { %v4703_v63 = vpop.eup %4702  ;;  %v2127_v42 = vadd.f32 1.0, %v2095_v37  ;;  %v3117_v24 = vmul.f32 0.6931472, %v4701_v59  ;;  %v6190_v23 = vadd.f32 -1.0, %v1810_v49  ;;  %v6193_v36 = vadd.f32 -1.0, %v1811_v45 }
 0x35b   : > { %v2214_v46 = vpack.c.bf16 %v2171_v30, %v2169_v50  ;;  %4710 = vlog2.f32 %v2126_v51  ;;  %v3119_v3 = vmul.f32 0.6931472, %v4703_v63  ;;  %v2002_v56 = vadd.f32 1e-07, %v5762_v40 }
 0x35c   : > { %4712 = vlog2.f32 %v2127_v42  ;;  %v3173_v1 = vmul.f32 %v5902_v53, %v3117_v24  ;;  %v3529_v47 = vmul.f32 %v6160_v14, %v6154_v7  ;;  %vm1874_vm11 = vcmp.gt.f32.partialorder %v6190_v23, 0.0  ;;  %v1780_v42 = vld [vmem:[%s6983_s2 + $0xa0] sm:$0xff] }
 0x35d   : > { %v4705_v19 = vpop.eup %4704  ;;  %4248 = vmatprep.mubr.bf16.mxu1 %v2214_v46  ;;  %v3174_v41 = vmul.f32 %v5902_v53, %v3119_v3  ;;  %v2003_v28 = vadd.f32 1e-07, %v5773_v15  ;;  %vm1875_vm15 = vcmp.gt.f32.partialorder %v6193_v36, 0.0  ;;  %v6203_v12 = vsel %vm1874_vm11, 1.0, %v7005_v62  ;;  %v1781_v46 = vld [vmem:[%s6983_s2 + $0xa8] sm:$0xff]  ;;  %v1782_v3 = vld [vmem:[%s6983_s2 + $0xb0] sm:$0xff] }
 0x35e   : > { %v3204_v44 = vadd.f32 %v3203_v61, %v3173_v1  ;;  %v2064_v39 = vmul.f32 %v4705_v19, %v1968_v31  ;;  %7039 = vst [vmem:[#allocation38_spill] sm:$0xff] %v6203_v12  ;;  %v3073_v9 = vadd.f32 1e-07, %v3041_v43  ;;  %v6206_v37 = vsel %vm1875_vm15, 1.0, %v7005_v62  ;;  %vm6209_vm2 = vmpackc.low %vm1875_vm15, %vm1874_vm11  ;;  %v1783_v1 = vld [vmem:[%s6983_s2 + $0xb8] sm:$0xff] }
 0x35f   : > { %v4707_v57 = vpop.eup %4706  ;;  %7040 = vst [vmem:[#allocation39_spill] sm:$0xff] %v6206_v37  ;;  %4714 = vrcp.f32 %v2002_v56  ;;  %vm2978_vm0 = vcmp.lt.f32.partialorder %v6203_v12, 0.5  ;;  %v7041_v58 = vmov 0  ;;  %vm2979_vm3 = vcmp.lt.f32.partialorder %v6206_v37, 0.5 }
 0x360   : > { %v7042_v58 = vsel %vm6209_vm2, 4294967295, %v7041_v58  ;;  %v3205_v49 = vadd.f32 %v3204_v44, %v3174_v41  ;;  %v2065_v61 = vmul.f32 %v4707_v57, %v1969_v11  ;;  %v2096_v31 = vmul.f32 1.7182819, %v2064_v39  ;;  %v1784_v44 = vld [vmem:[%s6983_s2 + $0xc0] sm:$0xff]  ;;  %v1785_v39 = vld [vmem:[%s6983_s2 + $0xc8] sm:$0xff] }
 0x361   : > { %7043 = vst [vmem:[#allocation40_spill] sm:$0xff] %v7042_v58  ;;  %4716 = vrcp.f32 %v2003_v28  ;;  %v3010_v59 = vsub.f32 1.0, %v5762_v40  ;;  %v3011_v50 = vsub.f32 1.0, %v5773_v15  ;;  %v6218_v63 = vmul.f32 %v6160_v14, %v6170_v55 }
 0x362   : > { %v2097_v30 = vmul.f32 1.7182819, %v2065_v61  ;;  %v2128_v51 = vadd.f32 1.0, %v2096_v31  ;;  %4718 = vlog2.f32 %v3073_v9  ;;  %v6223_v11 = vadd.f32 %v3600_v6, %v3529_v47  ;;  %v1790_v31 = vld [vmem:[%s6983_s2 + $0xf0] sm:$0xff] }
 0x363   : > { %v4709_v24 = vpop.eup %4708  ;;  %v3042_v43 = vsel %vm2978_vm0, %v3010_v59, %v5762_v40  ;;  %v3043_v45 = vsel %vm2979_vm3, %v3011_v50, %v5773_v15  ;;  %v1786_v40 = vld [vmem:[%s6983_s2 + $0xd0] sm:$0xff]  ;;  %v1970_v41 = vmax.f32 %v6190_v23, 0.0  ;;  %v1971_v47 = vmax.f32 %v6193_v36, 0.0  ;;  %v1787_v23 = vld [vmem:[%s6983_s2 + $0xd8] sm:$0xff]  ;;  %v1788_v36 = vld [vmem:[%s6983_s2 + $0xe0] sm:$0xff] }
 0x364   : > { %v2129_v6 = vadd.f32 1.0, %v2097_v30  ;;  %4720 = vlog2.f32 %v2128_v51  ;;  %v3121_v56 = vmul.f32 0.6931472, %v4709_v24  ;;  %v3074_v19 = vadd.f32 1e-07, %v3042_v43  ;;  %v1791_v24 = vld [vmem:[%s6983_s2 + $0xf8] sm:$0xff] }
 0x365   : > { %v4711_v15 = vpop.eup %4710  ;;  %v3075_v28 = vadd.f32 1e-07, %v3043_v45  ;;  %v1812_v57 = vadd.f32 %v5815_v17, %v1780_v42  ;;  %v1813_v59 = vadd.f32 %v5829_v54, %v1781_v46  ;;  %v1814_v50 = vadd.f32 %v5811_v35, %v1782_v3  ;;  %v1789_v42 = vld [vmem:[%s6983_s2 + $0xe8] sm:$0xff] }
 0x366   : > { %v4713_v9 = vpop.eup %4712  ;;  %4722 = vlog2.f32 %v2129_v6  ;;  %v3175_v61 = vmul.f32 %v5902_v53, %v3121_v56  ;;  %v2173_v30 = vmul.f32 0.6931472, %v4711_v15  ;;  %v1815_v43 = vadd.f32 %v5822_v27, %v1783_v1 }
 0x367   : > { %v2175_v51 = vmul.f32 0.6931472, %v4713_v9  ;;  %4724 = vlog2.f32 %v3074_v19  ;;  %v1816_v46 = vadd.f32 %v5877_v38, %v1784_v44  ;;  %v1817_v3 = vadd.f32 %v5888_v4, %v1785_v39 }
 0x368   : > { %v6269_v45 = vadd.f32 %v3205_v49, %v3175_v61  ;;  %4726 = vlog2.f32 %v3075_v28  ;;  %v1818_v19 = vadd.f32 %v5871_v13, %v1786_v40  ;;  %v1819_v15 = vadd.f32 %v5883_v8, %v1787_v23 }
 0x369   : > { %v4715_v6 = vpop.eup %4714  ;;  %v2215_v56 = vpack.c.bf16 %v2175_v51, %v2173_v30  ;;  %v1820_v9 = vadd.f32 %v5931_v33, %v1788_v36  ;;  %v1821_v60 = vadd.f32 %v6177_v18, %v1789_v42  ;;  %v1822_v49 = vadd.f32 %v5925_v52, %v1790_v31 }
 0x36a   : > { %v2066_v7 = vmul.f32 %v4715_v6, %v1970_v41  ;;  %v1823_v1 = vadd.f32 %v5939_v48, %v1791_v24  ;;  %v6279_v44 = vadd.f32 -1.0, %v1812_v57  ;;  %v6281_v39 = vadd.f32 -1.0, %v1813_v59 }
 0x36b   : > { %v4717_v55 = vpop.eup %4716  ;;  %4249 = vmatmul.mubr.bf16.gmra.mrb[12].mxu1 %v2215_v56  ;;  %v6283_v61 = vadd.f32 -1.0, %v1814_v50  ;;  %v6285_v23 = vadd.f32 -1.0, %v1815_v43  ;;  %v6287_v36 = vadd.f32 -1.0, %v1816_v46  ;;  %v6289_v41 = vadd.f32 -1.0, %v1817_v3 }
 0x36c   : > { %v2067_v28 = vmul.f32 %v4717_v55, %v1971_v47  ;;  %v2098_v40 = vmul.f32 1.7182819, %v2066_v7  ;;  %v4719_v30 = vpop.eup %4718  ;;  %v6291_v31 = vadd.f32 -1.0, %v1818_v19  ;;  %v6293_v42 = vadd.f32 -1.0, %v1819_v15 }
 0x36d   : > { %v6295_v55 = vadd.f32 -1.0, %v1820_v9  ;;  %v6297_v59 = vadd.f32 -1.0, %v1821_v60  ;;  %v6299_v50 = vadd.f32 -1.0, %v1822_v49  ;;  %v6301_v7 = vadd.f32 -1.0, %v1823_v1 }
 0x36e   : > { %v2099_v51 = vmul.f32 1.7182819, %v2067_v28  ;;  %v4721_v47 = vpop.eup %4720  ;;  %v2130_v57 = vadd.f32 1.0, %v2098_v40  ;;  %vm6946_vm9 = vcmp.gt.f32.partialorder %v6279_v44, 0.0  ;;  %vm6945_vm10 = vcmp.gt.f32.partialorder %v6281_v39, 0.0 }
 0x36f   : > { %7044 = vst [vmem:[#allocation41_spill] sm:$0xff] %v6301_v7  ;;  %v2177_v24 = vmul.f32 0.6931472, %v4721_v47  ;;  %vm6948_vm11 = vcmp.gt.f32.partialorder %v6283_v61, 0.0  ;;  %vm6947_vm15 = vcmp.gt.f32.partialorder %v6285_v23, 0.0  ;;  %vm6312_vm3 = vmpackc.low %vm6945_vm10, %vm6946_vm9  ;;  %v7045_v60 = vmov 0 }
 0x370   : > { %v2131_v43 = vadd.f32 1.0, %v2099_v51  ;;  %v4723_v46 = vpop.eup %4722  ;;  %4728 = vlog2.f32 %v2130_v57  ;;  %v7046_v60 = vsel %vm6312_vm3, 4294967295, %v7045_v60  ;;  %vm6949_vm2 = vcmp.gt.f32.partialorder %v6287_v36, 0.0  ;;  %vm6322_vm0 = vmpackc.low %vm6947_vm15, %vm6948_vm11 }
 0x371   : > { %7047 = vst [vmem:[#allocation42_spill] sm:$0xff] %v7046_v60  ;;  %v4725_v3 = vpop.eup %4724  ;;  %v2179_v6 = vmul.f32 0.6931472, %v4723_v46  ;;  %v7048_v56 = vmov 0  ;;  %v3602_v15 = vadd.f32 %v6223_v11, %v6218_v63  ;;  %vm6950_vm10 = vcmp.gt.f32.partialorder %v6291_v31, 0.0 }
 0x372   : > { %4730 = vlog2.f32 %v2131_v43  ;;  %v7049_v56 = vsel %vm6322_vm0, 4294967295, %v7048_v56  ;;  %v4727_v19 = vpop.eup %4726  ;;  %vm6951_vm9 = vcmp.gt.f32.partialorder %v6297_v59, 0.0  ;;  %vm7051_vm4 = vcmp.gt.f32.partialorder %v6289_v41, 0.0 }
 0x373   : > { %7050 = vst [vmem:[#allocation43_spill] sm:$0xff] %v7049_v56  ;;  %vm6334_vm3 = vmpackc.low %vm7051_vm4, %vm6949_vm2  ;;  %v7052_v9 = vmov 0  ;;  %v2216_v49 = vpack.c.bf16 %v2179_v6, %v2177_v24  ;;  %vm1884_vm15 = vcmp.gt.f32.partialorder %v6295_v55, 0.0  ;;  %vm6955_vm11 = vcmp.gt.f32.partialorder %v6301_v7, 0.0 }
 0x374   : > { %v7053_v9 = vsel %vm6334_vm3, 4294967295, %v7052_v9  ;;  %vm7055_vm0 = vcmp.gt.f32.partialorder %v6293_v42, 0.0  ;;  %v7056_v63 = vmov 0  ;;  %v3531_v11 = vmul.f32 %v6160_v14, %v6203_v12  ;;  %vm6355_vm2 = vmpackc.low %vm6951_vm9, %vm1884_vm15 }
 0x375   : > { %7054 = vst [vmem:[#allocation44_spill] sm:$0xff] %v7053_v9  ;;  %vm6344_vm13 = vmpackc.low %vm7055_vm0, %vm6950_vm10  ;;  %vm6956_vm4 = vcmp.gt.f32.partialorder %v6299_v50, 0.0  ;;  %v7059_v1 = vmov 0  ;;  %4252 = vmatprep.mubr.bf16.mxu1 %v2216_v49  ;;  %v7062_v28 = vmov 0  ;;  %vm7065_vm10 = vcmp.gt.f32.partialorder %v6279_v44, 0.0 }
 0x376   : > { %v7057_v63 = vsel %vm6344_vm13, 4294967295, %v7056_v63  ;;  %v7060_v1 = vsel %vm6355_vm2, 4294967295, %v7059_v1  ;;  %vm6363_vm0 = vmpackc.low %vm6955_vm11, %vm6956_vm4  ;;  %v3603_v40 = vadd.f32 %v3602_v15, %v3531_v11  ;;  %v6370_v51 = vsel %vm7065_vm10, 1.0, %v7005_v62 }
 0x377   : > { %7058 = vst [vmem:[#allocation45_spill] sm:$0xff] %v7057_v63  ;;  %7061 = vst [vmem:[#allocation46_spill] sm:$0xff] %v7060_v1  ;;  %v7063_v28 = vsel %vm6363_vm0, 4294967295, %v7062_v28  ;;  %v3123_v47 = vmul.f32 0.6931472, %v4719_v30  ;;  %v3532_v57 = vmul.f32 %v6160_v14, %v6206_v37  ;;  %vm7066_vm9 = vcmp.gt.f32.partialorder %v6281_v39, 0.0 }
 0x378   : > { %7064 = vst [vmem:[#allocation47_spill] sm:$0xff] %v7063_v28  ;;  %v3125_v24 = vmul.f32 0.6931472, %v4725_v3  ;;  %v6377_v43 = vsel %vm7066_vm9, 1.0, %v7005_v62  ;;  %v3533_v15 = vmul.f32 %v6160_v14, %v6370_v51  ;;  %v6386_v3 = vmul.f32 0.6931472, %v4727_v19 }
 0x379   : > { %v3604_v6 = vadd.f32 %v3603_v40, %v3532_v57  ;;  %v6382_v11 = vmul.f32 %v5902_v53, %v3123_v47  ;;  %v3534_v37 = vmul.f32 %v6160_v14, %v6377_v43  ;;  %vm7067_vm9 = vcmp.gt.f32.partialorder %v6283_v61, 0.0 }
 0x37a   : > { %v4729_v46 = vpop.eup %4728  ;;  %v6389_v5 = vmul.f32 %v5902_v53, %v3125_v24  ;;  %v6394_v40 = vsel %vm7067_vm9, 1.0, %v7005_v62  ;;  %vm7068_vm10 = vcmp.gt.f32.partialorder %v6285_v23, 0.0  ;;  %vm7069_vm11 = vcmp.gt.f32.partialorder %v6287_v36, 0.0 }
 0x37b   : > { %v2181_v12 = vmul.f32 0.6931472, %v4729_v46  ;;  %v6399_v47 = vsel %vm7068_vm10, 1.0, %v7005_v62  ;;  %v6404_v46 = vsel %vm7069_vm11, 1.0, %v7005_v62  ;;  %vm7070_vm4 = vcmp.gt.f32.partialorder %v6289_v41, 0.0 }
 0x37c   : > { %v4731_v49 = vpop.eup %4730  ;;  %v6409_v53 = vsel %vm7070_vm4, 1.0, %v7005_v62  ;;  %v3605_v19 = vadd.f32 %v3604_v6, %v3533_v15  ;;  %vm7071_vm9 = vcmp.gt.f32.partialorder %v6291_v31, 0.0  ;;  %vm7072_vm10 = vcmp.gt.f32.partialorder %v6293_v42, 0.0 }
 0x37d   : > { %v2183_v30 = vmul.f32 0.6931472, %v4731_v49  ;;  %v6414_v24 = vsel %vm7071_vm9, 1.0, %v7005_v62  ;;  %v2004_v49 = vadd.f32 1e-07, %v5815_v17  ;;  %v3535_v20 = vmul.f32 %v6160_v14, %v6394_v40 }
 0x37e   : > { %v3606_v2 = vadd.f32 %v3605_v19, %v3534_v37  ;;  %v2006_v6 = vadd.f32 1e-07, %v5811_v35  ;;  %v2007_v15 = vadd.f32 1e-07, %v5822_v27  ;;  %v6430_v21 = vsel %vm1884_vm15, 1.0, %v7005_v62 }
 0x37f   : > { %v2217_v57 = vpack.c.bf16 %v2183_v30, %v2181_v12  ;;  %v6419_v12 = vsel %vm7072_vm10, 1.0, %v7005_v62  ;;  %v2005_v30 = vadd.f32 1e-07, %v5829_v54  ;;  %v3536_v16 = vmul.f32 %v6160_v14, %v6399_v47 }
 0x380   : > { %4732 = vrcp.f32 %v2004_v49  ;;  %v2008_v28 = vadd.f32 1e-07, %v5877_v38  ;;  %v3607_v1 = vadd.f32 %v3606_v2, %v3535_v20  ;;  %v2009_v37 = vadd.f32 1e-07, %v5888_v4 }
 0x381   : > { %4253 = vmatmul.mubr.bf16.gmra.mrb[16].mxu1 %v2217_v57  ;;  %v3537_v57 = vmul.f32 %v6160_v14, %v6404_v46  ;;  %4734 = vrcp.f32 %v2005_v30  ;;  %vm7073_vm11 = vcmp.gt.f32.partialorder %v6297_v59, 0.0  ;;  %vm7074_vm15 = vcmp.gt.f32.partialorder %v6299_v50, 0.0 }
 0x382   : > { %v6441_v19 = vsel %vm7073_vm11, 1.0, %v7005_v62  ;;  %v6446_v63 = vsel %vm7074_vm15, 1.0, %v7005_v62  ;;  %4736 = vrcp.f32 %v2006_v6  ;;  %v2010_v49 = vadd.f32 1e-07, %v5871_v13 }
 0x383   : > { %v3538_v9 = vmul.f32 %v6160_v14, %v6409_v53  ;;  %v3608_v2 = vadd.f32 %v3607_v1, %v3536_v16  ;;  %4738 = vrcp.f32 %v2007_v15  ;;  %v2011_v20 = vadd.f32 1e-07, %v5883_v8 }
 0x384   : > { %vm7075_vm4 = vcmp.gt.f32.partialorder %v6301_v7, 0.0  ;;  %vm2980_vm9 = vcmp.lt.f32.partialorder %v6370_v51, 0.5  ;;  %vm2981_vm10 = vcmp.lt.f32.partialorder %v6377_v43, 0.5  ;;  %4740 = vrcp.f32 %v2008_v28 }
 0x385   : > { %v6455_v30 = vsel %vm7075_vm4, 1.0, %v7005_v62  ;;  %v3539_v6 = vmul.f32 %v6160_v14, %v6414_v24  ;;  %v3540_v56 = vmul.f32 %v6160_v14, %v6419_v12  ;;  %v3609_v16 = vadd.f32 %v3608_v2, %v3537_v57 }
 0x386   : > { %4742 = vrcp.f32 %v2009_v37  ;;  %v3541_v1 = vmul.f32 %v6160_v14, %v6430_v21  ;;  %v3542_v15 = vmul.f32 %v6160_v14, %v6441_v19  ;;  %v3543_v62 = vmul.f32 %v6160_v14, %v6446_v63 }
 0x387   : > { %4744 = vrcp.f32 %v2010_v49  ;;  %v6471_v28 = vmul.f32 %v6160_v14, %v6455_v30  ;;  %v3610_v60 = vadd.f32 %v3609_v16, %v3538_v9  ;;  %v1972_v58 = vmax.f32 %v6279_v44, 0.0 }
 0x388   : > { %4746 = vrcp.f32 %v2011_v20  ;;  %v1973_v57 = vmax.f32 %v6281_v39, 0.0  ;;  %v1974_v37 = vmax.f32 %v6283_v61, 0.0  ;;  %v1975_v2 = vmax.f32 %v6285_v23, 0.0 }
 0x389   : > { %v1976_v34 = vmax.f32 %v6287_v36, 0.0  ;;  %v3611_v29 = vadd.f32 %v3610_v60, %v3539_v6  ;;  %v1977_v49 = vmax.f32 %v6289_v41, 0.0  ;;  %v1978_v14 = vmax.f32 %v6291_v31, 0.0 }
 0x38a   : > { %v1979_v9 = vmax.f32 %v6293_v42, 0.0  ;;  %v4733_v16 = vpop.eup %4732  ;;  %v3012_v44 = vsub.f32 1.0, %v5815_v17  ;;  %v3013_v39 = vsub.f32 1.0, %v5829_v54  ;;  %v3014_v61 = vsub.f32 1.0, %v5811_v35 }
 0x38b   : > { %v3015_v23 = vsub.f32 1.0, %v5822_v27  ;;  %v4735_v36 = vpop.eup %4734  ;;  %v3612_v60 = vadd.f32 %v3611_v29, %v3540_v56  ;;  %v2068_v41 = vmul.f32 %v4733_v16, %v1972_v58  ;;  %v3016_v31 = vsub.f32 1.0, %v5877_v38 }
 0x38c   : > { %v3017_v42 = vsub.f32 1.0, %v5888_v4  ;;  %v4737_v20 = vpop.eup %4736  ;;  %v2069_v6 = vmul.f32 %v4735_v36, %v1973_v57  ;;  %v3018_v26 = vsub.f32 1.0, %v5871_v13  ;;  %v3019_v32 = vsub.f32 1.0, %v5883_v8 }
 0x38d   : > { %v4739_v22 = vpop.eup %4738  ;;  %v3613_v10 = vadd.f32 %v3612_v60, %v3541_v1  ;;  %v2100_v0 = vmul.f32 1.7182819, %v2068_v41  ;;  %v2070_v7 = vmul.f32 %v4737_v20, %v1974_v37  ;;  %v3044_v29 = vsel %vm2980_vm9, %v3012_v44, %v5815_v17 }
 0x38e   : > { %v4741_v58 = vpop.eup %4740  ;;  %v2101_v56 = vmul.f32 1.7182819, %v2069_v6  ;;  %v2071_v16 = vmul.f32 %v4739_v22, %v1975_v2  ;;  %v3045_v36 = vsel %vm2981_vm10, %v3013_v39, %v5829_v54  ;;  %vm2987_vm15 = vcmp.lt.f32.partialorder %v6419_v12, 0.5 }
 0x38f   : > { %v3614_v1 = vadd.f32 %v3613_v10, %v3542_v15  ;;  %v2132_v37 = vadd.f32 1.0, %v2100_v0  ;;  %v2102_v60 = vmul.f32 1.7182819, %v2070_v7  ;;  %v2072_v41 = vmul.f32 %v4741_v58, %v1976_v34 }
 0x390   : > { %v4743_v25 = vpop.eup %4742  ;;  %vm2988_vm9 = vcmp.lt.f32.partialorder %v6430_v21, 0.5  ;;  %v2133_v17 = vadd.f32 1.0, %v2101_v56  ;;  %v2103_v44 = vmul.f32 1.7182819, %v2071_v16  ;;  %v3076_v22 = vadd.f32 1e-07, %v3044_v29 }
 0x391   : > { %v4745_v20 = vpop.eup %4744  ;;  %v2073_v6 = vmul.f32 %v4743_v25, %v1977_v49  ;;  %v3615_v54 = vadd.f32 %v3614_v1, %v3543_v62  ;;  %4748 = vlog2.f32 %v2132_v37  ;;  %v2134_v39 = vadd.f32 1.0, %v2102_v60 }
 0x392   : > { %v4747_v2 = vpop.eup %4746  ;;  %v2104_v57 = vmul.f32 1.7182819, %v2072_v41  ;;  %4750 = vlog2.f32 %v2133_v17  ;;  %v2135_v0 = vadd.f32 1.0, %v2103_v44  ;;  %v2074_v34 = vmul.f32 %v4745_v20, %v1978_v14 }
 0x393   : > { %v2105_v10 = vmul.f32 1.7182819, %v2073_v6  ;;  %v3616_v7 = vadd.f32 %v3615_v54, %v6471_v28  ;;  %4752 = vlog2.f32 %v2134_v39  ;;  %v2075_v58 = vmul.f32 %v4747_v2, %v1979_v9 }
 0x394   : > { %v2136_v15 = vadd.f32 1.0, %v2104_v57  ;;  %4754 = vlog2.f32 %v2135_v0  ;;  %v2106_v49 = vmul.f32 1.7182819, %v2074_v34  ;;  %vm7076_vm10 = vcmp.lt.f32.partialorder %v6394_v40, 0.5 }
 0x395   : > { %v2137_v25 = vadd.f32 1.0, %v2105_v10  ;;  %v3046_v29 = vsel %vm7076_vm10, %v3014_v61, %v5811_v35  ;;  %3617 = vadd.xlane.f32.xlu1 %v3616_v7  ;;  %v2107_v62 = vmul.f32 1.7182819, %v2075_v58  ;;  %vm7077_vm11 = vcmp.lt.f32.partialorder %v6399_v47, 0.5 }
 0x396   : > { %4756 = vlog2.f32 %v2136_v15  ;;  %v3047_v56 = vsel %vm7077_vm11, %v3015_v23, %v5822_v27  ;;  %vm7078_vm4 = vcmp.lt.f32.partialorder %v6404_v46, 0.5  ;;  %v2138_v14 = vadd.f32 1.0, %v2106_v49  ;;  %v6524_v27 = vld [vmem:[%s7004_s0] ss:$0 sm:$0xff] }
 0x397   : > { %v3048_v28 = vsel %vm7078_vm4, %v3016_v31, %v5877_v38  ;;  %4758 = vlog2.f32 %v2137_v25  ;;  %v3077_v9 = vadd.f32 1e-07, %v3045_v36  ;;  %v3207_v16 = vadd.f32 %v6269_v45, %v6382_v11 }
 0x398   : > { %v2139_v57 = vadd.f32 1.0, %v2107_v62  ;;  %vm7079_vm10 = vcmp.lt.f32.partialorder %v6409_v53, 0.5  ;;  %v3078_v61 = vadd.f32 1e-07, %v3046_v29  ;;  %4760 = vlog2.f32 %v3076_v22 }
 0x399   : > { %v3049_v35 = vsel %vm7079_vm10, %v3017_v42, %v5888_v4  ;;  %4762 = vlog2.f32 %v2138_v14  ;;  %v3079_v1 = vadd.f32 1e-07, %v3047_v56  ;;  %v3178_v38 = vmul.f32 %v6524_v27, %v6386_v3 }
 0x39a   : > { %v3208_v23 = vadd.f32 %v3207_v16, %v6389_v5  ;;  %4764 = vlog2.f32 %v2139_v57  ;;  %v3022_v45 = vsub.f32 1.0, %v5925_v52  ;;  %vm7080_vm11 = vcmp.lt.f32.partialorder %v6414_v24, 0.5 }
 0x39b   : > { %v3050_v4 = vsel %vm7080_vm11, %v3018_v26, %v5871_v13  ;;  %v3080_v11 = vadd.f32 1e-07, %v3048_v28  ;;  %v3051_v31 = vsel %vm2987_vm15, %v3019_v32, %v5883_v8  ;;  %v3081_v42 = vadd.f32 1e-07, %v3049_v35  ;;  %v4749_v5 = vpop.eup %4748 }
 0x39c   : > { %4766 = vlog2.f32 %v3077_v9  ;;  %v3209_v3 = vadd.f32 %v3208_v23, %v3178_v38  ;;  %v7081_v36 = vsub.f32 1.0, %v5931_v33  ;;  %v4751_v60 = vpop.eup %4750  ;;  %v7082_v13 = vsub.f32 1.0, %v6177_v18 }
 0x39d   : > { %4768 = vlog2.f32 %v3078_v61  ;;  %vm7083_vm4 = vcmp.lt.f32.partialorder %v6441_v19, 0.5  ;;  %vm7084_vm15 = vcmp.lt.f32.partialorder %v6446_v63, 0.5  ;;  %v3082_v32 = vadd.f32 1e-07, %v3050_v4  ;;  %v4753_v41 = vpop.eup %4752 }
 0x39e   : > { %v3052_v37 = vsel %vm2988_vm9, %v7081_v36, %v5931_v33  ;;  %v3053_v26 = vsel %vm7083_vm4, %v7082_v13, %v6177_v18  ;;  %v3054_v8 = vsel %vm7084_vm15, %v3022_v45, %v5925_v52  ;;  %4770 = vlog2.f32 %v3079_v1  ;;  %v4755_v6 = vpop.eup %4754 }
 0x39f   : > { %v2185_v20 = vmul.f32 0.6931472, %v4749_v5  ;;  %v2187_v17 = vmul.f32 0.6931472, %v4751_v60  ;;  %v3083_v44 = vadd.f32 1e-07, %v3051_v31  ;;  %4772 = vlog2.f32 %v3080_v11 }
 0x3a0   : > { %vm2991_vm9 = vcmp.lt.f32.partialorder %v6455_v30, 0.5  ;;  %v3084_v22 = vadd.f32 1e-07, %v3052_v37  ;;  %4774 = vlog2.f32 %v3081_v42  ;;  %v4757_v2 = vpop.eup %4756  ;;  %v2189_v39 = vmul.f32 0.6931472, %v4753_v41 }
 0x3a1   : > { %v2218_v54 = vpack.c.bf16 %v2187_v17, %v2185_v20  ;;  %v2191_v0 = vmul.f32 0.6931472, %v4755_v6  ;;  %v3085_v10 = vadd.f32 1e-07, %v3053_v26  ;;  %v4759_v34 = vpop.eup %4758  ;;  %v3023_v7 = vsub.f32 1.0, %v5939_v48 }
 0x3a2   : > { %v3086_v15 = vadd.f32 1e-07, %v3054_v8  ;;  %4776 = vlog2.f32 %v3082_v32  ;;  %v2012_v58 = vadd.f32 1e-07, %v5931_v33  ;;  %v4761_v25 = vpop.eup %4760  ;;  %v2193_v29 = vmul.f32 0.6931472, %v4757_v2 }
 0x3a3   : > { %4256 = vmatprep.mubr.bf16.mxu1 %v2218_v54  ;;  %v2219_v49 = vpack.c.bf16 %v2191_v0, %v2189_v39  ;;  %v2195_v62 = vmul.f32 0.6931472, %v4759_v34  ;;  %4778 = vlog2.f32 %v3083_v44  ;;  %v4763_v56 = vpop.eup %4762  ;;  %v3055_v28 = vsel %vm2991_vm9, %v3023_v7, %v5939_v48  ;;  %v4474_v32 = vld [vmem:[%s6920_s11] sm:$0xff]  }
 0x3a4   : > { %v3129_v14 = vmul.f32 0.6931472, %v4761_v25  ;;  %4780 = vlog2.f32 %v3084_v22  ;;  %v2013_v9 = vadd.f32 1e-07, %v6177_v18  ;;  %v4765_v16 = vpop.eup %4764  ;;  %v2014_v33 = vadd.f32 1e-07, %v5925_v52  ;;  %4268 = vmatprep.subr.bf16.mxu0 %v4474_v32 }
 0x3a5   : > { %4257 = vmatmul.mubr.bf16.gmra.mrb[20].mxu1 %v2219_v49  ;;  %v2220_v57 = vpack.c.bf16 %v2195_v62, %v2193_v29  ;;  %4782 = vlog2.f32 %v3085_v10  ;;  %v2015_v35 = vadd.f32 1e-07, %v5939_v48  ;;  %v2197_v1 = vmul.f32 0.6931472, %v4763_v56  ;;  %4269 = vmatpush3.bf16.msra.mxu0 %v4474_v32  ;;  %v7085_v62 = vld [vmem:[#allocation41_spill] sm:$0xff] }
 0x3a6   : > { %v4767_v61 = vpop.eup %4766  ;;  %v2199_v38 = vmul.f32 0.6931472, %v4765_v16  ;;  %4784 = vlog2.f32 %v3086_v15  ;;  %v3179_v23 = vmul.f32 %v6524_v27, %v3129_v14  ;;  %v3087_v4 = vadd.f32 1e-07, %v3055_v28 }
 0x3a7   : > { %v4769_v45 = vpop.eup %4768  ;;  %4260 = vmatprep.mubr.bf16.mxu1 %v2220_v57  ;;  %v3131_v11 = vmul.f32 0.6931472, %v4767_v61  ;;  %4786 = vrcp.f32 %v2012_v58  ;;  %v1980_v34 = vmax.f32 %v6295_v55, 0.0  ;;  %v1981_v25 = vmax.f32 %v6297_v59, 0.0 }
 0x3a8   : > { %v4771_v18 = vpop.eup %4770  ;;  %v2221_v31 = vpack.c.bf16 %v2199_v38, %v2197_v1  ;;  %v3133_v42 = vmul.f32 0.6931472, %v4769_v45  ;;  %v3210_v5 = vadd.f32 %v3209_v3, %v3179_v23  ;;  %4788 = vrcp.f32 %v2013_v9 }
 0x3a9   : > { %v4773_v36 = vpop.eup %4772  ;;  %v3135_v52 = vmul.f32 0.6931472, %v4771_v18  ;;  %v3180_v48 = vmul.f32 %v6524_v27, %v3131_v11  ;;  %4790 = vrcp.f32 %v2014_v33  ;;  %v1982_v29 = vmax.f32 %v6299_v50, 0.0 }
 0x3aa   : > { %v4775_v37 = vpop.eup %4774  ;;  %v3137_v60 = vmul.f32 0.6931472, %v4773_v36  ;;  %4792 = vrcp.f32 %v2015_v35  ;;  %v3181_v26 = vmul.f32 %v6524_v27, %v3133_v42  ;;  %v1983_v56 = vmax.f32 %v7085_v62, 0.0  ;;  %v4478_v62 = vld [vmem:[%s6920_s11 + $0x20] sm:$0xff]  }
 0x3ab   : > { %v3139_v13 = vmul.f32 0.6931472, %v4775_v37  ;;  %v3211_v8 = vadd.f32 %v3210_v5, %v3180_v48  ;;  %4794 = vlog2.f32 %v3087_v4  ;;  %v3182_v20 = vmul.f32 %v6524_v27, %v3135_v52 }
 0x3ac   : > { %v4777_v41 = vpop.eup %4776  ;;  %v3183_v17 = vmul.f32 %v6524_v27, %v3137_v60 }
 0x3ad   : > { %v4779_v3 = vpop.eup %4778  ;;  %4261 = vmatmul.mubr.bf16.gmra.mrb[24].mxu1 %v2221_v31  ;;  %v3212_v44 = vadd.f32 %v3211_v8, %v3181_v26  ;;  %v3141_v2 = vmul.f32 0.6931472, %v4777_v41  ;;  %v3184_v54 = vmul.f32 %v6524_v27, %v3139_v13 }
 0x3ae   : > { %v4781_v6 = vpop.eup %4780  ;;  %v3143_v10 = vmul.f32 0.6931472, %v4779_v3 }
 0x3af   : > { %v4783_v22 = vpop.eup %4782  ;;  %v3213_v39 = vadd.f32 %v3212_v44, %v3182_v20  ;;  %v3145_v15 = vmul.f32 0.6931472, %v4781_v6  ;;  %v3185_v16 = vmul.f32 %v6524_v27, %v3141_v2 }
 0x3b0   : > { %v4785_v0 = vpop.eup %4784  ;;  %v3147_v9 = vmul.f32 0.6931472, %v4783_v22  ;;  %v3186_v55 = vmul.f32 %v6524_v27, %v3143_v10  ;;  %v5020_v10 = vmov 1.0|1.0  }
 0x3b1   : > { %v4787_v7 = vpop.eup %4786  ;;  %v3214_v58 = vadd.f32 %v3213_v39, %v3183_v17  ;;  %v3187_v38 = vmul.f32 %v6524_v27, %v3145_v15  ;;  %v3149_v4 = vmul.f32 0.6931472, %v4785_v0  ;;  %v4475_v15 = vld [vmem:[%s6920_s11 + $0x8] sm:$0xff]  }
 0x3b2   : > { %v4789_v49 = vpop.eup %4788  ;;  %v2076_v28 = vmul.f32 %v4787_v7, %v1980_v34  ;;  %v3188_v31 = vmul.f32 %v6524_v27, %v3147_v9  ;;  %4270 = vmatprep.subr.bf16.mxu0 %v4475_v15  ;;  %v4480_v9 = vld [vmem:[%s6920_s11 + $0x30] sm:$0xff]  }
 0x3b3   : > { %v4791_v14 = vpop.eup %4790  ;;  %v3215_v57 = vadd.f32 %v3214_v58, %v3184_v54  ;;  %v2077_v33 = vmul.f32 %v4789_v49, %v1981_v25  ;;  %v3189_v13 = vmul.f32 %v6524_v27, %v3149_v4  ;;  %v4476_v58 = vld [vmem:[%s6920_s11 + $0x10] sm:$0xff]   ;;  %4271 = vmatpush3.bf16.msra.mxu0 %v4475_v15  ;;  %v4477_v25 = vld [vmem:[%s6920_s11 + $0x18] sm:$0xff]  }
 0x3b4   : > { %v4793_v35 = vpop.eup %4792  ;;  %v2108_v61 = vmul.f32 1.7182819, %v2076_v28  ;;  %v2078_v1 = vmul.f32 %v4791_v14, %v1982_v29  ;;  %4272 = vmatprep.subr.bf16.mxu0 %v4476_v58 }
 0x3b5   : > { %v3216_v59 = vadd.f32 %v3215_v57, %v3185_v16  ;;  %v2109_v23 = vmul.f32 1.7182819, %v2077_v33  ;;  %v2079_v45 = vmul.f32 %v4793_v35, %v1983_v56  ;;  %v4795_v50 = vpop.eup %4794  ;;  %v4479_v56 = vld [vmem:[%s6920_s11 + $0x28] sm:$0xff]   ;;  %v4481_v16 = vld [vmem:[%s6920_s11 + $0x38] sm:$0xff]  }
 0x3b6   : > { %v2140_v11 = vadd.f32 1.0, %v2108_v61  ;;  %v2110_v18 = vmul.f32 1.7182819, %v2078_v1  ;;  %v3151_v48 = vmul.f32 0.6931472, %v4795_v50  ;;  %v7093_v57 = vld [vmem:[#allocation34_spill] sm:$0xff] }
 0x3b7   : > { %v3217_v42 = vadd.f32 %v3216_v59, %v3186_v55  ;;  %v2141_v5 = vadd.f32 1.0, %v2109_v23  ;;  %v2111_v36 = vmul.f32 1.7182819, %v2079_v45  ;;  %4273 = vmatpush3.bf16.msra.mxu0 %v4476_v58  ;;  %v7095_v33 = vld [vmem:[#allocation36_spill] sm:$0xff]  ;;  %v7099_v55 = vld [vmem:[#allocation42_spill] sm:$0xff]  ;;  %v7101_v61 = vld [vmem:[#allocation43_spill] sm:$0xff] }
 0x3b8   : > { %4796 = vlog2.f32 %v2140_v11  ;;  %v2142_v52 = vadd.f32 1.0, %v2110_v18  ;;  %v3190_v8 = vmul.f32 %v6524_v27, %v3151_v48  ;;  %4274 = vmatprep.subr.bf16.mxu0 %v4477_v25  ;;  %v7097_v35 = vld [vmem:[#allocation40_spill] sm:$0xff]  ;;  %v6639_v45 = vld [vmem:[%s6919_s10] ss:$0 sm:$0xff] }
 0x3b9   : > { %v3218_v37 = vadd.f32 %v3217_v42, %v3187_v38  ;;  %4798 = vlog2.f32 %v2141_v5  ;;  %v2143_v60 = vadd.f32 1.0, %v2111_v36  ;;  %v7104_v38 = vmov 0.0  }
 0x3ba   : > { %4800 = vlog2.f32 %v2142_v52 }
 0x3bb   : > { %v3219_v26 = vadd.f32 %v3218_v37, %v3188_v31  ;;  %4802 = vlog2.f32 %v2143_v60  ;;  %4275 = vmatpush3.bf16.msra.mxu0 %v4477_v25 }
 0x3bc   : > { %4276 = vmatprep.subr.bf16.mxu0 %v4478_v62 }
 0x3bd   : > { %v3220_v32 = vadd.f32 %v3219_v26, %v3189_v13 }
 0x3bf   : > { %v3221_v41 = vadd.f32 %v3220_v32, %v3190_v8  ;;  %4277 = vmatpush3.bf16.msra.mxu0 %v4478_v62 }
 0x3c0   : > { %4278 = vmatprep.subr.bf16.mxu0 %v4479_v56 }
 0x3c1   : > { %3222 = vadd.xlane.f32.xlu0 %v3221_v41 }
 0x3c2   : > { %v4797_v3 = vpop.eup %4796 }
 0x3c3   : > { %v4799_v20 = vpop.eup %4798  ;;  %v2201_v44 = vmul.f32 0.6931472, %v4797_v3  ;;  %4279 = vmatpush3.bf16.msra.mxu0 %v4479_v56 }
 0x3c4   : > { %v4801_v17 = vpop.eup %4800  ;;  %v2203_v6 = vmul.f32 0.6931472, %v4799_v20  ;;  %4280 = vmatprep.subr.bf16.mxu0 %v4480_v9 }
 0x3c5   : > { %v4803_v22 = vpop.eup %4802  ;;  %v2205_v54 = vmul.f32 0.6931472, %v4801_v17 }
 0x3c6   : > { %v2222_v2 = vpack.c.bf16 %v2203_v6, %v2201_v44  ;;  %v2207_v39 = vmul.f32 0.6931472, %v4803_v22 }
 0x3c7   : > { %4281 = vmatpush3.bf16.msra.mxu0 %v4480_v9 }
 0x3c8   : > { %4264 = vmatprep.mubr.bf16.mxu1 %v2222_v2  ;;  %v2223_v0 = vpack.c.bf16 %v2207_v39, %v2205_v54  ;;  %4282 = vmatprep.subr.bf16.mxu0 %v4481_v16 }
 0x3ca   : > { %4265 = vmatmul.mubr.bf16.gmra.mrb[28].mxu1 %v2223_v0 }
 0x3cb   : > { %4332 = vmatprep.mubr.msk.bf16.mxu1 %vm5698_vm6, %v5020_v10  ;;  %vm7094_vm6 = vnez %v7093_v57  ;;  %4283 = vmatpush3.bf16.msra.mxu0 %v4481_v16 }
 0x3d2   : > { %4333 = vmatmul.mubr.msk.bf16.vlgmr.msra.gmra.mrb[32].mxu1 %vm5712_vm7, %v5020_v10  ;;  %vm7096_vm7 = vnez %v7095_v33 }
 0x3d3   : > { %4336 = vmatprep.mubr.msk.bf16.mxu1 %vm5787_vm12, %v5020_v10  ;;  %vm7098_vm12 = vnez %v7097_v35 }
 0x3da   : > { %4337 = vmatmul.mubr.msk.bf16.gmra.mrb[36].mxu1 %vm5859_vm1, %v5020_v10  ;;  %vm7100_vm1 = vnez %v7099_v55 }
 0x3db   : > { %4340 = vmatprep.mubr.msk.bf16.mxu1 %vm5913_vm8, %v5020_v10  ;;  %vm7102_vm8 = vnez %v7101_v61 }
 0x3e2   : > { %4341 = vmatmul.mubr.msk.bf16.gmra.mrb[40].mxu1 %vm5985_vm14, %v5020_v10  ;;  %vm1173_vm14 = vcmask 0  }
 0x3e3   : > { %4344 = vmatprep.mubr.msk.bf16.mxu1 %vm6068_vm5, %v5020_v10  ;;  %1174 = vst.msk [vmem:[#allocation5] sm:$0x1] %vm1173_vm14, %v7104_v38  ;;  %1175 = vst.msk [vmem:[#allocation7] sm:$0x1] %vm1173_vm14, %v7104_v38 }
 0x3ea   : > { %4345 = vmatmul.mubr.msk.bf16.gmra.mrb[44].mxu1 %vm7094_vm6, %v5020_v10 }
 0x3eb   : > { %4348 = vmatprep.mubr.msk.bf16.mxu1 %vm7096_vm7, %v5020_v10 }
 0x3f2   : > { %4349 = vmatmul.mubr.msk.bf16.gmra.mrb[48].mxu1 %vm7098_vm12, %v5020_v10 }
 0x3f3   : > { %4352 = vmatprep.mubr.msk.bf16.mxu1 %vm7100_vm1, %v5020_v10 }
 0x3fa   : > { %4353 = vmatmul.mubr.msk.bf16.gmra.mrb[52].mxu1 %vm7102_vm8, %v5020_v10 }
 0x3fb   : > { %4356 = vmatprep.mubr.msk.bf16.mxu1 %vm6334_vm3, %v5020_v10 }
 0x402   : > { %4357 = vmatmul.mubr.msk.bf16.gmra.mrb[56].mxu1 %vm6344_vm13, %v5020_v10 }
 0x403   : > { %4360 = vmatprep.mubr.msk.bf16.mxu1 %vm6355_vm2, %v5020_v10 }
 0x408   : > { %v4238_v4 = vpop.f32.mrb[0].mxu1 }
 0x409   : > { %v2338_v11 = vadd.f32 %v4238_v4, %v6639_v45  ;;  %v2329_v18 = vpop.f32.mrb[1].mxu1 }
 0x40a   : > { %4361 = vmatmul.mubr.msk.bf16.gmra.mrb[60].mxu1 %vm6363_vm0, %v5020_v10  ;;  %v2330_v31 = vadd.f32 %v6639_v45, %v2329_v18  ;;  %v4239_v42 = vpop.f32.mrb[2].mxu1 }
 0x40b   : > { %v2341_v5 = vadd.f32 %v4239_v42, %v6639_v45  ;;  %v2332_v36 = vpop.f32.mrb[3].mxu1  ;;  %v2458_v48 = vmax.f32 %v2338_v11, 0.0 }
 0x40c   : > { %v2333_v52 = vadd.f32 %v6639_v45, %v2332_v36  ;;  %v2456_v60 = vmax.f32 %v2330_v31, 0.0 }
 0x40d   : > { %v2459_v37 = vmax.f32 %v2341_v5, 0.0 }
 0x40e   : > { %v2457_v13 = vmax.f32 %v2333_v52, 0.0 }
 0x40f   : > { %v2489_v26 = vpack.c.bf16 %v2459_v37, %v2458_v48 }
 0x410   : > { %v2488_v8 = vpack.c.bf16 %v2457_v13, %v2456_v60 }
 0x412   : > { %v4242_v32 = vpop.f32.mrb[4].mxu1  ;;  %4284 = vmatprep.mubr.bf16.mxu0 %v2488_v8 }
 0x413   : > { %v2354_v41 = vadd.f32 %v4242_v32, %v6639_v45  ;;  %v2345_v3 = vpop.f32.mrb[5].mxu1  ;;  %4285 = vmatmul.mubr.bf16.vlgmr.msra.gmra.mrb[32].mxu0 %v2489_v26 }
 0x414   : > { %v2346_v20 = vadd.f32 %v6639_v45, %v2345_v3  ;;  %v4243_v17 = vpop.f32.mrb[6].mxu1 }
 0x415   : > { %v2357_v44 = vadd.f32 %v4243_v17, %v6639_v45  ;;  %v2348_v6 = vpop.f32.mrb[7].mxu1  ;;  %v2462_v2 = vmax.f32 %v2354_v41, 0.0 }
 0x416   : > { %v2349_v22 = vadd.f32 %v6639_v45, %v2348_v6  ;;  %v2460_v39 = vmax.f32 %v2346_v20, 0.0 }
 0x417   : > { %v2463_v54 = vmax.f32 %v2357_v44, 0.0 }
 0x418   : > { %v2461_v0 = vmax.f32 %v2349_v22, 0.0 }
 0x419   : > { %v2491_v10 = vpack.c.bf16 %v2463_v54, %v2462_v2 }
 0x41a   : > { %v2490_v34 = vpack.c.bf16 %v2461_v0, %v2460_v39 }
 0x41c   : > { %4288 = vmatprep.mubr.bf16.mxu0 %v2490_v34 }
 0x41d   : > { %4289 = vmatmul.mubr.bf16.gmra.mrb[36].mxu0 %v2491_v10 }
 0x425   : > { %v4246_v27 = vpop.f32.mrb[8].mxu1 }
 0x426   : > { %v2370_v7 = vadd.f32 %v4246_v27, %v6639_v45  ;;  %v2361_v15 = vpop.f32.mrb[9].mxu1 }
 0x427   : > { %v2362_v58 = vadd.f32 %v6639_v45, %v2361_v15  ;;  %v4247_v25 = vpop.f32.mrb[10].mxu1 }
 0x428   : > { %v2373_v49 = vadd.f32 %v4247_v25, %v6639_v45  ;;  %v2364_v29 = vpop.f32.mrb[11].mxu1  ;;  %v2466_v56 = vmax.f32 %v2370_v7, 0.0 }
 0x429   : > { %v2365_v62 = vadd.f32 %v6639_v45, %v2364_v29  ;;  %v2464_v14 = vmax.f32 %v2362_v58, 0.0 }
 0x42a   : > { %v2467_v28 = vmax.f32 %v2373_v49, 0.0 }
 0x42b   : > { %v2465_v9 = vmax.f32 %v2365_v62, 0.0 }
 0x42c   : > { %v2493_v16 = vpack.c.bf16 %v2467_v28, %v2466_v56 }
 0x42d   : > { %v2492_v57 = vpack.c.bf16 %v2465_v9, %v2464_v14 }
 0x42f   : > { %4292 = vmatprep.mubr.bf16.mxu0 %v2492_v57 }
 0x430   : > { %4293 = vmatmul.mubr.bf16.gmra.mrb[40].mxu0 %v2493_v16 }
 0x43e   : > { %v4250_v33 = vpop.f32.mrb[12].mxu1 }
 0x43f   : > { %v2386_v35 = vadd.f32 %v4250_v33, %v6639_v45  ;;  %v2377_v55 = vpop.f32.mrb[13].mxu1 }
 0x440   : > { %v2378_v61 = vadd.f32 %v6639_v45, %v2377_v55  ;;  %v4251_v1 = vpop.f32.mrb[14].mxu1 }
 0x441   : > { %v2389_v38 = vadd.f32 %v4251_v1, %v6639_v45  ;;  %v2380_v59 = vpop.f32.mrb[15].mxu1  ;;  %v2470_v50 = vmax.f32 %v2386_v35, 0.0 }
 0x442   : > { %v2381_v23 = vadd.f32 %v6639_v45, %v2380_v59  ;;  %v2468_v11 = vmax.f32 %v2378_v61, 0.0 }
 0x443   : > { %v2471_v4 = vmax.f32 %v2389_v38, 0.0 }
 0x444   : > { %v2469_v18 = vmax.f32 %v2381_v23, 0.0 }
 0x445   : > { %v2495_v31 = vpack.c.bf16 %v2471_v4, %v2470_v50 }
 0x446   : > { %v2494_v42 = vpack.c.bf16 %v2469_v18, %v2468_v11 }
 0x448   : > { %4296 = vmatprep.mubr.bf16.mxu0 %v2494_v42  ;;  %v3628_v42 = vld [vmem:[#allocation5] sm:$0x1] }
 0x449   : > { %4297 = vmatmul.mubr.bf16.gmra.mrb[44].mxu0 %v2495_v31 }
 0x44e   : > { %v3223_v5 = vpop.xlane.xlu0 %3222 }
 0x44f   : > { %v3224_v36 = vrot.slane %v3223_v5, 4 }
 0x451   : > { %v3225_v52 = vadd.f32 %v3224_v36, %v3223_v5 }
 0x453   : > { %v3226_v48 = vrot.slane %v3225_v52, 2 }
 0x454   : > { %v4254_v37 = vpop.f32.mrb[16].mxu1 }
 0x455   : > { %v3227_v60 = vadd.f32 %v3226_v48, %v3225_v52  ;;  %v2402_v13 = vadd.f32 %v4254_v37, %v6639_v45  ;;  %v2393_v26 = vpop.f32.mrb[17].mxu1 }
 0x456   : > { %v2394_v8 = vadd.f32 %v6639_v45, %v2393_v26  ;;  %v4255_v32 = vpop.f32.mrb[18].mxu1 }
 0x457   : > { %v3228_v41 = vrot.slane %v3227_v60, 1  ;;  %v2405_v3 = vadd.f32 %v4255_v32, %v6639_v45  ;;  %v2396_v20 = vpop.f32.mrb[19].mxu1  ;;  %v2474_v6 = vmax.f32 %v2402_v13, 0.0 }
 0x458   : > { %v2397_v17 = vadd.f32 %v6639_v45, %v2396_v20  ;;  %v2472_v2 = vmax.f32 %v2394_v8, 0.0 }
 0x459   : > { %v3229_v44 = vadd.f32 %v3228_v41, %v3227_v60  ;;  %v2475_v22 = vmax.f32 %v2405_v3, 0.0 }
 0x45a   : > { %v2473_v54 = vmax.f32 %v2397_v17, 0.0 }
 0x45b   : > { %4380 = vpush %v3229_v44  ;;  %v2497_v39 = vpack.c.bf16 %v2475_v22, %v2474_v6 }
 0x45c   : > { %v2496_v0 = vpack.c.bf16 %v2473_v54, %v2472_v2 }
 0x45e   : > { %4300 = vmatprep.mubr.bf16.mxu0 %v2496_v0  ;;  %v7108_v0 = vld [vmem:[#allocation11_spill] sm:$0xff] }
 0x45f   : > { %4301 = vmatmul.mubr.bf16.gmra.mrb[48].mxu0 %v2497_v39 }
 0x478   : > { %v4258_v10 = vpop.f32.mrb[20].mxu1 }
 0x479   : > { %v2418_v34 = vadd.f32 %v4258_v10, %v6639_v45  ;;  %v2409_v27 = vpop.f32.mrb[21].mxu1 }
 0x47a   : > { %v2410_v7 = vadd.f32 %v6639_v45, %v2409_v27  ;;  %v4259_v15 = vpop.f32.mrb[22].mxu1 }
 0x47b   : > { %v2421_v58 = vadd.f32 %v4259_v15, %v6639_v45  ;;  %v2412_v25 = vpop.f32.mrb[23].mxu1  ;;  %v2478_v29 = vmax.f32 %v2418_v34, 0.0  ;;  %v7109_v34 = vld [vmem:[#allocation12_spill] sm:$0xff] }
 0x47c   : > { %v2413_v49 = vadd.f32 %v6639_v45, %v2412_v25  ;;  %v2476_v56 = vmax.f32 %v2410_v7, 0.0  ;;  %v7110_v7 = vld [vmem:[#allocation13_spill] sm:$0xff] }
 0x47d   : > { %v2479_v62 = vmax.f32 %v2421_v58, 0.0 }
 0x47e   : > { %v2477_v28 = vmax.f32 %v2413_v49, 0.0 }
 0x47f   : > { %v2499_v14 = vpack.c.bf16 %v2479_v62, %v2478_v29 }
 0x480   : > { %v2498_v9 = vpack.c.bf16 %v2477_v28, %v2476_v56  ;;  %v4262_v16 = vpop.f32.mrb[24].mxu1  ;;  %v7112_v56 = vld [vmem:[#allocation17_spill] sm:$0xff] }
 0x481   : > { %v2434_v57 = vadd.f32 %v4262_v16, %v6639_v45  ;;  %v2425_v33 = vpop.f32.mrb[25].mxu1 }
 0x482   : > { %v2426_v35 = vadd.f32 %v6639_v45, %v2425_v33  ;;  %v4263_v55 = vpop.f32.mrb[26].mxu1  ;;  %4304 = vmatprep.mubr.bf16.mxu0 %v2498_v9  ;;  %v7113_v33 = vld [vmem:[#allocation18_spill] sm:$0xff] }
 0x483   : > { %v2437_v61 = vadd.f32 %v4263_v55, %v6639_v45  ;;  %v2428_v1 = vpop.f32.mrb[27].mxu1  ;;  %4305 = vmatmul.mubr.bf16.gmra.mrb[52].mxu0 %v2499_v14  ;;  %v2482_v59 = vmax.f32 %v2434_v57, 0.0  ;;  %v7114_v55 = vld [vmem:[#allocation20_spill] sm:$0xff] }
 0x484   : > { %v2429_v38 = vadd.f32 %v6639_v45, %v2428_v1  ;;  %v2480_v50 = vmax.f32 %v2426_v35, 0.0 }
 0x485   : > { %v2483_v23 = vmax.f32 %v2437_v61, 0.0 }
 0x486   : > { %v2481_v4 = vmax.f32 %v2429_v38, 0.0  ;;  %v7115_v38 = vld [vmem:[#allocation21_spill] sm:$0xff] }
 0x487   : > { %v2501_v11 = vpack.c.bf16 %v2483_v23, %v2482_v59 }
 0x488   : > { %v2500_v18 = vpack.c.bf16 %v2481_v4, %v2480_v50 }
 0x48a   : > { %4308 = vmatprep.mubr.bf16.mxu0 %v2500_v18 }
 0x48b   : > { %4309 = vmatmul.mubr.bf16.gmra.mrb[56].mxu0 %v2501_v11  ;;  %v7116_v11 = vld [vmem:[#allocation23_spill] sm:$0xff] }
 0x48c   : > { %s4381_s19 = spop %4380 }
 0x48d   : > { %v3231_v31 = vstv %s4381_s19 }
 0x48e   : > { %v3232_v5 = vsub.f32 0.0, %v3231_v31 }
 0x490   : > { %v3629_v36 = vadd.f32 %v3628_v42, %v3232_v5 }
 0x492   : > { %3631 = vst.msk [vmem:[#allocation5] sm:$0x1] %vm1173_vm14, %v3629_v36 }
 0x49d   : > { %v4266_v52 = vpop.f32.mrb[28].mxu1 }
 0x49e   : > { %v2450_v48 = vadd.f32 %v4266_v52, %v6639_v45  ;;  %v2441_v37 = vpop.f32.mrb[29].mxu1  ;;  %v7117_v52 = vld [vmem:[#allocation24_spill] sm:$0xff] }
 0x49f   : > { %v2442_v60 = vadd.f32 %v6639_v45, %v2441_v37  ;;  %v4267_v13 = vpop.f32.mrb[30].mxu1  ;;  %v7118_v37 = vld [vmem:[#allocation27_spill] sm:$0xff] }
 0x4a0   : > { %v2453_v26 = vadd.f32 %v4267_v13, %v6639_v45  ;;  %v2444_v8 = vpop.f32.mrb[31].mxu1  ;;  %v2486_v41 = vmax.f32 %v2450_v48, 0.0 }
 0x4a1   : > { %v2445_v32 = vadd.f32 %v6639_v45, %v2444_v8  ;;  %v2484_v20 = vmax.f32 %v2442_v60, 0.0  ;;  %v7111_v45 = vld [vmem:[#allocation15_spill] sm:$0xff] }
 0x4a2   : > { %v2487_v3 = vmax.f32 %v2453_v26, 0.0  ;;  %v7119_v26 = vld [vmem:[#allocation28_spill] sm:$0xff] }
 0x4a3   : > { %v2485_v17 = vmax.f32 %v2445_v32, 0.0 }
 0x4a4   : > { %v2503_v44 = vpack.c.bf16 %v2487_v3, %v2486_v41 }
 0x4a5   : > { %v2502_v6 = vpack.c.bf16 %v2485_v17, %v2484_v20  ;;  %v4334_v22 = vpop.f32.mrb[32].mxu1  ;;  %v7120_v20 = vld [vmem:[#allocation29_spill] sm:$0xff] }
 0x4a6   : > { %v3347_v2 = vpop.f32.mrb[33].mxu1  ;;  %v3476_v15 = vmul.f32 %v4334_v22, %v7110_v7 }
 0x4a7   : > { %4312 = vmatprep.mubr.bf16.mxu0 %v2502_v6  ;;  %v4335_v54 = vpop.f32.mrb[34].mxu1  ;;  %v3474_v10 = vmul.f32 %v7108_v0, %v3347_v2  ;;  %v7122_v0 = vld [vmem:[#allocation32_spill] sm:$0xff] }
 0x4a8   : > { %4313 = vmatmul.mubr.bf16.gmra.mrb[60].mxu0 %v2503_v44  ;;  %v3350_v39 = vpop.f32.mrb[35].mxu1  ;;  %v3477_v25 = vmul.f32 %v4335_v54, %v7111_v45  ;;  %v7121_v54 = vld [vmem:[#allocation30_spill] sm:$0xff] }
 0x4a9   : > { %v3475_v27 = vmul.f32 %v7109_v34, %v3350_v39 }
 0x4ab   : > { %v3545_v58 = vadd.f32 %v3475_v27, %v3474_v10  ;;  %v7123_v27 = vld [vmem:[#allocation33_spill] sm:$0xff] }
 0x4ad   : > { %v3546_v49 = vadd.f32 %v3545_v58, %v3476_v15  ;;  %v4338_v29 = vpop.f32.mrb[36].mxu1 }
 0x4ae   : > { %v3363_v62 = vpop.f32.mrb[37].mxu1  ;;  %v3480_v61 = vmul.f32 %v4338_v29, %v7114_v55 }
 0x4af   : > { %v3478_v28 = vmul.f32 %v7112_v56, %v3363_v62  ;;  %v3547_v14 = vadd.f32 %v3546_v49, %v3477_v25  ;;  %v4339_v9 = vpop.f32.mrb[38].mxu1  ;;  %v7124_v25 = vld [vmem:[#allocation35_spill] sm:$0xff] }
 0x4b0   : > { %v3366_v16 = vpop.f32.mrb[39].mxu1  ;;  %v3481_v59 = vmul.f32 %v4339_v9, %v7115_v38 }
 0x4b1   : > { %v3548_v57 = vadd.f32 %v3547_v14, %v3478_v28  ;;  %v3479_v35 = vmul.f32 %v7113_v33, %v3366_v16  ;;  %v7125_v14 = vld [vmem:[#allocation37_spill] sm:$0xff]  ;;  %v7126_v16 = vld [vmem:[#allocation38_spill] sm:$0xff] }
 0x4b3   : > { %v3549_v1 = vadd.f32 %v3548_v57, %v3479_v35  ;;  %v7127_v35 = vld [vmem:[#allocation39_spill] sm:$0xff] }
 0x4b5   : > { %v3550_v23 = vadd.f32 %v3549_v1, %v3480_v61  ;;  %v4342_v50 = vpop.f32.mrb[40].mxu1 }
 0x4b6   : > { %v3379_v4 = vpop.f32.mrb[41].mxu1  ;;  %v3484_v60 = vmul.f32 %v4342_v50, %v7118_v37 }
 0x4b7   : > { %v3482_v18 = vmul.f32 %v7116_v11, %v3379_v4  ;;  %v3551_v31 = vadd.f32 %v3550_v23, %v3481_v59  ;;  %v4343_v42 = vpop.f32.mrb[42].mxu1 }
 0x4b8   : > { %v3382_v5 = vpop.f32.mrb[43].mxu1  ;;  %v3485_v8 = vmul.f32 %v4343_v42, %v7119_v26 }
 0x4b9   : > { %v3552_v36 = vadd.f32 %v3551_v31, %v3482_v18  ;;  %v3483_v48 = vmul.f32 %v7117_v52, %v3382_v5 }
 0x4bb   : > { %v3553_v13 = vadd.f32 %v3552_v36, %v3483_v48 }
 0x4bd   : > { %v3554_v32 = vadd.f32 %v3553_v13, %v3484_v60  ;;  %v4346_v41 = vpop.f32.mrb[44].mxu1 }
 0x4be   : > { %v3395_v3 = vpop.f32.mrb[45].mxu1  ;;  %v3488_v10 = vmul.f32 %v4346_v41, %v7122_v0 }
 0x4bf   : > { %v3486_v17 = vmul.f32 %v7120_v20, %v3395_v3  ;;  %v3555_v44 = vadd.f32 %v3554_v32, %v3485_v8  ;;  %v4347_v6 = vpop.f32.mrb[46].mxu1 }
 0x4c0   : > { %v3398_v22 = vpop.f32.mrb[47].mxu1  ;;  %v3489_v7 = vmul.f32 %v4347_v6, %v7123_v27 }
 0x4c1   : > { %v3556_v2 = vadd.f32 %v3555_v44, %v3486_v17  ;;  %v3487_v39 = vmul.f32 %v7121_v54, %v3398_v22 }
 0x4c3   : > { %v3557_v34 = vadd.f32 %v3556_v2, %v3487_v39 }
 0x4c5   : > { %v3558_v15 = vadd.f32 %v3557_v34, %v3488_v10  ;;  %v4350_v58 = vpop.f32.mrb[48].mxu1 }
 0x4c6   : > { %v3411_v45 = vpop.f32.mrb[49].mxu1  ;;  %v3492_v57 = vmul.f32 %v4350_v58, %v7126_v16 }
 0x4c7   : > { %v3490_v49 = vmul.f32 %v7124_v25, %v3411_v45  ;;  %v3559_v29 = vadd.f32 %v3558_v15, %v3489_v7  ;;  %v4351_v62 = vpop.f32.mrb[50].mxu1 }
 0x4c8   : > { %v3414_v56 = vpop.f32.mrb[51].mxu1  ;;  %v3493_v55 = vmul.f32 %v4351_v62, %v7127_v35 }
 0x4c9   : > { %v3560_v28 = vadd.f32 %v3559_v29, %v3490_v49  ;;  %v3491_v9 = vmul.f32 %v7125_v14, %v3414_v56 }
 0x4cb   : > { %v3561_v33 = vadd.f32 %v3560_v28, %v3491_v9 }
 0x4cd   : > { %v3562_v61 = vadd.f32 %v3561_v33, %v3492_v57  ;;  %v4354_v1 = vpop.f32.mrb[52].mxu1 }
 0x4ce   : > { %v3427_v38 = vpop.f32.mrb[53].mxu1  ;;  %v3496_v31 = vmul.f32 %v4354_v1, %v6394_v40 }
 0x4cf   : > { %v3494_v59 = vmul.f32 %v6370_v51, %v3427_v38  ;;  %v3563_v23 = vadd.f32 %v3562_v61, %v3493_v55  ;;  %v4355_v50 = vpop.f32.mrb[54].mxu1 }
 0x4d0   : > { %v3430_v4 = vpop.f32.mrb[55].mxu1  ;;  %v3497_v5 = vmul.f32 %v4355_v50, %v6399_v47 }
 0x4d1   : > { %v3564_v11 = vadd.f32 %v3563_v23, %v3494_v59  ;;  %v3495_v18 = vmul.f32 %v6377_v43, %v3430_v4 }
 0x4d3   : > { %v3565_v42 = vadd.f32 %v3564_v11, %v3495_v18 }
 0x4d5   : > { %v3566_v36 = vadd.f32 %v3565_v42, %v3496_v31  ;;  %v4358_v52 = vpop.f32.mrb[56].mxu1 }
 0x4d6   : > { %v3443_v48 = vpop.f32.mrb[57].mxu1  ;;  %v3500_v32 = vmul.f32 %v4358_v52, %v6414_v24 }
 0x4d7   : > { %v3498_v37 = vmul.f32 %v6404_v46, %v3443_v48  ;;  %v3567_v60 = vadd.f32 %v3566_v36, %v3497_v5  ;;  %v4359_v13 = vpop.f32.mrb[58].mxu1 }
 0x4d8   : > { %v3446_v26 = vpop.f32.mrb[59].mxu1  ;;  %v3501_v43 = vmul.f32 %v4359_v13, %v6419_v12  ;;  %v6711_v12 = vld [vmem:[%s6921_s12] ss:$0 sm:$0xff] }
 0x4d9   : > { %v3568_v51 = vadd.f32 %v3567_v60, %v3498_v37  ;;  %v3499_v8 = vmul.f32 %v6409_v53, %v3446_v26 }
 0x4db   : > { %v3569_v41 = vadd.f32 %v3568_v51, %v3499_v8 }
 0x4dd   : > { %v3570_v40 = vadd.f32 %v3569_v41, %v3500_v32  ;;  %v4362_v3 = vpop.f32.mrb[60].mxu1 }
 0x4de   : > { %v3459_v20 = vpop.f32.mrb[61].mxu1  ;;  %v3504_v2 = vmul.f32 %v4362_v3, %v6446_v63 }
 0x4df   : > { %v3502_v47 = vmul.f32 %v6430_v21, %v3459_v20  ;;  %v3571_v17 = vadd.f32 %v3570_v40, %v3501_v43  ;;  %v4363_v44 = vpop.f32.mrb[62].mxu1 }
 0x4e0   : > { %v3462_v6 = vpop.f32.mrb[63].mxu1  ;;  %v3505_v53 = vmul.f32 %v4363_v44, %v6455_v30 }
 0x4e1   : > { %v3572_v46 = vadd.f32 %v3571_v17, %v3502_v47  ;;  %v3503_v22 = vmul.f32 %v6441_v19, %v3462_v6 }
 0x4e3   : > { %v3573_v54 = vadd.f32 %v3572_v46, %v3503_v22 }
 0x4e5   : > { %v3574_v24 = vadd.f32 %v3573_v54, %v3504_v2 }
 0x4e6   : > { %v4286_v21 = vpop.f32.mrb[32].mxu0 }
 0x4e7   : > { %v3575_v39 = vadd.f32 %v3574_v24, %v3505_v53  ;;  %v2618_v0 = vadd.f32 %v4286_v21, %v6711_v12  ;;  %v2609_v10 = vpop.f32.mrb[33].mxu0 }
 0x4e8   : > { %v2610_v34 = vadd.f32 %v6711_v12, %v2609_v10  ;;  %v4287_v19 = vpop.f32.mrb[34].mxu0 }
 0x4e9   : > { %3576 = vadd.xlane.f32.xlu0 %v3575_v39  ;;  %v3924_v27 = vmul.f32 -1.442695, %v2618_v0  ;;  %v2621_v63 = vadd.f32 %v4287_v19, %v6711_v12  ;;  %v2612_v7 = vpop.f32.mrb[35].mxu0 }
 0x4ea   : > { %v3922_v30 = vmul.f32 -1.442695, %v2610_v34  ;;  %v2613_v15 = vadd.f32 %v6711_v12, %v2612_v7 }
 0x4eb   : > { %4804 = vpow2.f32 %v3924_v27  ;;  %v3925_v58 = vmul.f32 -1.442695, %v2621_v63 }
 0x4ec   : > { %4806 = vpow2.f32 %v3922_v30  ;;  %v3923_v45 = vmul.f32 -1.442695, %v2613_v15 }
 0x4ed   : > { %4808 = vpow2.f32 %v3925_v58 }
 0x4ee   : > { %4810 = vpow2.f32 %v3923_v45 }
 0x4f0   : > { %v4290_v25 = vpop.f32.mrb[36].mxu0 }
 0x4f1   : > { %v2634_v49 = vadd.f32 %v4290_v25, %v6711_v12  ;;  %v2625_v29 = vpop.f32.mrb[37].mxu0 }
 0x4f2   : > { %v2626_v62 = vadd.f32 %v6711_v12, %v2625_v29  ;;  %v4291_v56 = vpop.f32.mrb[38].mxu0 }
 0x4f3   : > { %v3928_v28 = vmul.f32 -1.442695, %v2634_v49  ;;  %v2637_v14 = vadd.f32 %v4291_v56, %v6711_v12  ;;  %v2628_v9 = vpop.f32.mrb[39].mxu0 }
 0x4f4   : > { %v3926_v16 = vmul.f32 -1.442695, %v2626_v62  ;;  %v2629_v57 = vadd.f32 %v6711_v12, %v2628_v9 }
 0x4f5   : > { %4812 = vpow2.f32 %v3928_v28  ;;  %v3929_v33 = vmul.f32 -1.442695, %v2637_v14  ;;  %v4805_v35 = vpop.eup %4804 }
 0x4f6   : > { %4814 = vpow2.f32 %v3926_v16  ;;  %v3927_v55 = vmul.f32 -1.442695, %v2629_v57  ;;  %v4807_v61 = vpop.eup %4806  ;;  %v2834_v1 = vadd.f32 1.0, %v4805_v35 }
 0x4f7   : > { %4816 = vpow2.f32 %v3929_v33  ;;  %v4809_v38 = vpop.eup %4808  ;;  %v2832_v59 = vadd.f32 1.0, %v4807_v61 }
 0x4f8   : > { %4818 = vpow2.f32 %v3927_v55  ;;  %v4811_v23 = vpop.eup %4810  ;;  %v2835_v50 = vadd.f32 1.0, %v4809_v38 }
 0x4f9   : > { %4820 = vrcp.f32 %v2834_v1  ;;  %v2833_v4 = vadd.f32 1.0, %v4811_v23 }
 0x4fa   : > { %4822 = vrcp.f32 %v2832_v59 }
 0x4fb   : > { %4824 = vrcp.f32 %v2835_v50 }
 0x4fc   : > { %4826 = vrcp.f32 %v2833_v4 }
 0x4ff   : > { %v4813_v11 = vpop.eup %4812 }
 0x500   : > { %v4815_v18 = vpop.eup %4814  ;;  %v2838_v31 = vadd.f32 1.0, %v4813_v11 }
 0x501   : > { %v4817_v42 = vpop.eup %4816  ;;  %v2836_v5 = vadd.f32 1.0, %v4815_v18 }
 0x502   : > { %v4819_v36 = vpop.eup %4818  ;;  %4828 = vrcp.f32 %v2838_v31  ;;  %v2839_v52 = vadd.f32 1.0, %v4817_v42 }
 0x503   : > { %v4821_v48 = vpop.eup %4820  ;;  %4830 = vrcp.f32 %v2836_v5  ;;  %v2837_v37 = vadd.f32 1.0, %v4819_v36  ;;  %v4294_v60 = vpop.f32.mrb[40].mxu0 }
 0x504   : > { %v4823_v13 = vpop.eup %4822  ;;  %2930 = vst [vmem:[%s6924_s15 + $0x10] sm:$0xff] %v4821_v48  ;;  %4832 = vrcp.f32 %v2839_v52  ;;  %v2650_v26 = vadd.f32 %v4294_v60, %v6711_v12  ;;  %v2641_v51 = vpop.f32.mrb[41].mxu0 }
 0x505   : > { %v4825_v8 = vpop.eup %4824  ;;  %2928 = vst [vmem:[%s6924_s15] sm:$0xff] %v4823_v13  ;;  %4834 = vrcp.f32 %v2837_v37  ;;  %v2642_v32 = vadd.f32 %v6711_v12, %v2641_v51  ;;  %v4295_v41 = vpop.f32.mrb[42].mxu0 }
 0x506   : > { %v4827_v43 = vpop.eup %4826  ;;  %2931 = vst [vmem:[%s6924_s15 + $0x18] sm:$0xff] %v4825_v8  ;;  %v3932_v40 = vmul.f32 -1.442695, %v2650_v26  ;;  %v2653_v3 = vadd.f32 %v4295_v41, %v6711_v12  ;;  %v2644_v20 = vpop.f32.mrb[43].mxu0 }
 0x507   : > { %2929 = vst [vmem:[%s6924_s15 + $0x8] sm:$0xff] %v4827_v43  ;;  %v3930_v47 = vmul.f32 -1.442695, %v2642_v32  ;;  %v2645_v17 = vadd.f32 %v6711_v12, %v2644_v20 }
 0x508   : > { %4836 = vpow2.f32 %v3932_v40  ;;  %v3933_v44 = vmul.f32 -1.442695, %v2653_v3 }
 0x509   : > { %4838 = vpow2.f32 %v3930_v47  ;;  %v3931_v6 = vmul.f32 -1.442695, %v2645_v17 }
 0x50a   : > { %4840 = vpow2.f32 %v3933_v44 }
 0x50b   : > { %4842 = vpow2.f32 %v3931_v6 }
 0x50c   : > { %v4829_v46 = vpop.eup %4828 }
 0x50d   : > { %v4831_v22 = vpop.eup %4830  ;;  %2934 = vst [vmem:[%s6924_s15 + $0x30] sm:$0xff] %v4829_v46 }
 0x50e   : > { %v4833_v2 = vpop.eup %4832  ;;  %2932 = vst [vmem:[%s6924_s15 + $0x20] sm:$0xff] %v4831_v22 }
 0x50f   : > { %v4835_v54 = vpop.eup %4834  ;;  %2935 = vst [vmem:[%s6924_s15 + $0x38] sm:$0xff] %v4833_v2 }
 0x510   : > { %2933 = vst [vmem:[%s6924_s15 + $0x28] sm:$0xff] %v4835_v54 }
 0x512   : > { %v4837_v53 = vpop.eup %4836 }
 0x513   : > { %v4839_v24 = vpop.eup %4838  ;;  %v2842_v39 = vadd.f32 1.0, %v4837_v53 }
 0x514   : > { %v4841_v21 = vpop.eup %4840  ;;  %v2840_v0 = vadd.f32 1.0, %v4839_v24 }
 0x515   : > { %v4843_v10 = vpop.eup %4842  ;;  %4844 = vrcp.f32 %v2842_v39  ;;  %v2843_v34 = vadd.f32 1.0, %v4841_v21 }
 0x516   : > { %4846 = vrcp.f32 %v2840_v0  ;;  %v2841_v19 = vadd.f32 1.0, %v4843_v10 }
 0x517   : > { %4848 = vrcp.f32 %v2843_v34 }
 0x518   : > { %4850 = vrcp.f32 %v2841_v19 }
 0x51c   : > { %v4298_v27 = vpop.f32.mrb[44].mxu0 }
 0x51d   : > { %v2666_v63 = vadd.f32 %v4298_v27, %v6711_v12  ;;  %v2657_v7 = vpop.f32.mrb[45].mxu0 }
 0x51e   : > { %v2658_v30 = vadd.f32 %v6711_v12, %v2657_v7  ;;  %v4299_v15 = vpop.f32.mrb[46].mxu0 }
 0x51f   : > { %v3936_v58 = vmul.f32 -1.442695, %v2666_v63  ;;  %v2669_v45 = vadd.f32 %v4299_v15, %v6711_v12  ;;  %v2660_v25 = vpop.f32.mrb[47].mxu0  ;;  %v4845_v49 = vpop.eup %4844 }
 0x520   : > { %v3934_v29 = vmul.f32 -1.442695, %v2658_v30  ;;  %v2661_v62 = vadd.f32 %v6711_v12, %v2660_v25  ;;  %v4847_v56 = vpop.eup %4846  ;;  %2938 = vst [vmem:[%s6924_s15 + $0x50] sm:$0xff] %v4845_v49 }
 0x521   : > { %4852 = vpow2.f32 %v3936_v58  ;;  %v3937_v28 = vmul.f32 -1.442695, %v2669_v45  ;;  %v4849_v14 = vpop.eup %4848  ;;  %2936 = vst [vmem:[%s6924_s15 + $0x40] sm:$0xff] %v4847_v56 }
 0x522   : > { %4854 = vpow2.f32 %v3934_v29  ;;  %v3935_v9 = vmul.f32 -1.442695, %v2661_v62  ;;  %v4851_v16 = vpop.eup %4850  ;;  %2939 = vst [vmem:[%s6924_s15 + $0x58] sm:$0xff] %v4849_v14 }
 0x523   : > { %4856 = vpow2.f32 %v3937_v28  ;;  %2937 = vst [vmem:[%s6924_s15 + $0x48] sm:$0xff] %v4851_v16 }
 0x524   : > { %4858 = vpow2.f32 %v3935_v9 }
 0x52b   : > { %v4853_v57 = vpop.eup %4852 }
 0x52c   : > { %v4855_v33 = vpop.eup %4854  ;;  %v2846_v35 = vadd.f32 1.0, %v4853_v57 }
 0x52d   : > { %v4857_v55 = vpop.eup %4856  ;;  %v2844_v61 = vadd.f32 1.0, %v4855_v33 }
 0x52e   : > { %v4859_v1 = vpop.eup %4858  ;;  %4860 = vrcp.f32 %v2846_v35  ;;  %v2847_v38 = vadd.f32 1.0, %v4857_v55 }
 0x52f   : > { %4862 = vrcp.f32 %v2844_v61  ;;  %v2845_v59 = vadd.f32 1.0, %v4859_v1  ;;  %v3618_v1 = vpop.xlane.xlu1 %3617 }
 0x530   : > { %4864 = vrcp.f32 %v2847_v38 }
 0x531   : > { %4866 = vrcp.f32 %v2845_v59 }
 0x532   : > { %v4302_v23 = vpop.f32.mrb[48].mxu0 }
 0x533   : > { %v2682_v50 = vadd.f32 %v4302_v23, %v6711_v12  ;;  %v2673_v4 = vpop.f32.mrb[49].mxu0  ;;  %v3619_v23 = vrot.slane %v3618_v1, 4 }
 0x534   : > { %v2674_v11 = vadd.f32 %v6711_v12, %v2673_v4  ;;  %v4303_v18 = vpop.f32.mrb[50].mxu0 }
 0x535   : > { %v3940_v31 = vmul.f32 -1.442695, %v2682_v50  ;;  %v2685_v42 = vadd.f32 %v4303_v18, %v6711_v12  ;;  %v2676_v5 = vpop.f32.mrb[51].mxu0 }
 0x536   : > { %v3938_v36 = vmul.f32 -1.442695, %v2674_v11  ;;  %v2677_v52 = vadd.f32 %v6711_v12, %v2676_v5 }
 0x537   : > { %4868 = vpow2.f32 %v3940_v31  ;;  %v3941_v48 = vmul.f32 -1.442695, %v2685_v42 }
 0x538   : > { %4870 = vpow2.f32 %v3938_v36  ;;  %v3939_v37 = vmul.f32 -1.442695, %v2677_v52  ;;  %v4861_v60 = vpop.eup %4860  ;;  %v3620_v36 = vadd.f32 %v3619_v23, %v3618_v1 }
 0x539   : > { %4872 = vpow2.f32 %v3941_v48  ;;  %v4863_v13 = vpop.eup %4862  ;;  %2942 = vst [vmem:[%s6924_s15 + $0x70] sm:$0xff] %v4861_v60 }
 0x53a   : > { %4874 = vpow2.f32 %v3939_v37  ;;  %v4865_v26 = vpop.eup %4864  ;;  %2940 = vst [vmem:[%s6924_s15 + $0x60] sm:$0xff] %v4863_v13  ;;  %v3621_v60 = vrot.slane %v3620_v36, 2 }
 0x53b   : > { %v4867_v51 = vpop.eup %4866  ;;  %2943 = vst [vmem:[%s6924_s15 + $0x78] sm:$0xff] %v4865_v26 }
 0x53c   : > { %2941 = vst [vmem:[%s6924_s15 + $0x68] sm:$0xff] %v4867_v51 }
 0x541   : > { %v4869_v8 = vpop.eup %4868 }
 0x542   : > { %v4871_v32 = vpop.eup %4870  ;;  %v2850_v41 = vadd.f32 1.0, %v4869_v8 }
 0x543   : > { %v4873_v43 = vpop.eup %4872  ;;  %v2848_v40 = vadd.f32 1.0, %v4871_v32  ;;  %v3622_v32 = vadd.f32 %v3621_v60, %v3620_v36 }
 0x544   : > { %v4875_v3 = vpop.eup %4874  ;;  %4876 = vrcp.f32 %v2850_v41  ;;  %v2851_v20 = vadd.f32 1.0, %v4873_v43 }
 0x545   : > { %4878 = vrcp.f32 %v2848_v40  ;;  %v2849_v47 = vadd.f32 1.0, %v4875_v3 }
 0x546   : > { %4880 = vrcp.f32 %v2851_v20 }
 0x547   : > { %4882 = vrcp.f32 %v2849_v47 }
 0x54e   : > { %v4877_v17 = vpop.eup %4876 }
 0x54f   : > { %v4879_v44 = vpop.eup %4878  ;;  %2946 = vst [vmem:[%s6924_s15 + $0x90] sm:$0xff] %v4877_v17 }
 0x550   : > { %v4881_v6 = vpop.eup %4880  ;;  %2944 = vst [vmem:[%s6924_s15 + $0x80] sm:$0xff] %v4879_v44 }
 0x551   : > { %v4883_v46 = vpop.eup %4882  ;;  %2947 = vst [vmem:[%s6924_s15 + $0x98] sm:$0xff] %v4881_v6 }
 0x552   : > { %2945 = vst [vmem:[%s6924_s15 + $0x88] sm:$0xff] %v4883_v46 }
 0x556   : > { %v4306_v22 = vpop.f32.mrb[52].mxu0 }
 0x557   : > { %v2698_v2 = vadd.f32 %v4306_v22, %v6711_v12  ;;  %v2689_v54 = vpop.f32.mrb[53].mxu0 }
 0x558   : > { %v2690_v53 = vadd.f32 %v6711_v12, %v2689_v54  ;;  %v4307_v24 = vpop.f32.mrb[54].mxu0 }
 0x559   : > { %v3944_v39 = vmul.f32 -1.442695, %v2698_v2  ;;  %v2701_v21 = vadd.f32 %v4307_v24, %v6711_v12  ;;  %v2692_v0 = vpop.f32.mrb[55].mxu0 }
 0x55a   : > { %v3942_v10 = vmul.f32 -1.442695, %v2690_v53  ;;  %v2693_v34 = vadd.f32 %v6711_v12, %v2692_v0  ;;  %v3623_v53 = vrot.slane %v3622_v32, 1 }
 0x55b   : > { %4884 = vpow2.f32 %v3944_v39  ;;  %v3945_v19 = vmul.f32 -1.442695, %v2701_v21 }
 0x55c   : > { %4886 = vpow2.f32 %v3942_v10  ;;  %v3943_v27 = vmul.f32 -1.442695, %v2693_v34 }
 0x55d   : > { %4888 = vpow2.f32 %v3945_v19  ;;  %v3624_v19 = vadd.f32 %v3623_v53, %v3622_v32 }
 0x55e   : > { %4890 = vpow2.f32 %v3943_v27  ;;  %v4310_v63 = vpop.f32.mrb[56].mxu0 }
 0x55f   : > { %v2714_v7 = vadd.f32 %v4310_v63, %v6711_v12  ;;  %v2705_v30 = vpop.f32.mrb[57].mxu0 }
 0x560   : > { %v2706_v15 = vadd.f32 %v6711_v12, %v2705_v30  ;;  %v4311_v58 = vpop.f32.mrb[58].mxu0 }
 0x561   : > { %v3948_v45 = vmul.f32 -1.442695, %v2714_v7  ;;  %v2717_v25 = vadd.f32 %v4311_v58, %v6711_v12  ;;  %v2708_v49 = vpop.f32.mrb[59].mxu0 }
 0x562   : > { %v3946_v29 = vmul.f32 -1.442695, %v2706_v15  ;;  %v2709_v62 = vadd.f32 %v6711_v12, %v2708_v49 }
 0x563   : > { %4892 = vpow2.f32 %v3948_v45  ;;  %v3949_v56 = vmul.f32 -1.442695, %v2717_v25 }
 0x564   : > { %4894 = vpow2.f32 %v3946_v29  ;;  %v3947_v28 = vmul.f32 -1.442695, %v2709_v62 }
 0x565   : > { %v4885_v14 = vpop.eup %4884  ;;  %4896 = vpow2.f32 %v3949_v56 }
 0x566   : > { %v4887_v9 = vpop.eup %4886  ;;  %v2854_v16 = vadd.f32 1.0, %v4885_v14  ;;  %4898 = vpow2.f32 %v3947_v28  ;;  %v3632_v14 = vld [vmem:[#allocation7] sm:$0x1] }
 0x567   : > { %v4889_v57 = vpop.eup %4888  ;;  %v2852_v33 = vadd.f32 1.0, %v4887_v9 }
 0x568   : > { %v4891_v35 = vpop.eup %4890  ;;  %4900 = vrcp.f32 %v2854_v16  ;;  %v2855_v55 = vadd.f32 1.0, %v4889_v57 }
 0x569   : > { %4902 = vrcp.f32 %v2852_v33  ;;  %v2853_v61 = vadd.f32 1.0, %v4891_v35 }
 0x56a   : > { %4904 = vrcp.f32 %v2855_v55 }
 0x56b   : > { %4906 = vrcp.f32 %v2853_v61 }
 0x56d   : > { %v4893_v38 = vpop.eup %4892 }
 0x56e   : > { %v4895_v59 = vpop.eup %4894  ;;  %v2858_v50 = vadd.f32 1.0, %v4893_v38 }
 0x56f   : > { %v4897_v4 = vpop.eup %4896  ;;  %v2856_v11 = vadd.f32 1.0, %v4895_v59 }
 0x570   : > { %v4899_v18 = vpop.eup %4898  ;;  %4908 = vrcp.f32 %v2858_v50  ;;  %v2859_v31 = vadd.f32 1.0, %v4897_v4 }
 0x571   : > { %4910 = vrcp.f32 %v2856_v11  ;;  %v2857_v42 = vadd.f32 1.0, %v4899_v18 }
 0x572   : > { %v4901_v5 = vpop.eup %4900  ;;  %4912 = vrcp.f32 %v2859_v31 }
 0x573   : > { %v4903_v52 = vpop.eup %4902  ;;  %2950 = vst [vmem:[%s6924_s15 + $0xb0] sm:$0xff] %v4901_v5  ;;  %4914 = vrcp.f32 %v2857_v42 }
 0x574   : > { %v4905_v48 = vpop.eup %4904  ;;  %2948 = vst [vmem:[%s6924_s15 + $0xa0] sm:$0xff] %v4903_v52 }
 0x575   : > { %v4907_v37 = vpop.eup %4906  ;;  %2951 = vst [vmem:[%s6924_s15 + $0xb8] sm:$0xff] %v4905_v48 }
 0x576   : > { %2949 = vst [vmem:[%s6924_s15 + $0xa8] sm:$0xff] %v4907_v37  ;;  %v3577_v13 = vpop.xlane.xlu0 %3576 }
 0x577   : > { %v3578_v26 = vrot.slane %v3577_v13, 4 }
 0x579   : > { %v3579_v51 = vadd.f32 %v3578_v26, %v3577_v13 }
 0x57a   : > { %v4909_v8 = vpop.eup %4908 }
 0x57b   : > { %v4911_v41 = vpop.eup %4910  ;;  %2954 = vst [vmem:[%s6924_s15 + $0xd0] sm:$0xff] %v4909_v8  ;;  %v3580_v43 = vrot.slane %v3579_v51, 2  ;;  %v4314_v40 = vpop.f32.mrb[60].mxu0 }
 0x57c   : > { %v4913_v3 = vpop.eup %4912  ;;  %2952 = vst [vmem:[%s6924_s15 + $0xc0] sm:$0xff] %v4911_v41  ;;  %v2730_v20 = vadd.f32 %v4314_v40, %v6711_v12  ;;  %v2721_v47 = vpop.f32.mrb[61].mxu0 }
 0x57d   : > { %v4915_v17 = vpop.eup %4914  ;;  %2955 = vst [vmem:[%s6924_s15 + $0xd8] sm:$0xff] %v4913_v3  ;;  %v3581_v44 = vadd.f32 %v3580_v43, %v3579_v51  ;;  %v2722_v6 = vadd.f32 %v6711_v12, %v2721_v47  ;;  %v4315_v46 = vpop.f32.mrb[62].mxu0 }
 0x57e   : > { %2953 = vst [vmem:[%s6924_s15 + $0xc8] sm:$0xff] %v4915_v17  ;;  %v3952_v22 = vmul.f32 -1.442695, %v2730_v20  ;;  %v2733_v2 = vadd.f32 %v4315_v46, %v6711_v12  ;;  %v2724_v54 = vpop.f32.mrb[63].mxu0 }
 0x57f   : > { %v3950_v24 = vmul.f32 -1.442695, %v2722_v6  ;;  %v2725_v39 = vadd.f32 %v6711_v12, %v2724_v54  ;;  %v3582_v21 = vrot.slane %v3581_v44, 1 }
 0x580   : > { %4916 = vpow2.f32 %v3952_v22  ;;  %v3953_v0 = vmul.f32 -1.442695, %v2733_v2 }
 0x581   : > { %4918 = vpow2.f32 %v3950_v24  ;;  %v3951_v10 = vmul.f32 -1.442695, %v2725_v39  ;;  %v3583_v34 = vadd.f32 %v3582_v21, %v3581_v44 }
 0x582   : > { %4920 = vpow2.f32 %v3953_v0 }
 0x583   : > { %4922 = vpow2.f32 %v3951_v10  ;;  %4382 = vpush %v3583_v34 }
 0x584   : > { %4384 = vpush %v3624_v19 }
 0x58a   : > { %v4917_v27 = vpop.eup %4916 }
 0x58b   : > { %v4919_v63 = vpop.eup %4918  ;;  %v2862_v7 = vadd.f32 1.0, %v4917_v27 }
 0x58c   : > { %v4921_v30 = vpop.eup %4920  ;;  %v2860_v15 = vadd.f32 1.0, %v4919_v63 }
 0x58d   : > { %v4923_v58 = vpop.eup %4922  ;;  %4924 = vrcp.f32 %v2862_v7  ;;  %v2863_v45 = vadd.f32 1.0, %v4921_v30 }
 0x58e   : > { %4926 = vrcp.f32 %v2860_v15  ;;  %v2861_v12 = vadd.f32 1.0, %v4923_v58 }
 0x58f   : > { %4928 = vrcp.f32 %v2863_v45 }
 0x590   : > { %4930 = vrcp.f32 %v2861_v12 }
 0x597   : > { %v4925_v25 = vpop.eup %4924 }
 0x598   : > { %v4927_v49 = vpop.eup %4926  ;;  %2958 = vst [vmem:[%s6924_s15 + $0xf0] sm:$0xff] %v4925_v25 }
 0x599   : > { %v4929_v29 = vpop.eup %4928  ;;  %2956 = vst [vmem:[%s6924_s15 + $0xe0] sm:$0xff] %v4927_v49 }
 0x59a   : > { %v4931_v62 = vpop.eup %4930  ;;  %2959 = vst [vmem:[%s6924_s15 + $0xf8] sm:$0xff] %v4929_v29 }
 0x59b   : > { %2957 = vst [vmem:[%s6924_s15 + $0xe8] sm:$0xff] %v4931_v62 }
 0x5b4   : > { %s4383_s24 = spop %4382 }
 0x5b5   : > { %v3585_v56 = vstv %s4383_s24  ;;  %s4385_s30 = spop %4384 }
 0x5b6   : > { %v3626_v28 = vstv %s4385_s30 }
 0x5b7   : > { %v3627_v9 = vadd.f32 %v3626_v28, %v3585_v56 }
 0x5b9   : > { %v3633_v16 = vadd.f32 %v3632_v14, %v3627_v9 }
 0x5bb   : > { %3634 = vst.msk [vmem:[#allocation7] sm:$0x1] %vm1173_vm14, %v3633_v16 }
 0x5bc PF: > { %s7128_s18 = sadd.s32 4294967295, %s5017_s26   ;;  %s5021_s27 = smov [#allocation5]  }
 0x5bd   : > { %p6844_p6 = scmp.eq.s32.totalorder %s7128_s18, 1  ;;  %s3651_s1 = sshll.u32 %s5021_s27, 4  ;;  %s3652_s1 = int_to_ptr.vmem [resolvable:$true] %s3651_s1 }
 0x5be   : > { %s5022_s20 = smov [#allocation7]   ;;  %s4935_s22 = scalar_lea.vmem %s3652_s1, 16 }
 0x5bf   : > { %s3662_s21 = sshll.u32 %s5022_s20, 4  ;;  %p4936_p7 = scmp.ne.s32.totalorder %s3652_s1, %s4935_s22  ;;  %s6848_s21 = int_to_ptr.vmem [resolvable:$true] %s3662_s21 }
 0x5c0   : > { %s4941_s23 = scalar_lea.vmem %s3652_s1, 32  ;;  %p4942_p10 = scmp.lt.s32.totalorder %s3652_s1, %s3652_s1 }
 0x5c1   : > { %p4937_p8 = pnand %p4936_p7, %p6844_p6  ;;  %p4943_p11 = scmp.lt.s32.totalorder %s4941_s23, %s4935_s22 }
 0x5c3   : > { %p4938_p9 = pneg %p4937_p8  ;;  %p4944_p12 = por %p4943_p11, %p4942_p10 }
 0x5c5   : > { %p4945_p13 = pnand %p4944_p12, %p4938_p9 }
 0x5c7   : > { %4948 = shalt.err (!%p4945_p13)
}
 0x5c8   : > { %s4949_s18 = scalar_lea.hbm %s6925_s16, 16 }
 0x5c9   : > { %p4950_p0 = scmp.ne.s32.totalorder %s6925_s16, %s4949_s18  ;;  %p4955_p3 = scmp.lt.u32.totalorder %s4949_s18, %s6925_s16 }
 0x5cb   : > { %p4951_p1 = pnand %p4950_p0, %p6844_p6 }
 0x5cd   : > { %p4952_p2 = pneg %p4951_p1 }
 0x5cf   : > { %p4957_p4 = pnand %p4955_p3, %p4952_p2 }
 0x5d1   : > { %4960 = shalt.err (!%p4957_p4)
}
 0x5d2   : > { %4387 = dma.vmem_to_hbm [thread:$0]  (%p6844_p6), %s3652_s1, 16, %s6925_s16, [#allocation6]  }
 0x5d3   : > { %s4961_s24 = scalar_lea.vmem %s6848_s21, 16  ;;  %s4967_s2 = scalar_lea.vmem %s6848_s21, 32 }
 0x5d4   : > { %p4962_p5 = scmp.ne.s32.totalorder %s6848_s21, %s4961_s24  ;;  %p4968_p9 = scmp.lt.s32.totalorder %s6848_s21, %s6848_s21 }
 0x5d5   : > { %p4969_p10 = scmp.lt.s32.totalorder %s4967_s2, %s4961_s24 }
 0x5d6   : > { %p4963_p7 = pnand %p4962_p5, %p6844_p6 }
 0x5d7   : > { %p4970_p11 = por %p4969_p10, %p4968_p9 }
 0x5d8   : > { %p4964_p8 = pneg %p4963_p7 }
 0x5da   : > { %p4971_p12 = pnand %p4970_p11, %p4964_p8 }
 0x5dc   : > { %4974 = shalt.err (!%p4971_p12)
}
 0x5dd   : > { %s4975_s18 = scalar_lea.hbm %s6926_s17, 16 }
 0x5de   : > { %p4976_p13 = scmp.ne.s32.totalorder %s6926_s17, %s4975_s18  ;;  %p4981_p2 = scmp.lt.u32.totalorder %s4975_s18, %s6926_s17 }
 0x5e0   : > { %p4977_p0 = pnand %p4976_p13, %p6844_p6 }
 0x5e2   : > { %p4978_p1 = pneg %p4977_p0 }
 0x5e4   : > { %p4983_p3 = pnand %p4981_p2, %p4978_p1 }
 0x5e6   : > { %4986 = shalt.err (!%p4983_p3)
}
 0x5e7   : > { %4389 = dma.vmem_to_hbm [thread:$0]  (%p6844_p6), %s6848_s21, 16, %s6926_s17, [#allocation8]  }
 0x5e8   : > { %5000 = dma.done.wait (%p6844_p6), [#allocation6], 16  }
 0x5e9   : > { %5002 = vsyncadd (%p6844_p6), [#allocation6], 4294967280 }
 0x5ea   : > { %5004 = dma.done.wait (%p6844_p6), [#allocation8], 16  }
 0x5eb   : > { %5006 = vsyncadd (%p6844_p6), [#allocation8], 4294967280 }
 0x5ec PF: > { %s30_s26 = sadd.s32 1, %s5017_s26   ;;  %s7130_s24 = smov %s5013_s25 }
 0x5ed   : > { %p27_p4 = scmp.ge.s32.totalorder %s30_s26, 4   ;;  %s7131_s25 = smov %s7133_s28 }
 0x5ef   :  { %29 = sbr.rel (!%p27_p4) target bundleno = 7 (0x7), region = 144 }
 0x5f6   :  { %3687 = vsyncpa [#allocation6], 1 }
 0x5f7   :  { %3689 = vsyncpa [#allocation6 + $0x1], 1 }
 0x5f8   :  { %3690 = vsyncpa [#allocation8], 1 }

</bundles_post_ra>
